<compile_context>
chip_gen: v7x
topology: tpu7x:2x2x1
jax: 0.10.0
libtpu: 0.0.40
codegen_flags: <defaults>
</compile_context>

<pallas_src>
import jax
import jax.numpy as jnp
from jax.experimental import pallas as pl
from jax.experimental.pallas import tpu as pltpu

f32 = jnp.float32
bf16 = jnp.bfloat16


# ---------------------------------------------------------------------------
# Kernel 0: ConvTranspose2d(k=2, s=2).  One merged bf16 MXU matmul per sample:
# (H*W, Cin) @ (Cin, 4*C), RHS packed as (dy, dx, c).  The output array shape
# (N, H, 2, W, 2C) is row-major identical to the upsampled (N, 2H, 2W, C)
# tensor, so no transpose is ever materialized.
# ---------------------------------------------------------------------------
def upconv_kernel(x_ref, wup_ref, bup_ref, o_ref):
    _, H, W, Cin = x_ref.shape
    C4 = wup_ref.shape[-1]                      # 4 * out_c, packed (dy, dx, c)
    C2 = C4 // 2
    x2d = x_ref[0].reshape(H * W, Cin)          # bf16
    r = jnp.dot(x2d, wup_ref[...], preferred_element_type=jnp.float32)
    r = r + bup_ref[...]
    for dy in range(2):
        o_ref[0:1, :, dy:dy + 1, :, :] = (
            r[:, dy * C2:(dy + 1) * C2]
            .reshape(1, H, 1, W, C2).astype(jnp.bfloat16))


# ---------------------------------------------------------------------------
# Kernel 1: concat([up, skip]) + Conv3x3 (pre-BN) + per-sample BN partials.
# The concat is just two disjoint channel ranges of the bf16 dx-im2col
# scratch; the conv is 3 bf16 matmuls (one per dy tap) with K = 3 * 2C.
# ---------------------------------------------------------------------------
def concat_conv1_kernel(up_ref, skip_ref, w1_ref, y1_ref, s1_ref, cols_ref):
    _, Ho, Wo, C = up_ref.shape
    C2 = 2 * C
    K = 3 * C2
    Hp = Ho + 2

    up = up_ref[0]                              # (Ho, Wo, C) bf16
    sk = skip_ref[0]                            # (Ho, Wo, C) bf16

    # Halo of the bf16 im2col scratch (see header for why it is unconditional).
    cols_ref[0:1, :, :] = jnp.zeros((1, Wo, K), bf16)
    cols_ref[Hp - 1:Hp, :, :] = jnp.zeros((1, Wo, K), bf16)
    cols_ref[1:Hp - 1, 0:1, 0:C2] = jnp.zeros((Ho, 1, C2), bf16)
    cols_ref[1:Hp - 1, Wo - 1:Wo, 2 * C2:K] = jnp.zeros((Ho, 1, C2), bf16)

    # dx = -1 tap
    cols_ref[1:Hp - 1, 1:Wo, 0:C] = up[:, 0:Wo - 1, :]
    cols_ref[1:Hp - 1, 1:Wo, C:C2] = sk[:, 0:Wo - 1, :]
    # dx = 0 tap (channel-concat [up, skip] is just these two ranges)
    cols_ref[1:Hp - 1, :, C2:C2 + C] = up
    cols_ref[1:Hp - 1, :, C2 + C:2 * C2] = sk
    # dx = +1 tap
    cols_ref[1:Hp - 1, 0:Wo - 1, 2 * C2:2 * C2 + C] = up[:, 1:Wo, :]
    cols_ref[1:Hp - 1, 0:Wo - 1, 2 * C2 + C:K] = sk[:, 1:Wo, :]

    # conv1 = 3 bf16 MXU matmuls over dy, f32 accumulation, acc seeded by dy=0.
    # (conv1 bias is dropped: exactly cancelled by the BN mean subtraction.)
    acc = jnp.dot(cols_ref[0:Ho].reshape(Ho * Wo, K), w1_ref[0],
                  preferred_element_type=f32)
    for dy in range(1, 3):
        acc = acc + jnp.dot(cols_ref[dy:dy + Ho].reshape(Ho * Wo, K),
                            w1_ref[dy], preferred_element_type=f32)

    y1_ref[...] = acc.reshape(1, Ho, Wo, C).astype(bf16)

    # per-sample mean-shifted BN partials (stabler than raw sum / sumsq)
    mu = jnp.sum(acc, axis=0, keepdims=True) * (1.0 / (Ho * Wo))
    d = acc - mu
    s1_ref[0:1, 0:1, :] = mu.reshape(1, 1, C)
    s1_ref[0:1, 1:2, :] = jnp.sum(d * d, axis=0, keepdims=True).reshape(1, 1, C)


# ---------------------------------------------------------------------------
# Kernel 2: BN1 (precomputed scale/shift) + ReLU + Conv3x3 (pre-BN) + partials.
# ---------------------------------------------------------------------------
def bn_relu_conv2_kernel(y1_ref, sc_ref, sh_ref, w2_ref, y2_ref, s2_ref, cols_ref):
    _, Ho, Wo, C = y1_ref.shape
    K = 3 * C
    Hp = Ho + 2

    a = jnp.maximum(y1_ref[0].astype(f32) * sc_ref[...] + sh_ref[...], 0.0)
    a16 = a.astype(bf16)                        # cast once, taps reuse it

    cols_ref[0:1, :, :] = jnp.zeros((1, Wo, K), bf16)
    cols_ref[Hp - 1:Hp, :, :] = jnp.zeros((1, Wo, K), bf16)
    cols_ref[1:Hp - 1, 0:1, 0:C] = jnp.zeros((Ho, 1, C), bf16)
    cols_ref[1:Hp - 1, Wo - 1:Wo, 2 * C:K] = jnp.zeros((Ho, 1, C), bf16)

    cols_ref[1:Hp - 1, 1:Wo, 0:C] = a16[:, 0:Wo - 1, :]
    cols_ref[1:Hp - 1, :, C:2 * C] = a16
    cols_ref[1:Hp - 1, 0:Wo - 1, 2 * C:K] = a16[:, 1:Wo, :]

    acc = jnp.dot(cols_ref[0:Ho].reshape(Ho * Wo, K), w2_ref[0],
                  preferred_element_type=f32)
    for dy in range(1, 3):
        acc = acc + jnp.dot(cols_ref[dy:dy + Ho].reshape(Ho * Wo, K),
                            w2_ref[dy], preferred_element_type=f32)

    y2_ref[...] = acc.reshape(1, Ho, Wo, C).astype(bf16)

    mu = jnp.sum(acc, axis=0, keepdims=True) * (1.0 / (Ho * Wo))
    d = acc - mu
    s2_ref[0:1, 0:1, :] = mu.reshape(1, 1, C)
    s2_ref[0:1, 1:2, :] = jnp.sum(d * d, axis=0, keepdims=True).reshape(1, 1, C)


# ---------------------------------------------------------------------------
# Kernel 3: BN2 finalize + ReLU (bf16 output: this pass is purely HBM-bound).
# ---------------------------------------------------------------------------
def bn_relu_kernel(y2_ref, sc_ref, sh_ref, o_ref):
    _, Ho, Wo, C = y2_ref.shape
    y = jnp.maximum(y2_ref[0].astype(f32) * sc_ref[...] + sh_ref[...], 0.0)
    o_ref[...] = y.reshape(1, Ho, Wo, C).astype(o_ref.dtype)


# ---------------------------------------------------------------------------
# Wrapper
# ---------------------------------------------------------------------------
def _vmem_limit_bytes():
    # Generation-dependent budget: ~3/4 of physical VMEM, capped at 100 MiB.
    # v7x (64 MiB physical) -> 48 MiB; v5e/v6e (128 MiB) -> 96 MiB.
    try:
        cap = pltpu.get_tpu_info().vmem_capacity_bytes
    except Exception:
        cap = 128 * 1024 * 1024
    return int(min(cap * 3 // 4, 100 * 1024 * 1024))


def _bn_finalize(stats, gamma, beta, n_per_sample, eps=1e-5):
    """Merge per-sample (mean, centered sum-sq) partials into BN scale/shift."""
    mu_s = stats[:, 0, :]                       # (N, C)
    css_s = stats[:, 1, :]                      # (N, C)
    M = stats.shape[0] * n_per_sample
    mean = jnp.mean(mu_s, axis=0)
    var = (jnp.sum(css_s, axis=0)
           + n_per_sample * jnp.sum((mu_s - mean) ** 2, axis=0)) / M
    var = jnp.maximum(var, 0.0)
    inv = jax.lax.rsqrt(var + eps)
    C = mean.shape[0]
    scale = (gamma * inv).reshape(1, C).astype(f32)
    shift = (beta - mean * gamma * inv).reshape(1, C).astype(f32)
    return scale, shift


def decoder_block_forward(x, skip, params):
    N, H, W, Cin = x.shape
    C = params["w_up"].shape[-1]
    Ho, Wo = 2 * H, 2 * W
    C2 = 2 * C

    # bf16 MXU operands: inputs + packed weights (tiny host/XLA-side packing)
    x16 = x.astype(bf16)
    skip16 = skip.astype(bf16)
    wup_r = params["w_up"].reshape(Cin, 4 * C).astype(bf16)       # (cin, dy*2C+dx*C+c)
    bup_r = jnp.tile(params["b_up"], 4).reshape(1, 4 * C).astype(f32)
    w1_r = params["w1"].reshape(3, 3 * C2, C).astype(bf16)        # (ky, kx*cin, cout)
    w2_r = params["w2"].reshape(3, 3 * C, C).astype(bf16)

    cparams = pltpu.CompilerParams(
        dimension_semantics=("parallel",),
        vmem_limit_bytes=_vmem_limit_bytes(),
    )

    # --- pass 0: ConvTranspose2d(k=2, s=2), layout-punned bf16 output ---
    up_raw = pl.pallas_call(
        upconv_kernel,
        out_shape=jax.ShapeDtypeStruct((N, H, 2, W, C2), bf16),
        grid_spec=pltpu.PrefetchScalarGridSpec(
            num_scalar_prefetch=0,
            grid=(N,),
            in_specs=[
                pl.BlockSpec((1, H, W, Cin), lambda n: (n, 0, 0, 0)),
                pl.BlockSpec((Cin, 4 * C), lambda n: (0, 0)),
                pl.BlockSpec((1, 4 * C), lambda n: (0, 0)),
            ],
            out_specs=pl.BlockSpec((1, H, 2, W, C2), lambda n: (n, 0, 0, 0, 0)),
        ),
        compiler_params=cparams,
    )(x16, wup_r, bup_r)
    # free, layout-preserving reinterpretation: (N,H,2,W,2C) == (N,2H,2W,C)
    up = up_raw.reshape(N, Ho, Wo, C)

    # --- pass 1: concat + conv1 + per-sample BN1 partials ---
    y1, s1 = pl.pallas_call(
        concat_conv1_kernel,
        out_shape=(
            jax.ShapeDtypeStruct((N, Ho, Wo, C), bf16),
            jax.ShapeDtypeStruct((N, 2, C), f32),
        ),
        grid_spec=pltpu.PrefetchScalarGridSpec(
            num_scalar_prefetch=0,
            grid=(N,),
            in_specs=[
                pl.BlockSpec((1, Ho, Wo, C), lambda n: (n, 0, 0, 0)),
                pl.BlockSpec((1, Ho, Wo, C), lambda n: (n, 0, 0, 0)),
                pl.BlockSpec((3, 3 * C2, C), lambda n: (0, 0, 0)),
            ],
            out_specs=[
                pl.BlockSpec((1, Ho, Wo, C), lambda n: (n, 0, 0, 0)),
                pl.BlockSpec((1, 2, C), lambda n: (n, 0, 0)),
            ],
            scratch_shapes=[pltpu.VMEM((Ho + 2, Wo, 3 * C2), bf16)],
        ),
        compiler_params=cparams,
    )(up, skip16, w1_r)

    scale1, shift1 = _bn_finalize(s1, params["g1"], params["bt1"], Ho * Wo)

    # --- pass 2: BN1 + ReLU + conv2 + per-sample BN2 partials ---
    y2, s2 = pl.pallas_call(
        bn_relu_conv2_kernel,
        out_shape=(
            jax.ShapeDtypeStruct((N, Ho, Wo, C), bf16),
            jax.ShapeDtypeStruct((N, 2, C), f32),
        ),
        grid_spec=pltpu.PrefetchScalarGridSpec(
            num_scalar_prefetch=0,
            grid=(N,),
            in_specs=[
                pl.BlockSpec((1, Ho, Wo, C), lambda n: (n, 0, 0, 0)),
                pl.BlockSpec((1, C), lambda n: (0, 0)),
                pl.BlockSpec((1, C), lambda n: (0, 0)),
                pl.BlockSpec((3, 3 * C, C), lambda n: (0, 0, 0)),
            ],
            out_specs=[
                pl.BlockSpec((1, Ho, Wo, C), lambda n: (n, 0, 0, 0)),
                pl.BlockSpec((1, 2, C), lambda n: (n, 0, 0)),
            ],
            scratch_shapes=[pltpu.VMEM((Ho + 2, Wo, 3 * C), bf16)],
        ),
        compiler_params=cparams,
    )(y1, scale1, shift1, w2_r)

    scale2, shift2 = _bn_finalize(s2, params["g2"], params["bt2"], Ho * Wo)

    # --- pass 3: BN2 + ReLU finalize (bf16 output, HBM-bound pass) ---
    out = pl.pallas_call(
        bn_relu_kernel,
        out_shape=jax.ShapeDtypeStruct((N, Ho, Wo, C), bf16),
        grid_spec=pltpu.PrefetchScalarGridSpec(
            num_scalar_prefetch=0,
            grid=(N,),
            in_specs=[
                pl.BlockSpec((1, Ho, Wo, C), lambda n: (n, 0, 0, 0)),
                pl.BlockSpec((1, C), lambda n: (0, 0)),
                pl.BlockSpec((1, C), lambda n: (0, 0)),
            ],
            out_specs=pl.BlockSpec((1, Ho, Wo, C), lambda n: (n, 0, 0, 0)),
        ),
        compiler_params=cparams,
    )(y2, scale2, shift2)
    return out


def init_params(key, in_c, out_c):
    ks = jax.random.split(key, 6)
    s = 0.1
    return dict(
        w_up=s * jax.random.normal(ks[0], (in_c, 2, 2, out_c), jnp.float32),
        b_up=s * jax.random.normal(ks[1], (out_c,), jnp.float32),
        w1=s * jax.random.normal(ks[2], (3, 3, 2 * out_c, out_c), jnp.float32),
        b1=s * jax.random.normal(ks[3], (out_c,), jnp.float32),
        g1=jnp.ones((out_c,), jnp.float32),
        bt1=jnp.zeros((out_c,), jnp.float32),
        w2=s * jax.random.normal(ks[4], (3, 3, out_c, out_c), jnp.float32),
        b2=s * jax.random.normal(ks[5], (out_c,), jnp.float32),
        g2=jnp.ones((out_c,), jnp.float32),
        bt2=jnp.zeros((out_c,), jnp.float32),
    )


# Pure-JAX f32 reference (faithful to the torch module, biases included,
# training-mode BatchNorm with biased variance, eps=1e-5).  Note: the Pallas
# path drops b1/b2 because training-mode BN with batch statistics cancels
# them exactly; reinstate them if running-stats (inference) BN is ever used.
def reference_forward(x, skip, p):
    N, H, W, Cin = x.shape
    C = p["w_up"].shape[-1]
    up = jnp.einsum("nhwc,cijd->nhwijd", x, p["w_up"]) + p["b_up"]
    up = up.transpose(0, 1, 3, 2, 4, 5).reshape(N, 2 * H, 2 * W, C)
    h = jnp.concatenate([up, skip], axis=-1)

    def conv_bn_relu(h, w, b, g, bt):
        y = jax.lax.conv_general_dilated(
            h, w, window_strides=(1, 1), padding="SAME",
            dimension_numbers=("NHWC", "HWIO", "NHWC")) + b
        mean = jnp.mean(y, axis=(0, 1, 2), keepdims=True)
        var = jnp.mean((y - mean) ** 2, axis=(0, 1, 2), keepdims=True)
        return jnp.maximum((y - mean) * jax.lax.rsqrt(var + 1e-5) * g + bt, 0.0)

    h = conv_bn_relu(h, p["w1"], p["b1"], p["g1"], p["bt1"])
    h = conv_bn_relu(h, p["w2"], p["b2"], p["g2"], p["bt2"])
    return h


if __name__ == "__main__":
    key = jax.random.PRNGKey(0)
    k_x, k_s, k_p = jax.random.split(key, 3)
    N, in_c, out_c, H, W = 2, 8, 4, 8, 8

    x = jax.random.normal(k_x, (N, H, W, in_c), jnp.float32)              # NHWC
    skip = jax.random.normal(k_s, (N, 2 * H, 2 * W, out_c), jnp.float32)  # NHWC
    params = init_params(k_p, in_c, out_c)

    fwd = jax.jit(decoder_block_forward)
    out = jax.block_until_ready(fwd(x, skip, params))

    ref = reference_forward(x, skip, params)
    assert out.shape == (N, 2 * H, 2 * W, out_c)
    out_f32 = jnp.asarray(out, jnp.float32)
    err = float(jnp.max(jnp.abs(out_f32 - ref)))
    # bf16 MXU operands, bf16 intermediates and bf16 output
    # (f32 accumulation, f32 BN statistics)
    assert jnp.allclose(out_f32, ref, atol=3e-2, rtol=3e-2), f"max abs err = {err}"
    print("KERNEL_OK")
</pallas_src>

<mosaic_0001>
module attributes {stable_mosaic.version = 11 : i64} {
  func.func @upconv_kernel(%arg0: i32, %arg1: memref<1x8x8x8xbf16, #tpu.memory_space<vmem>>, %arg2: memref<8x16xbf16, #tpu.memory_space<vmem>>, %arg3: memref<1x16xf32, #tpu.memory_space<vmem>>, %arg4: memref<1x8x2x8x8xbf16, #tpu.memory_space<vmem>>) attributes {dimension_semantics = [#tpu.dimension_semantics<parallel>], iteration_bounds = array<i64: 2>, scalar_prefetch = 0 : i64, scratch_operands = 0 : i64, tpu.core_type = #tpu.core_type<tc>, window_params = [{transform_indices = @transform_0, window_bounds = array<i64: 1, 8, 8, 8>}, {pipeline_mode = #tpu.pipeline_mode<synchronous>, transform_indices = @transform_1, window_bounds = array<i64: 8, 16>}, {pipeline_mode = #tpu.pipeline_mode<synchronous>, transform_indices = @transform_2, window_bounds = array<i64: 1, 16>}, {transform_indices = @transform_3, window_bounds = array<i64: 1, 8, 2, 8, 8>}]} {
    %c0 = arith.constant 0 : index
    %c0_0 = arith.constant 0 : index
    %c0_1 = arith.constant 0 : index
    %c0_2 = arith.constant 0 : index
    %0 = vector.load %arg1[%c0, %c0_0, %c0_1, %c0_2] : memref<1x8x8x8xbf16, #tpu.memory_space<vmem>>, vector<1x8x8x8xbf16>
    %1 = vector.shape_cast %0 : vector<1x8x8x8xbf16> to vector<8x8x8xbf16>
    %2 = vector.shape_cast %1 : vector<8x8x8xbf16> to vector<64x8xbf16>
    %c0_3 = arith.constant 0 : index
    %c0_4 = arith.constant 0 : index
    %3 = vector.load %arg2[%c0_3, %c0_4] : memref<8x16xbf16, #tpu.memory_space<vmem>>, vector<8x16xbf16>
    %cst = arith.constant dense<0.000000e+00> : vector<64x16xf32>
    %4 = tpu.matmul %2, %3, %cst {dimension_numbers = #tpu.dot_dimension_numbers<[1], [0], [0], [1], [0, 0, 1, 1], [], []>} : vector<64x8xbf16>, vector<8x16xbf16>, vector<64x16xf32> -> vector<64x16xf32>
    %c0_5 = arith.constant 0 : index
    %c0_6 = arith.constant 0 : index
    %5 = vector.load %arg3[%c0_5, %c0_6] : memref<1x16xf32, #tpu.memory_space<vmem>>, vector<1x16xf32>
    %6 = vector.broadcast %5 : vector<1x16xf32> to vector<64x16xf32>
    %7 = arith.addf %4, %6 : vector<64x16xf32>
    %8 = vector.extract_strided_slice %7 {offsets = [0, 0], sizes = [64, 8], strides = [1, 1]} : vector<64x16xf32> to vector<64x8xf32>
    %9 = vector.shape_cast %8 : vector<64x8xf32> to vector<1x8x1x8x8xf32>
    %10 = arith.truncf %9 : vector<1x8x1x8x8xf32> to vector<1x8x1x8x8xbf16>
    %c0_7 = arith.constant 0 : index
    %c0_8 = arith.constant 0 : index
    %c0_9 = arith.constant 0 : index
    %c0_10 = arith.constant 0 : index
    %c0_11 = arith.constant 0 : index
    %11 = vector.load %arg4[%c0_7, %c0_8, %c0_9, %c0_10, %c0_11] : memref<1x8x2x8x8xbf16, #tpu.memory_space<vmem>>, vector<1x8x1x8x8xbf16>
    tpu.vector_store %arg4[%c0_7, %c0_8, %c0_9, %c0_10, %c0_11], %10 {strides = array<i32>} : memref<1x8x2x8x8xbf16, #tpu.memory_space<vmem>>, vector<1x8x1x8x8xbf16>,
    %12 = vector.extract_strided_slice %7 {offsets = [0, 8], sizes = [64, 8], strides = [1, 1]} : vector<64x16xf32> to vector<64x8xf32>
    %13 = vector.shape_cast %12 : vector<64x8xf32> to vector<1x8x1x8x8xf32>
    %14 = arith.truncf %13 : vector<1x8x1x8x8xf32> to vector<1x8x1x8x8xbf16>
    %c0_12 = arith.constant 0 : index
    %c0_13 = arith.constant 0 : index
    %c1 = arith.constant 1 : index
    %c0_14 = arith.constant 0 : index
    %c0_15 = arith.constant 0 : index
    %15 = vector.load %arg4[%c0_12, %c0_13, %c1, %c0_14, %c0_15] : memref<1x8x2x8x8xbf16, #tpu.memory_space<vmem>>, vector<1x8x1x8x8xbf16>
    tpu.vector_store %arg4[%c0_12, %c0_13, %c1, %c0_14, %c0_15], %14 {strides = array<i32>} : memref<1x8x2x8x8xbf16, #tpu.memory_space<vmem>>, vector<1x8x1x8x8xbf16>,
    return
  }
  func.func @transform_0(%arg0: i32) -> (i32, i32, i32, i32) {
    %c0_i32 = arith.constant 0 : i32
    %c0_i32_0 = arith.constant 0 : i32
    %c0_i32_1 = arith.constant 0 : i32
    %c0_i32_2 = arith.constant 0 : i32
    return %arg0, %c0_i32, %c0_i32_0, %c0_i32_1 : i32, i32, i32, i32
  }
  func.func @transform_1(%arg0: i32) -> (i32, i32) {
    %c0_i32 = arith.constant 0 : i32
    %c0_i32_0 = arith.constant 0 : i32
    %c0_i32_1 = arith.constant 0 : i32
    return %c0_i32, %c0_i32_0 : i32, i32
  }
  func.func @transform_2(%arg0: i32) -> (i32, i32) {
    %c0_i32 = arith.constant 0 : i32
    %c0_i32_0 = arith.constant 0 : i32
    %c0_i32_1 = arith.constant 0 : i32
    return %c0_i32, %c0_i32_0 : i32, i32
  }
  func.func @transform_3(%arg0: i32) -> (i32, i32, i32, i32, i32) {
    %c0_i32 = arith.constant 0 : i32
    %c0_i32_0 = arith.constant 0 : i32
    %c0_i32_1 = arith.constant 0 : i32
    %c0_i32_2 = arith.constant 0 : i32
    %c0_i32_3 = arith.constant 0 : i32
    return %arg0, %c0_i32, %c0_i32_0, %c0_i32_1, %c0_i32_2 : i32, i32, i32, i32, i32
  }
}

module attributes {stable_mosaic.version = 11 : i64} {
  func.func @concat_conv1_kernel(%arg0: i32, %arg1: memref<1x16x16x4xbf16, #tpu.memory_space<vmem>>, %arg2: memref<1x16x16x4xbf16, #tpu.memory_space<vmem>>, %arg3: memref<3x24x4xbf16, #tpu.memory_space<vmem>>, %arg4: memref<1x16x16x4xbf16, #tpu.memory_space<vmem>>, %arg5: memref<1x2x4xf32, #tpu.memory_space<vmem>>, %arg6: memref<18x16x24xbf16, #tpu.memory_space<vmem>>) attributes {dimension_semantics = [#tpu.dimension_semantics<parallel>], iteration_bounds = array<i64: 2>, scalar_prefetch = 0 : i64, scratch_operands = 1 : i64, tpu.core_type = #tpu.core_type<tc>, window_params = [{transform_indices = @transform_0, window_bounds = array<i64: 1, 16, 16, 4>}, {transform_indices = @transform_1, window_bounds = array<i64: 1, 16, 16, 4>}, {pipeline_mode = #tpu.pipeline_mode<synchronous>, transform_indices = @transform_2, window_bounds = array<i64: 3, 24, 4>}, {transform_indices = @transform_3, window_bounds = array<i64: 1, 16, 16, 4>}, {transform_indices = @transform_4, window_bounds = array<i64: 1, 2, 4>}]} {
    %c0 = arith.constant 0 : index
    %c0_0 = arith.constant 0 : index
    %c0_1 = arith.constant 0 : index
    %c0_2 = arith.constant 0 : index
    %0 = vector.load %arg1[%c0, %c0_0, %c0_1, %c0_2] : memref<1x16x16x4xbf16, #tpu.memory_space<vmem>>, vector<1x16x16x4xbf16>
    %1 = vector.shape_cast %0 : vector<1x16x16x4xbf16> to vector<16x16x4xbf16>
    %c0_3 = arith.constant 0 : index
    %c0_4 = arith.constant 0 : index
    %c0_5 = arith.constant 0 : index
    %c0_6 = arith.constant 0 : index
    %2 = vector.load %arg2[%c0_3, %c0_4, %c0_5, %c0_6] : memref<1x16x16x4xbf16, #tpu.memory_space<vmem>>, vector<1x16x16x4xbf16>
    %3 = vector.shape_cast %2 : vector<1x16x16x4xbf16> to vector<16x16x4xbf16>
    %cst = arith.constant 0.000000e+00 : bf16
    %4 = vector.broadcast %cst : bf16 to vector<1x16x24xbf16>
    %c0_7 = arith.constant 0 : index
    %c0_8 = arith.constant 0 : index
    %c0_9 = arith.constant 0 : index
    %5 = vector.load %arg6[%c0_7, %c0_8, %c0_9] : memref<18x16x24xbf16, #tpu.memory_space<vmem>>, vector<1x16x24xbf16>
    tpu.vector_store %arg6[%c0_7, %c0_8, %c0_9], %4 {strides = array<i32>} : memref<18x16x24xbf16, #tpu.memory_space<vmem>>, vector<1x16x24xbf16>,
    %cst_10 = arith.constant 0.000000e+00 : bf16
    %6 = vector.broadcast %cst_10 : bf16 to vector<1x16x24xbf16>
    %c17 = arith.constant 17 : index
    %c0_11 = arith.constant 0 : index
    %c0_12 = arith.constant 0 : index
    %7 = vector.load %arg6[%c17, %c0_11, %c0_12] : memref<18x16x24xbf16, #tpu.memory_space<vmem>>, vector<1x16x24xbf16>
    tpu.vector_store %arg6[%c17, %c0_11, %c0_12], %6 {strides = array<i32>} : memref<18x16x24xbf16, #tpu.memory_space<vmem>>, vector<1x16x24xbf16>,
    %cst_13 = arith.constant 0.000000e+00 : bf16
    %8 = vector.broadcast %cst_13 : bf16 to vector<16x1x8xbf16>
    %c1 = arith.constant 1 : index
    %c0_14 = arith.constant 0 : index
    %c0_15 = arith.constant 0 : index
    %9 = vector.load %arg6[%c1, %c0_14, %c0_15] : memref<18x16x24xbf16, #tpu.memory_space<vmem>>, vector<16x1x8xbf16>
    tpu.vector_store %arg6[%c1, %c0_14, %c0_15], %8 {strides = array<i32>} : memref<18x16x24xbf16, #tpu.memory_space<vmem>>, vector<16x1x8xbf16>,
    %cst_16 = arith.constant 0.000000e+00 : bf16
    %10 = vector.broadcast %cst_16 : bf16 to vector<16x1x8xbf16>
    %c1_17 = arith.constant 1 : index
    %c15 = arith.constant 15 : index
    %c16 = arith.constant 16 : index
    %11 = vector.load %arg6[%c1_17, %c15, %c16] : memref<18x16x24xbf16, #tpu.memory_space<vmem>>, vector<16x1x8xbf16>
    tpu.vector_store %arg6[%c1_17, %c15, %c16], %10 {strides = array<i32>} : memref<18x16x24xbf16, #tpu.memory_space<vmem>>, vector<16x1x8xbf16>,
    %12 = vector.extract_strided_slice %1 {offsets = [0, 0, 0], sizes = [16, 15, 4], strides = [1, 1, 1]} : vector<16x16x4xbf16> to vector<16x15x4xbf16>
    %c1_18 = arith.constant 1 : index
    %c1_19 = arith.constant 1 : index
    %c0_20 = arith.constant 0 : index
    %13 = vector.load %arg6[%c1_18, %c1_19, %c0_20] : memref<18x16x24xbf16, #tpu.memory_space<vmem>>, vector<16x15x4xbf16>
    tpu.vector_store %arg6[%c1_18, %c1_19, %c0_20], %12 {strides = array<i32>} : memref<18x16x24xbf16, #tpu.memory_space<vmem>>, vector<16x15x4xbf16>,
    %14 = vector.extract_strided_slice %3 {offsets = [0, 0, 0], sizes = [16, 15, 4], strides = [1, 1, 1]} : vector<16x16x4xbf16> to vector<16x15x4xbf16>
    %c1_21 = arith.constant 1 : index
    %c1_22 = arith.constant 1 : index
    %c4 = arith.constant 4 : index
    %15 = vector.load %arg6[%c1_21, %c1_22, %c4] : memref<18x16x24xbf16, #tpu.memory_space<vmem>>, vector<16x15x4xbf16>
    tpu.vector_store %arg6[%c1_21, %c1_22, %c4], %14 {strides = array<i32>} : memref<18x16x24xbf16, #tpu.memory_space<vmem>>, vector<16x15x4xbf16>,
    %c1_23 = arith.constant 1 : index
    %c0_24 = arith.constant 0 : index
    %c8 = arith.constant 8 : index
    %16 = vector.load %arg6[%c1_23, %c0_24, %c8] : memref<18x16x24xbf16, #tpu.memory_space<vmem>>, vector<16x16x4xbf16>
    tpu.vector_store %arg6[%c1_23, %c0_24, %c8], %1 {strides = array<i32>} : memref<18x16x24xbf16, #tpu.memory_space<vmem>>, vector<16x16x4xbf16>,
    %c1_25 = arith.constant 1 : index
    %c0_26 = arith.constant 0 : index
    %c12 = arith.constant 12 : index
    %17 = vector.load %arg6[%c1_25, %c0_26, %c12] : memref<18x16x24xbf16, #tpu.memory_space<vmem>>, vector<16x16x4xbf16>
    tpu.vector_store %arg6[%c1_25, %c0_26, %c12], %3 {strides = array<i32>} : memref<18x16x24xbf16, #tpu.memory_space<vmem>>, vector<16x16x4xbf16>,
    %18 = vector.extract_strided_slice %1 {offsets = [0, 1, 0], sizes = [16, 15, 4], strides = [1, 1, 1]} : vector<16x16x4xbf16> to vector<16x15x4xbf16>
    %c1_27 = arith.constant 1 : index
    %c0_28 = arith.constant 0 : index
    %c16_29 = arith.constant 16 : index
    %19 = vector.load %arg6[%c1_27, %c0_28, %c16_29] : memref<18x16x24xbf16, #tpu.memory_space<vmem>>, vector<16x15x4xbf16>
    tpu.vector_store %arg6[%c1_27, %c0_28, %c16_29], %18 {strides = array<i32>} : memref<18x16x24xbf16, #tpu.memory_space<vmem>>, vector<16x15x4xbf16>,
    %20 = vector.extract_strided_slice %3 {offsets = [0, 1, 0], sizes = [16, 15, 4], strides = [1, 1, 1]} : vector<16x16x4xbf16> to vector<16x15x4xbf16>
    %c1_30 = arith.constant 1 : index
    %c0_31 = arith.constant 0 : index
    %c20 = arith.constant 20 : index
    %21 = vector.load %arg6[%c1_30, %c0_31, %c20] : memref<18x16x24xbf16, #tpu.memory_space<vmem>>, vector<16x15x4xbf16>
    tpu.vector_store %arg6[%c1_30, %c0_31, %c20], %20 {strides = array<i32>} : memref<18x16x24xbf16, #tpu.memory_space<vmem>>, vector<16x15x4xbf16>,
    %c0_32 = arith.constant 0 : index
    %c0_33 = arith.constant 0 : index
    %c0_34 = arith.constant 0 : index
    %22 = vector.load %arg6[%c0_32, %c0_33, %c0_34] : memref<18x16x24xbf16, #tpu.memory_space<vmem>>, vector<16x16x24xbf16>
    %23 = vector.shape_cast %22 : vector<16x16x24xbf16> to vector<256x24xbf16>
    %c0_35 = arith.constant 0 : index
    %c0_36 = arith.constant 0 : index
    %c0_37 = arith.constant 0 : index
    %24 = vector.load %arg3[%c0_35, %c0_36, %c0_37] : memref<3x24x4xbf16, #tpu.memory_space<vmem>>, vector<1x24x4xbf16>
    %25 = vector.shape_cast %24 : vector<1x24x4xbf16> to vector<24x4xbf16>
    %cst_38 = arith.constant dense<0.000000e+00> : vector<256x4xf32>
    %26 = tpu.matmul %23, %25, %cst_38 {dimension_numbers = #tpu.dot_dimension_numbers<[1], [0], [0], [1], [0, 0, 1, 1], [], []>} : vector<256x24xbf16>, vector<24x4xbf16>, vector<256x4xf32> -> vector<256x4xf32>
    %c1_39 = arith.constant 1 : index
    %c0_40 = arith.constant 0 : index
    %c0_41 = arith.constant 0 : index
    %27 = vector.load %arg6[%c1_39, %c0_40, %c0_41] : memref<18x16x24xbf16, #tpu.memory_space<vmem>>, vector<16x16x24xbf16>
    %28 = vector.shape_cast %27 : vector<16x16x24xbf16> to vector<256x24xbf16>
    %c1_42 = arith.constant 1 : index
    %c0_43 = arith.constant 0 : index
    %c0_44 = arith.constant 0 : index
    %29 = vector.load %arg3[%c1_42, %c0_43, %c0_44] : memref<3x24x4xbf16, #tpu.memory_space<vmem>>, vector<1x24x4xbf16>
    %30 = vector.shape_cast %29 : vector<1x24x4xbf16> to vector<24x4xbf16>
    %cst_45 = arith.constant dense<0.000000e+00> : vector<256x4xf32>
    %31 = tpu.matmul %28, %30, %cst_45 {dimension_numbers = #tpu.dot_dimension_numbers<[1], [0], [0], [1], [0, 0, 1, 1], [], []>} : vector<256x24xbf16>, vector<24x4xbf16>, vector<256x4xf32> -> vector<256x4xf32>
    %32 = arith.addf %26, %31 : vector<256x4xf32>
    %c2 = arith.constant 2 : index
    %c0_46 = arith.constant 0 : index
    %c0_47 = arith.constant 0 : index
    %33 = vector.load %arg6[%c2, %c0_46, %c0_47] : memref<18x16x24xbf16, #tpu.memory_space<vmem>>, vector<16x16x24xbf16>
    %34 = vector.shape_cast %33 : vector<16x16x24xbf16> to vector<256x24xbf16>
    %c2_48 = arith.constant 2 : index
    %c0_49 = arith.constant 0 : index
    %c0_50 = arith.constant 0 : index
    %35 = vector.load %arg3[%c2_48, %c0_49, %c0_50] : memref<3x24x4xbf16, #tpu.memory_space<vmem>>, vector<1x24x4xbf16>
    %36 = vector.shape_cast %35 : vector<1x24x4xbf16> to vector<24x4xbf16>
    %cst_51 = arith.constant dense<0.000000e+00> : vector<256x4xf32>
    %37 = tpu.matmul %34, %36, %cst_51 {dimension_numbers = #tpu.dot_dimension_numbers<[1], [0], [0], [1], [0, 0, 1, 1], [], []>} : vector<256x24xbf16>, vector<24x4xbf16>, vector<256x4xf32> -> vector<256x4xf32>
    %38 = arith.addf %32, %37 : vector<256x4xf32>
    %39 = vector.shape_cast %38 : vector<256x4xf32> to vector<1x16x16x4xf32>
    %40 = arith.truncf %39 : vector<1x16x16x4xf32> to vector<1x16x16x4xbf16>
    %c0_52 = arith.constant 0 : index
    %c0_53 = arith.constant 0 : index
    %c0_54 = arith.constant 0 : index
    %c0_55 = arith.constant 0 : index
    %41 = vector.load %arg4[%c0_52, %c0_53, %c0_54, %c0_55] : memref<1x16x16x4xbf16, #tpu.memory_space<vmem>>, vector<1x16x16x4xbf16>
    tpu.vector_store %arg4[%c0_52, %c0_53, %c0_54, %c0_55], %40 {strides = array<i32>} : memref<1x16x16x4xbf16, #tpu.memory_space<vmem>>, vector<1x16x16x4xbf16>,
    %cst_56 = arith.constant dense<0.000000e+00> : vector<4xf32>
    %42 = vector.multi_reduction <add>, %38, %cst_56 [0] : vector<256x4xf32> to vector<4xf32>
    %43 = vector.shape_cast %42 : vector<4xf32> to vector<1x4xf32>
    %cst_57 = arith.constant 3.906250e-03 : f32
    %44 = vector.broadcast %cst_57 : f32 to vector<1x4xf32>
    %45 = arith.mulf %43, %44 : vector<1x4xf32>
    %46 = vector.broadcast %45 : vector<1x4xf32> to vector<256x4xf32>
    %47 = arith.subf %38, %46 : vector<256x4xf32>
    %48 = vector.shape_cast %45 : vector<1x4xf32> to vector<1x1x4xf32>
    %c0_58 = arith.constant 0 : index
    %c0_59 = arith.constant 0 : index
    %c0_60 = arith.constant 0 : index
    %49 = vector.load %arg5[%c0_58, %c0_59, %c0_60] : memref<1x2x4xf32, #tpu.memory_space<vmem>>, vector<1x1x4xf32>
    tpu.vector_store %arg5[%c0_58, %c0_59, %c0_60], %48 {strides = array<i32>} : memref<1x2x4xf32, #tpu.memory_space<vmem>>, vector<1x1x4xf32>,
    %50 = arith.mulf %47, %47 : vector<256x4xf32>
    %cst_61 = arith.constant dense<0.000000e+00> : vector<4xf32>
    %51 = vector.multi_reduction <add>, %50, %cst_61 [0] : vector<256x4xf32> to vector<4xf32>
    %52 = vector.shape_cast %51 : vector<4xf32> to vector<1x4xf32>
    %53 = vector.shape_cast %52 : vector<1x4xf32> to vector<1x1x4xf32>
    %c0_62 = arith.constant 0 : index
    %c1_63 = arith.constant 1 : index
    %c0_64 = arith.constant 0 : index
    %54 = vector.load %arg5[%c0_62, %c1_63, %c0_64] : memref<1x2x4xf32, #tpu.memory_space<vmem>>, vector<1x1x4xf32>
    tpu.vector_store %arg5[%c0_62, %c1_63, %c0_64], %53 {strides = array<i32>} : memref<1x2x4xf32, #tpu.memory_space<vmem>>, vector<1x1x4xf32>,
    return
  }
  func.func @transform_0(%arg0: i32) -> (i32, i32, i32, i32) {
    %c0_i32 = arith.constant 0 : i32
    %c0_i32_0 = arith.constant 0 : i32
    %c0_i32_1 = arith.constant 0 : i32
    %c0_i32_2 = arith.constant 0 : i32
    return %arg0, %c0_i32, %c0_i32_0, %c0_i32_1 : i32, i32, i32, i32
  }
  func.func @transform_1(%arg0: i32) -> (i32, i32, i32, i32) {
    %c0_i32 = arith.constant 0 : i32
    %c0_i32_0 = arith.constant 0 : i32
    %c0_i32_1 = arith.constant 0 : i32
    %c0_i32_2 = arith.constant 0 : i32
    return %arg0, %c0_i32, %c0_i32_0, %c0_i32_1 : i32, i32, i32, i32
  }
  func.func @transform_2(%arg0: i32) -> (i32, i32, i32) {
    %c0_i32 = arith.constant 0 : i32
    %c0_i32_0 = arith.constant 0 : i32
    %c0_i32_1 = arith.constant 0 : i32
    %c0_i32_2 = arith.constant 0 : i32
    return %c0_i32, %c0_i32_0, %c0_i32_1 : i32, i32, i32
  }
  func.func @transform_3(%arg0: i32) -> (i32, i32, i32, i32) {
    %c0_i32 = arith.constant 0 : i32
    %c0_i32_0 = arith.constant 0 : i32
    %c0_i32_1 = arith.constant 0 : i32
    %c0_i32_2 = arith.constant 0 : i32
    return %arg0, %c0_i32, %c0_i32_0, %c0_i32_1 : i32, i32, i32, i32
  }
  func.func @transform_4(%arg0: i32) -> (i32, i32, i32) {
    %c0_i32 = arith.constant 0 : i32
    %c0_i32_0 = arith.constant 0 : i32
    %c0_i32_1 = arith.constant 0 : i32
    return %arg0, %c0_i32, %c0_i32_0 : i32, i32, i32
  }
}

module attributes {stable_mosaic.version = 11 : i64} {
  func.func @bn_relu_conv2_kernel(%arg0: i32, %arg1: memref<1x16x16x4xbf16, #tpu.memory_space<vmem>>, %arg2: memref<1x4xf32, #tpu.memory_space<vmem>>, %arg3: memref<1x4xf32, #tpu.memory_space<vmem>>, %arg4: memref<3x12x4xbf16, #tpu.memory_space<vmem>>, %arg5: memref<1x16x16x4xbf16, #tpu.memory_space<vmem>>, %arg6: memref<1x2x4xf32, #tpu.memory_space<vmem>>, %arg7: memref<18x16x12xbf16, #tpu.memory_space<vmem>>) attributes {dimension_semantics = [#tpu.dimension_semantics<parallel>], iteration_bounds = array<i64: 2>, scalar_prefetch = 0 : i64, scratch_operands = 1 : i64, tpu.core_type = #tpu.core_type<tc>, window_params = [{transform_indices = @transform_0, window_bounds = array<i64: 1, 16, 16, 4>}, {pipeline_mode = #tpu.pipeline_mode<synchronous>, transform_indices = @transform_1, window_bounds = array<i64: 1, 4>}, {pipeline_mode = #tpu.pipeline_mode<synchronous>, transform_indices = @transform_2, window_bounds = array<i64: 1, 4>}, {pipeline_mode = #tpu.pipeline_mode<synchronous>, transform_indices = @transform_3, window_bounds = array<i64: 3, 12, 4>}, {transform_indices = @transform_4, window_bounds = array<i64: 1, 16, 16, 4>}, {transform_indices = @transform_5, window_bounds = array<i64: 1, 2, 4>}]} {
    %c0 = arith.constant 0 : index
    %c0_0 = arith.constant 0 : index
    %c0_1 = arith.constant 0 : index
    %c0_2 = arith.constant 0 : index
    %0 = vector.load %arg1[%c0, %c0_0, %c0_1, %c0_2] : memref<1x16x16x4xbf16, #tpu.memory_space<vmem>>, vector<1x16x16x4xbf16>
    %1 = vector.shape_cast %0 : vector<1x16x16x4xbf16> to vector<16x16x4xbf16>
    %2 = arith.extf %1 : vector<16x16x4xbf16> to vector<16x16x4xf32>
    %c0_3 = arith.constant 0 : index
    %c0_4 = arith.constant 0 : index
    %3 = vector.load %arg2[%c0_3, %c0_4] : memref<1x4xf32, #tpu.memory_space<vmem>>, vector<1x4xf32>
    %4 = vector.shape_cast %3 : vector<1x4xf32> to vector<1x1x4xf32>
    %5 = vector.broadcast %4 : vector<1x1x4xf32> to vector<16x16x4xf32>
    %6 = arith.mulf %2, %5 : vector<16x16x4xf32>
    %c0_5 = arith.constant 0 : index
    %c0_6 = arith.constant 0 : index
    %7 = vector.load %arg3[%c0_5, %c0_6] : memref<1x4xf32, #tpu.memory_space<vmem>>, vector<1x4xf32>
    %8 = vector.shape_cast %7 : vector<1x4xf32> to vector<1x1x4xf32>
    %9 = vector.broadcast %8 : vector<1x1x4xf32> to vector<16x16x4xf32>
    %10 = arith.addf %6, %9 : vector<16x16x4xf32>
    %cst = arith.constant 0.000000e+00 : f32
    %11 = vector.broadcast %cst : f32 to vector<16x16x4xf32>
    %12 = arith.maximumf %10, %11 : vector<16x16x4xf32>
    %13 = arith.truncf %12 : vector<16x16x4xf32> to vector<16x16x4xbf16>
    %cst_7 = arith.constant 0.000000e+00 : bf16
    %14 = vector.broadcast %cst_7 : bf16 to vector<1x16x12xbf16>
    %c0_8 = arith.constant 0 : index
    %c0_9 = arith.constant 0 : index
    %c0_10 = arith.constant 0 : index
    %15 = vector.load %arg7[%c0_8, %c0_9, %c0_10] : memref<18x16x12xbf16, #tpu.memory_space<vmem>>, vector<1x16x12xbf16>
    tpu.vector_store %arg7[%c0_8, %c0_9, %c0_10], %14 {strides = array<i32>} : memref<18x16x12xbf16, #tpu.memory_space<vmem>>, vector<1x16x12xbf16>,
    %cst_11 = arith.constant 0.000000e+00 : bf16
    %16 = vector.broadcast %cst_11 : bf16 to vector<1x16x12xbf16>
    %c17 = arith.constant 17 : index
    %c0_12 = arith.constant 0 : index
    %c0_13 = arith.constant 0 : index
    %17 = vector.load %arg7[%c17, %c0_12, %c0_13] : memref<18x16x12xbf16, #tpu.memory_space<vmem>>, vector<1x16x12xbf16>
    tpu.vector_store %arg7[%c17, %c0_12, %c0_13], %16 {strides = array<i32>} : memref<18x16x12xbf16, #tpu.memory_space<vmem>>, vector<1x16x12xbf16>,
    %cst_14 = arith.constant 0.000000e+00 : bf16
    %18 = vector.broadcast %cst_14 : bf16 to vector<16x1x4xbf16>
    %c1 = arith.constant 1 : index
    %c0_15 = arith.constant 0 : index
    %c0_16 = arith.constant 0 : index
    %19 = vector.load %arg7[%c1, %c0_15, %c0_16] : memref<18x16x12xbf16, #tpu.memory_space<vmem>>, vector<16x1x4xbf16>
    tpu.vector_store %arg7[%c1, %c0_15, %c0_16], %18 {strides = array<i32>} : memref<18x16x12xbf16, #tpu.memory_space<vmem>>, vector<16x1x4xbf16>,
    %cst_17 = arith.constant 0.000000e+00 : bf16
    %20 = vector.broadcast %cst_17 : bf16 to vector<16x1x4xbf16>
    %c1_18 = arith.constant 1 : index
    %c15 = arith.constant 15 : index
    %c8 = arith.constant 8 : index
    %21 = vector.load %arg7[%c1_18, %c15, %c8] : memref<18x16x12xbf16, #tpu.memory_space<vmem>>, vector<16x1x4xbf16>
    tpu.vector_store %arg7[%c1_18, %c15, %c8], %20 {strides = array<i32>} : memref<18x16x12xbf16, #tpu.memory_space<vmem>>, vector<16x1x4xbf16>,
    %22 = vector.extract_strided_slice %13 {offsets = [0, 0, 0], sizes = [16, 15, 4], strides = [1, 1, 1]} : vector<16x16x4xbf16> to vector<16x15x4xbf16>
    %c1_19 = arith.constant 1 : index
    %c1_20 = arith.constant 1 : index
    %c0_21 = arith.constant 0 : index
    %23 = vector.load %arg7[%c1_19, %c1_20, %c0_21] : memref<18x16x12xbf16, #tpu.memory_space<vmem>>, vector<16x15x4xbf16>
    tpu.vector_store %arg7[%c1_19, %c1_20, %c0_21], %22 {strides = array<i32>} : memref<18x16x12xbf16, #tpu.memory_space<vmem>>, vector<16x15x4xbf16>,
    %c1_22 = arith.constant 1 : index
    %c0_23 = arith.constant 0 : index
    %c4 = arith.constant 4 : index
    %24 = vector.load %arg7[%c1_22, %c0_23, %c4] : memref<18x16x12xbf16, #tpu.memory_space<vmem>>, vector<16x16x4xbf16>
    tpu.vector_store %arg7[%c1_22, %c0_23, %c4], %13 {strides = array<i32>} : memref<18x16x12xbf16, #tpu.memory_space<vmem>>, vector<16x16x4xbf16>,
    %25 = vector.extract_strided_slice %13 {offsets = [0, 1, 0], sizes = [16, 15, 4], strides = [1, 1, 1]} : vector<16x16x4xbf16> to vector<16x15x4xbf16>
    %c1_24 = arith.constant 1 : index
    %c0_25 = arith.constant 0 : index
    %c8_26 = arith.constant 8 : index
    %26 = vector.load %arg7[%c1_24, %c0_25, %c8_26] : memref<18x16x12xbf16, #tpu.memory_space<vmem>>, vector<16x15x4xbf16>
    tpu.vector_store %arg7[%c1_24, %c0_25, %c8_26], %25 {strides = array<i32>} : memref<18x16x12xbf16, #tpu.memory_space<vmem>>, vector<16x15x4xbf16>,
    %c0_27 = arith.constant 0 : index
    %c0_28 = arith.constant 0 : index
    %c0_29 = arith.constant 0 : index
    %27 = vector.load %arg7[%c0_27, %c0_28, %c0_29] : memref<18x16x12xbf16, #tpu.memory_space<vmem>>, vector<16x16x12xbf16>
    %28 = vector.shape_cast %27 : vector<16x16x12xbf16> to vector<256x12xbf16>
    %c0_30 = arith.constant 0 : index
    %c0_31 = arith.constant 0 : index
    %c0_32 = arith.constant 0 : index
    %29 = vector.load %arg4[%c0_30, %c0_31, %c0_32] : memref<3x12x4xbf16, #tpu.memory_space<vmem>>, vector<1x12x4xbf16>
    %30 = vector.shape_cast %29 : vector<1x12x4xbf16> to vector<12x4xbf16>
    %cst_33 = arith.constant dense<0.000000e+00> : vector<256x4xf32>
    %31 = tpu.matmul %28, %30, %cst_33 {dimension_numbers = #tpu.dot_dimension_numbers<[1], [0], [0], [1], [0, 0, 1, 1], [], []>} : vector<256x12xbf16>, vector<12x4xbf16>, vector<256x4xf32> -> vector<256x4xf32>
    %c1_34 = arith.constant 1 : index
    %c0_35 = arith.constant 0 : index
    %c0_36 = arith.constant 0 : index
    %32 = vector.load %arg7[%c1_34, %c0_35, %c0_36] : memref<18x16x12xbf16, #tpu.memory_space<vmem>>, vector<16x16x12xbf16>
    %33 = vector.shape_cast %32 : vector<16x16x12xbf16> to vector<256x12xbf16>
    %c1_37 = arith.constant 1 : index
    %c0_38 = arith.constant 0 : index
    %c0_39 = arith.constant 0 : index
    %34 = vector.load %arg4[%c1_37, %c0_38, %c0_39] : memref<3x12x4xbf16, #tpu.memory_space<vmem>>, vector<1x12x4xbf16>
    %35 = vector.shape_cast %34 : vector<1x12x4xbf16> to vector<12x4xbf16>
    %cst_40 = arith.constant dense<0.000000e+00> : vector<256x4xf32>
    %36 = tpu.matmul %33, %35, %cst_40 {dimension_numbers = #tpu.dot_dimension_numbers<[1], [0], [0], [1], [0, 0, 1, 1], [], []>} : vector<256x12xbf16>, vector<12x4xbf16>, vector<256x4xf32> -> vector<256x4xf32>
    %37 = arith.addf %31, %36 : vector<256x4xf32>
    %c2 = arith.constant 2 : index
    %c0_41 = arith.constant 0 : index
    %c0_42 = arith.constant 0 : index
    %38 = vector.load %arg7[%c2, %c0_41, %c0_42] : memref<18x16x12xbf16, #tpu.memory_space<vmem>>, vector<16x16x12xbf16>
    %39 = vector.shape_cast %38 : vector<16x16x12xbf16> to vector<256x12xbf16>
    %c2_43 = arith.constant 2 : index
    %c0_44 = arith.constant 0 : index
    %c0_45 = arith.constant 0 : index
    %40 = vector.load %arg4[%c2_43, %c0_44, %c0_45] : memref<3x12x4xbf16, #tpu.memory_space<vmem>>, vector<1x12x4xbf16>
    %41 = vector.shape_cast %40 : vector<1x12x4xbf16> to vector<12x4xbf16>
    %cst_46 = arith.constant dense<0.000000e+00> : vector<256x4xf32>
    %42 = tpu.matmul %39, %41, %cst_46 {dimension_numbers = #tpu.dot_dimension_numbers<[1], [0], [0], [1], [0, 0, 1, 1], [], []>} : vector<256x12xbf16>, vector<12x4xbf16>, vector<256x4xf32> -> vector<256x4xf32>
    %43 = arith.addf %37, %42 : vector<256x4xf32>
    %44 = vector.shape_cast %43 : vector<256x4xf32> to vector<1x16x16x4xf32>
    %45 = arith.truncf %44 : vector<1x16x16x4xf32> to vector<1x16x16x4xbf16>
    %c0_47 = arith.constant 0 : index
    %c0_48 = arith.constant 0 : index
    %c0_49 = arith.constant 0 : index
    %c0_50 = arith.constant 0 : index
    %46 = vector.load %arg5[%c0_47, %c0_48, %c0_49, %c0_50] : memref<1x16x16x4xbf16, #tpu.memory_space<vmem>>, vector<1x16x16x4xbf16>
    tpu.vector_store %arg5[%c0_47, %c0_48, %c0_49, %c0_50], %45 {strides = array<i32>} : memref<1x16x16x4xbf16, #tpu.memory_space<vmem>>, vector<1x16x16x4xbf16>,
    %cst_51 = arith.constant dense<0.000000e+00> : vector<4xf32>
    %47 = vector.multi_reduction <add>, %43, %cst_51 [0] : vector<256x4xf32> to vector<4xf32>
    %48 = vector.shape_cast %47 : vector<4xf32> to vector<1x4xf32>
    %cst_52 = arith.constant 3.906250e-03 : f32
    %49 = vector.broadcast %cst_52 : f32 to vector<1x4xf32>
    %50 = arith.mulf %48, %49 : vector<1x4xf32>
    %51 = vector.broadcast %50 : vector<1x4xf32> to vector<256x4xf32>
    %52 = arith.subf %43, %51 : vector<256x4xf32>
    %53 = vector.shape_cast %50 : vector<1x4xf32> to vector<1x1x4xf32>
    %c0_53 = arith.constant 0 : index
    %c0_54 = arith.constant 0 : index
    %c0_55 = arith.constant 0 : index
    %54 = vector.load %arg6[%c0_53, %c0_54, %c0_55] : memref<1x2x4xf32, #tpu.memory_space<vmem>>, vector<1x1x4xf32>
    tpu.vector_store %arg6[%c0_53, %c0_54, %c0_55], %53 {strides = array<i32>} : memref<1x2x4xf32, #tpu.memory_space<vmem>>, vector<1x1x4xf32>,
    %55 = arith.mulf %52, %52 : vector<256x4xf32>
    %cst_56 = arith.constant dense<0.000000e+00> : vector<4xf32>
    %56 = vector.multi_reduction <add>, %55, %cst_56 [0] : vector<256x4xf32> to vector<4xf32>
    %57 = vector.shape_cast %56 : vector<4xf32> to vector<1x4xf32>
    %58 = vector.shape_cast %57 : vector<1x4xf32> to vector<1x1x4xf32>
    %c0_57 = arith.constant 0 : index
    %c1_58 = arith.constant 1 : index
    %c0_59 = arith.constant 0 : index
    %59 = vector.load %arg6[%c0_57, %c1_58, %c0_59] : memref<1x2x4xf32, #tpu.memory_space<vmem>>, vector<1x1x4xf32>
    tpu.vector_store %arg6[%c0_57, %c1_58, %c0_59], %58 {strides = array<i32>} : memref<1x2x4xf32, #tpu.memory_space<vmem>>, vector<1x1x4xf32>,
    return
  }
  func.func @transform_0(%arg0: i32) -> (i32, i32, i32, i32) {
    %c0_i32 = arith.constant 0 : i32
    %c0_i32_0 = arith.constant 0 : i32
    %c0_i32_1 = arith.constant 0 : i32
    %c0_i32_2 = arith.constant 0 : i32
    return %arg0, %c0_i32, %c0_i32_0, %c0_i32_1 : i32, i32, i32, i32
  }
  func.func @transform_1(%arg0: i32) -> (i32, i32) {
    %c0_i32 = arith.constant 0 : i32
    %c0_i32_0 = arith.constant 0 : i32
    %c0_i32_1 = arith.constant 0 : i32
    return %c0_i32, %c0_i32_0 : i32, i32
  }
  func.func @transform_2(%arg0: i32) -> (i32, i32) {
    %c0_i32 = arith.constant 0 : i32
    %c0_i32_0 = arith.constant 0 : i32
    %c0_i32_1 = arith.constant 0 : i32
    return %c0_i32, %c0_i32_0 : i32, i32
  }
  func.func @transform_3(%arg0: i32) -> (i32, i32, i32) {
    %c0_i32 = arith.constant 0 : i32
    %c0_i32_0 = arith.constant 0 : i32
    %c0_i32_1 = arith.constant 0 : i32
    %c0_i32_2 = arith.constant 0 : i32
    return %c0_i32, %c0_i32_0, %c0_i32_1 : i32, i32, i32
  }
  func.func @transform_4(%arg0: i32) -> (i32, i32, i32, i32) {
    %c0_i32 = arith.constant 0 : i32
    %c0_i32_0 = arith.constant 0 : i32
    %c0_i32_1 = arith.constant 0 : i32
    %c0_i32_2 = arith.constant 0 : i32
    return %arg0, %c0_i32, %c0_i32_0, %c0_i32_1 : i32, i32, i32, i32
  }
  func.func @transform_5(%arg0: i32) -> (i32, i32, i32) {
    %c0_i32 = arith.constant 0 : i32
    %c0_i32_0 = arith.constant 0 : i32
    %c0_i32_1 = arith.constant 0 : i32
    return %arg0, %c0_i32, %c0_i32_0 : i32, i32, i32
  }
}

module attributes {stable_mosaic.version = 11 : i64} {
  func.func @bn_relu_kernel(%arg0: i32, %arg1: memref<1x16x16x4xbf16, #tpu.memory_space<vmem>>, %arg2: memref<1x4xf32, #tpu.memory_space<vmem>>, %arg3: memref<1x4xf32, #tpu.memory_space<vmem>>, %arg4: memref<1x16x16x4xbf16, #tpu.memory_space<vmem>>) attributes {dimension_semantics = [#tpu.dimension_semantics<parallel>], iteration_bounds = array<i64: 2>, scalar_prefetch = 0 : i64, scratch_operands = 0 : i64, tpu.core_type = #tpu.core_type<tc>, window_params = [{transform_indices = @transform_0, window_bounds = array<i64: 1, 16, 16, 4>}, {pipeline_mode = #tpu.pipeline_mode<synchronous>, transform_indices = @transform_1, window_bounds = array<i64: 1, 4>}, {pipeline_mode = #tpu.pipeline_mode<synchronous>, transform_indices = @transform_2, window_bounds = array<i64: 1, 4>}, {transform_indices = @transform_3, window_bounds = array<i64: 1, 16, 16, 4>}]} {
    %c0 = arith.constant 0 : index
    %c0_0 = arith.constant 0 : index
    %c0_1 = arith.constant 0 : index
    %c0_2 = arith.constant 0 : index
    %0 = vector.load %arg1[%c0, %c0_0, %c0_1, %c0_2] : memref<1x16x16x4xbf16, #tpu.memory_space<vmem>>, vector<1x16x16x4xbf16>
    %1 = vector.shape_cast %0 : vector<1x16x16x4xbf16> to vector<16x16x4xbf16>
    %2 = arith.extf %1 : vector<16x16x4xbf16> to vector<16x16x4xf32>
    %c0_3 = arith.constant 0 : index
    %c0_4 = arith.constant 0 : index
    %3 = vector.load %arg2[%c0_3, %c0_4] : memref<1x4xf32, #tpu.memory_space<vmem>>, vector<1x4xf32>
    %4 = vector.shape_cast %3 : vector<1x4xf32> to vector<1x1x4xf32>
    %5 = vector.broadcast %4 : vector<1x1x4xf32> to vector<16x16x4xf32>
    %6 = arith.mulf %2, %5 : vector<16x16x4xf32>
    %c0_5 = arith.constant 0 : index
    %c0_6 = arith.constant 0 : index
    %7 = vector.load %arg3[%c0_5, %c0_6] : memref<1x4xf32, #tpu.memory_space<vmem>>, vector<1x4xf32>
    %8 = vector.shape_cast %7 : vector<1x4xf32> to vector<1x1x4xf32>
    %9 = vector.broadcast %8 : vector<1x1x4xf32> to vector<16x16x4xf32>
    %10 = arith.addf %6, %9 : vector<16x16x4xf32>
    %cst = arith.constant 0.000000e+00 : f32
    %11 = vector.broadcast %cst : f32 to vector<16x16x4xf32>
    %12 = arith.maximumf %10, %11 : vector<16x16x4xf32>
    %13 = vector.shape_cast %12 : vector<16x16x4xf32> to vector<1x16x16x4xf32>
    %14 = arith.truncf %13 : vector<1x16x16x4xf32> to vector<1x16x16x4xbf16>
    %c0_7 = arith.constant 0 : index
    %c0_8 = arith.constant 0 : index
    %c0_9 = arith.constant 0 : index
    %c0_10 = arith.constant 0 : index
    %15 = vector.load %arg4[%c0_7, %c0_8, %c0_9, %c0_10] : memref<1x16x16x4xbf16, #tpu.memory_space<vmem>>, vector<1x16x16x4xbf16>
    tpu.vector_store %arg4[%c0_7, %c0_8, %c0_9, %c0_10], %14 {strides = array<i32>} : memref<1x16x16x4xbf16, #tpu.memory_space<vmem>>, vector<1x16x16x4xbf16>,
    return
  }
  func.func @transform_0(%arg0: i32) -> (i32, i32, i32, i32) {
    %c0_i32 = arith.constant 0 : i32
    %c0_i32_0 = arith.constant 0 : i32
    %c0_i32_1 = arith.constant 0 : i32
    %c0_i32_2 = arith.constant 0 : i32
    return %arg0, %c0_i32, %c0_i32_0, %c0_i32_1 : i32, i32, i32, i32
  }
  func.func @transform_1(%arg0: i32) -> (i32, i32) {
    %c0_i32 = arith.constant 0 : i32
    %c0_i32_0 = arith.constant 0 : i32
    %c0_i32_1 = arith.constant 0 : i32
    return %c0_i32, %c0_i32_0 : i32, i32
  }
  func.func @transform_2(%arg0: i32) -> (i32, i32) {
    %c0_i32 = arith.constant 0 : i32
    %c0_i32_0 = arith.constant 0 : i32
    %c0_i32_1 = arith.constant 0 : i32
    return %c0_i32, %c0_i32_0 : i32, i32
  }
  func.func @transform_3(%arg0: i32) -> (i32, i32, i32, i32) {
    %c0_i32 = arith.constant 0 : i32
    %c0_i32_0 = arith.constant 0 : i32
    %c0_i32_1 = arith.constant 0 : i32
    %c0_i32_2 = arith.constant 0 : i32
    return %arg0, %c0_i32, %c0_i32_0, %c0_i32_1 : i32, i32, i32, i32
  }
}

</mosaic_0001>

<bundles_post_ra>
// kernel: tile.8
= control target key start
LH: loop header
LB: loop body
LE: loop exit
PB: predicated region body
PF: predicated region fallthrough
CT: control target
= control target key end

     0   :  { %s22_s0 = inlined_call_operand.vmem [shape: f32[4], index: 0, kind: input, shape index: {}]   ;;  %s23_s1 = inlined_call_operand.vmem [shape: f32[4,4], index: 1, kind: output, shape index: {}]  }
   0x1   :  { %v4_v0 = vld [vmem:[%s22_s0] ss:$0 sm:$0xff] }
   0x2   :  { %5 = vst [vmem:[%s23_s1] sm:$0xf] %v4_v0 }

// kernel: tile.9
= control target key start
LH: loop header
LB: loop body
LE: loop exit
PB: predicated region body
PF: predicated region fallthrough
CT: control target
= control target key end

     0   :  { %s101_s0 = inlined_call_operand.vmem [shape: f32[4,4], index: 0, kind: input, shape index: {}]   ;;  %s102_s1 = inlined_call_operand.hbm [shape: f32[1,16], index: 1, kind: output, shape index: {}]  }
   0x1   :  { %v5_v0 = vld [vmem:[%s101_s0] sm:$0xf] }
   0x2   :  { %6 = vst [vmem:[#allocation3] sm:$0xf] %v5_v0 }
   0x3   :  { %2 = vsyncpa [#allocation1], 0  ;;  %vm8_vm0 = vcmask 31744   ;;  %s72_s0 = smov 12   ;;  %s73_s8 = smov 4   ;;  %vm14_vm1 = vcmask 130144  }
   0x4   :  { %s74_s9 = smov 8   ;;  %vm20_vm2 = vcmask 97344   ;;  %vm26_vm3 = vcmask 64544   ;;  %s75_s10 = smov [#allocation0]  }
   0x5   :  { %s38_s11 = sshll.u32 %s75_s10, 4  ;;  %s39_s11 = int_to_ptr.vmem [resolvable:$true] %s38_s11 }
   0x6   :  { %s48_s12 = scalar_lea.vmem %s39_s11, 16  ;;  %s52_s13 = scalar_lea.vmem %s39_s11, 32 }
   0x7   :  { %p49_p0 = scmp.ne.s32.totalorder %s39_s11, %s48_s12  ;;  %p53_p1 = scmp.lt.s32.totalorder %s39_s11, %s39_s11 }
   0x8   :  { %p54_p2 = scmp.lt.s32.totalorder %s52_s13, %s48_s12 }
   0x9   :  { %v11_v1 = vld [vmem:[#allocation3 + $0x3] sm:$0x1]   ;;  %v23_v2 = vld [vmem:[#allocation3 + $0x1] sm:$0x1]   ;;  %v7_v3 = vld [vmem:[#allocation3] sm:$0x1]  }
   0xa   :  { %12 = vrot.lane.b32.xlu0 %v11_v1, %s72_s0  ;;  %24 = vrot.lane.b32.xlu1 %v23_v2, %s73_s8  ;;  %v17_v4 = vld [vmem:[#allocation3 + $0x2] sm:$0x1]   ;;  %9 = vst.msk [vmem:[#allocation2] sm:$0x1] %vm8_vm0, %v7_v3   ;;  %p55_p3 = por %p54_p2, %p53_p1 }
   0xc   :  { %p56_p4 = pnand %p55_p3, %p49_p0 }
   0xe   :  { %18 = vrot.lane.b32.xlu0 %v17_v4, %s74_s9 }
  0x7c   :  { %v13_v5 = vpop.permute.xlu0 %12   ;;  %v25_v6 = vpop.permute.xlu1 %24  }
  0x7d   :  { %15 = vst.msk [vmem:[#allocation2] sm:$0x1] %vm14_vm1, %v13_v5  }
  0x80   :  { %v19_v7 = vpop.permute.xlu0 %18  }
  0x81   :  { %21 = vst.msk [vmem:[#allocation2] sm:$0x1] %vm20_vm2, %v19_v7  }
  0x82   :  { %27 = vst.msk [vmem:[#allocation2] sm:$0x1] %vm26_vm3, %v25_v6  }
  0x89   :  { %v31_v8 = vld [vmem:[#allocation2] sm:$0x1] }
  0x8a   :  { %33 = vst [vmem:[#allocation0] sm:$0x1] %v31_v8 }
  0x8b   :  { %59 = shalt.err (!%p56_p4)
}
  0x8c   :  { %s60_s16 = scalar_lea.hbm %s102_s1, 16 }
  0x8d   :  { %p61_p5 = scmp.ne.s32.totalorder %s102_s1, %s60_s16  ;;  %p64_p6 = scmp.lt.u32.totalorder %s60_s16, %s102_s1 }
  0x8f   :  { %p66_p7 = pnand %p64_p6, %p61_p5 }
  0x91   :  { %69 = shalt.err (!%p66_p7)
}
  0x92   :  { %41 = dma.vmem_to_hbm [thread:$0]  %s39_s11, 16, %s102_s1, [#allocation1]  }
  0x93   :  { %70 = dma.done.wait [#allocation1], 16  }
  0x94   :  { %71 = vsyncadd [#allocation1], 4294967280 }
  0x95   :  { %43 = vsyncpa [#allocation1], 1 }

// kernel: decoder_block_forward.4
= control target key start
LH: loop header
LB: loop body
LE: loop exit
PB: predicated region body
PF: predicated region fallthrough
CT: control target
= control target key end

     0   :  { %8 = vsyncpa [#allocation3], 0  ;;  %s1116_s0 = inlined_call_operand.hbm [shape: bf16[2,8,8,8], index: 0, kind: input, shape index: {}]   ;;  %s1117_s1 = inlined_call_operand.hbm [shape: bf16[8,16], index: 1, kind: input, shape index: {}]   ;;  %s1118_s2 = inlined_call_operand.hbm [shape: f32[1,16], index: 2, kind: input, shape index: {}]   ;;  %s1119_s3 = inlined_call_operand.hbm [shape: bf16[2,8,2,8,8], index: 3, kind: output, shape index: {}]  }
   0x1   :  { %10 = vsyncpa [#allocation3 + $0x1], 0 }
   0x2   :  { %11 = vsyncpa [#allocation6], 0 }
   0x3   :  { %12 = vsyncpa [#allocation4], 0 }
   0x4   :  { %14 = vsyncpa [#allocation4 + $0x1], 0  ;;  %s848_s12 = smov 0   ;;  %s850_s13 = smov 0  }
   0x5   :  { %s852_s14 = smov 0   ;;  %s854_s15 = smov 0  }
   0x6 LB: > { %s869_s16 = sadd.s32 4294967295, %s817_s15   ;;  %s513_s17 = sadd.s32 4294967294, %s817_s15   ;;  %s817_s15 = sphi %s854_s15, %s1144_s15   ;;  %s813_s14 = sphi %s852_s14, %s1143_s14   ;;  %s809_s13 = sphi %s850_s13, %s1142_s13   ;;  %s805_s12 = sphi %s848_s12, %s1141_s12  }
   0x7   : > { %s873_s18 = sadd.s32 1, %s817_s15   ;;  %s27_s19 = sadd.s32 1, %s813_s14 }
   0x8   : > { %s24_s20 = ssub.s32 %s817_s15, %s873_s18  ;;  %p34_p0 = scmp.ne.s32.totalorder %s813_s14, %s809_s13 }
   0x9   : > { %p25_p1 = scmp.eq.s32.totalorder %s24_s20, 0  ;;  %p35_p2 = scmp.eq.s32.totalorder %s817_s15, 0 }
   0xa   : > { %p40_p3 = scmp.ne.s32.totalorder %s809_s13, %s805_s12  ;;  %p1120_p4 = scmp.eq.s32.totalorder %s869_s16, 0 }
   0xb   : > { %s885_s21 = scalar_select %p25_p1, %s813_s14, %s27_s19  }
   0xc   : > { %p887_p5 = por %p35_p2, %p34_p0  ;;  %p893_p6 = por %p1120_p4, %p40_p3 }
   0xd   : > { %p106_p7 = scmp.eq.s32.totalorder %s869_s16, 1  ;;  %p112_p8 = scmp.eq.s32.totalorder %s513_s17, 1 }
   0xe   : > { %s1126_s23 = scalar_select %p893_p6, 1, 0 }
   0xf   : > { %p514_p9 = scmp.ge.s32.totalorder %s817_s15, 1  ;;  %p119_p10 = scmp.lt.s32.totalorder %s817_s15, 3 }
  0x10   : > { %p900_p11 = por %p106_p7, %p34_p0  ;;  %p904_p12 = por %p112_p8, %p40_p3 }
  0x11   : > { %p908_p13 = pnand %p514_p9, %p119_p10  ;;  %s819_s27 = smov [#allocation5]  }
  0x12   : > { %s1127_s24 = scalar_select %p900_p11, 1, 0 }
  0x13   : > { %s1128_s25 = scalar_select %p904_p12, 1, 0 }
  0x14   : > { %s1129_s26 = scalar_select %p908_p13, 1, 0 }
  0x15   : > { %p597_p2 = pneg %p908_p13  ;;  %s132_s28 = sshll.u32 %s819_s27, 4  ;;  %s133_s28 = int_to_ptr.vmem [resolvable:$true] %s132_s28 }
  0x16   : > { %p614_p4 = scmp.lt.s32.totalorder %s817_s15, 2  ;;  %p1130_p0 = scmp.eq.s32.totalorder %s869_s16, 0 }
  0x17   : > { %s820_s4 = smov [#allocation7]   ;;  %s661_s8 = scalar_lea.hbm %s1117_s1, 64 }
  0x18   : > { %p918_p7 = pnand %p597_p2, %p1130_p0  ;;  %p924_p3 = pnand %p614_p4, %p887_p5 }
  0x19   : > { %s143_s5 = sshll.u32 %s820_s4, 4  ;;  %p662_p8 = scmp.ne.s32.totalorder %s1117_s1, %s661_s8  ;;  %s928_s5 = int_to_ptr.vmem [resolvable:$true] %s143_s5 }
  0x1a   : > { %s1132_s30 = scalar_select %p924_p3, 1, 0 }
  0x1b   : > { %p663_p9 = pneg %p918_p7  ;;  %p668_p10 = scmp.lt.u32.totalorder %s661_s8, %s1117_s1 }
  0x1d   : > { %p664_p4 = pnand %p663_p9, %p662_p8 }
  0x1f   : > { %p665_p5 = pneg %p664_p4 }
  0x21   : > { %p670_p2 = pnand %p668_p10, %p665_p5 }
  0x23   : > { %673 = shalt.err (!%p670_p2)
}
  0x24   : > { %s674_s19 = scalar_lea.vmem %s133_s28, 64  ;;  %p682_p11 = scmp.lt.s32.totalorder %s133_s28, %s133_s28 }
  0x25   : > { %p675_p0 = scmp.ne.s32.totalorder %s133_s28, %s674_s19  ;;  %p683_p6 = scmp.lt.s32.totalorder %s674_s19, %s674_s19 }
  0x27   : > { %p677_p1 = pnand %p675_p0, %p663_p9  ;;  %p684_p13 = por %p683_p6, %p682_p11 }
  0x29   : > { %p678_p12 = pneg %p677_p1 }
  0x2b   : > { %p685_p3 = pnand %p684_p13, %p678_p12 }
  0x2d   : > { %688 = shalt.err (!%p685_p3)
}
  0x2e   : > { %600 = dma.hbm_to_vmem [thread:$0]  (!%p918_p7), %s1117_s1, 64, %s133_s28, [#allocation6]  }
  0x2f   : > { %s154_s27 = sand.u32 1, %s813_s14   ;;  %s689_s7 = scalar_lea.hbm %s1118_s2, 16 }
  0x30   : > { %p690_p1 = scmp.ne.s32.totalorder %s1118_s2, %s689_s7  ;;  %p696_p12 = scmp.lt.u32.totalorder %s689_s7, %s1118_s2 }
  0x32   : > { %p692_p6 = pnand %p690_p1, %p663_p9 }
  0x34   : > { %p693_p11 = pneg %p692_p6 }
  0x36   : > { %p698_p13 = pnand %p696_p12, %p693_p11 }
  0x38   : > { %701 = shalt.err (!%p698_p13)
}
  0x39   : > { %s702_s28 = scalar_lea.vmem %s928_s5, 16  ;;  %s709_s17 = scalar_lea.vmem %s928_s5, 32 }
  0x3a   : > { %p703_p3 = scmp.ne.s32.totalorder %s928_s5, %s702_s28  ;;  %p710_p5 = scmp.lt.s32.totalorder %s928_s5, %s928_s5 }
  0x3b   : > { %p711_p10 = scmp.lt.s32.totalorder %s709_s17, %s702_s28 }
  0x3c   : > { %p705_p8 = pnand %p703_p3, %p663_p9 }
  0x3d   : > { %p712_p2 = por %p711_p10, %p710_p5 }
  0x3e   : > { %p706_p4 = pneg %p705_p8 }
  0x40   : > { %p713_p0 = pnand %p712_p2, %p706_p4 }
  0x42   : > { %716 = shalt.err (!%p713_p0)
}
  0x43   : > { %603 = dma.hbm_to_vmem [thread:$0]  (!%p918_p7), %s1118_s2, 16, %s928_s5, [#allocation6]  }
  0x44   : > { %s518_s22 = sshll.u32 %s154_s27, 5  ;;  %s556_s4 = sshll.u32 %s817_s15, 9 }
  0x45   : > { %s983_s8 = scalar_lea.hbm %s1116_s0, %s556_s4  ;;  %s158_s29 = scalar_lea.vmem [#allocation2], %s518_s22 }
  0x46   : > { %s165_s9 = sshll.u32 %s158_s29, 4  ;;  %s987_s10 = scalar_lea.sflag [#allocation3], %s154_s27  ;;  %s985_s9 = int_to_ptr.vmem [resolvable:$true] %s165_s9 }
  0x47   : > { %s717_s11 = scalar_lea.hbm %s983_s8, 512  ;;  %p1133_p7 = scmp.ne.s32.totalorder %s1132_s30, 0 }
  0x48   : > { %p718_p9 = scmp.ne.s32.totalorder %s983_s8, %s717_s11  ;;  %s722_s17 = scalar_lea.hbm %s1116_s0, 1024 }
  0x49   : > { %p719_p1 = pneg %p1133_p7  ;;  %p723_p12 = scmp.lt.u32.totalorder %s983_s8, %s1116_s0 }
  0x4a   : > { %p724_p13 = scmp.lt.u32.totalorder %s722_s17, %s717_s11  ;;  %p726_p8 = scmp.lt.u32.totalorder %s717_s11, %s983_s8 }
  0x4b   : > { %p720_p6 = pnand %p719_p1, %p718_p9 }
  0x4c   : > { %p725_p3 = por %p724_p13, %p723_p12 }
  0x4d   : > { %p721_p11 = pneg %p720_p6 }
  0x4e   : > { %p727_p4 = por %p726_p8, %p725_p3 }
  0x50   : > { %p728_p5 = pnand %p727_p4, %p721_p11 }
  0x52   : > { %731 = shalt.err (!%p728_p5)
}
  0x53   : > { %s732_s27 = scalar_lea.vmem %s985_s9, 512  ;;  %s821_s22 = smov [#allocation2]  }
  0x54   : > { %p733_p10 = scmp.ne.s32.totalorder %s985_s9, %s732_s27  ;;  %s737_s4 = sshll.u32 %s821_s22, 4  ;;  %s738_s4 = int_to_ptr.vmem [resolvable:$false] %s737_s4 }
  0x55   : > { %s739_s6 = scalar_lea.vmem %s738_s4, 1024  ;;  %p740_p9 = scmp.lt.s32.totalorder %s985_s9, %s738_s4 }
  0x56   : > { %p735_p2 = pnand %p733_p10, %p719_p1  ;;  %p741_p6 = scmp.lt.s32.totalorder %s739_s6, %s732_s27 }
  0x58   : > { %p736_p0 = pneg %p735_p2  ;;  %p742_p12 = por %p741_p6, %p740_p9 }
  0x5a   : > { %p743_p13 = pnand %p742_p12, %p736_p0 }
  0x5c   : > { %746 = shalt.err (!%p743_p13)
}
  0x5d   : > { %s822_s7 = smov 64   ;;  %s823_s29 = smov 4  }
  0x5e   : > { %607 = dma.hbm_to_vmem [thread:$0]  (!%p1133_p7), %s983_s8, 512, %s985_s9, %s987_s10, %s822_s7, %s822_s7, %s823_s29  }
  0x5f   : > { %p1134_p1 = scmp.ne.s32.totalorder %s1129_s26, 0 }
  0x60   : > { %s1018_s11 = sand.u32 (!%p1134_p1), 1, %s809_s13   ;;  %p1135_p11 = scmp.ne.s32.totalorder (!%p1134_p1), %s1126_s23, 0 }
  0x61   : > { %177 = sbr.rel (%p1134_p1) target bundleno = 472 (0x1d8), region = 32  ;;  %s522_s5 = sshll.u32 (!%p1134_p1), %s1018_s11, 5 }
  0x62   : > { %s180_s28 = scalar_lea.sflag (!%p1134_p1), [#allocation3], %s1018_s11  ;;  %s183_s17 = scalar_lea.vmem (!%p1134_p1), [#allocation2], %s522_s5 }
  0x68   : > { %792 = dma.done.wait (%p1135_p11), %s180_s28, 512  }
  0x69   : > { %794 = vsyncadd (%p1135_p11), %s180_s28, 4294966784  ;;  %p1136_p3 = scmp.eq.s32.totalorder %s869_s16, 0 }
  0x6b   : > { %796 = dma.done.wait (%p1136_p3), [#allocation6], 80   ;;  %p1137_p7 = pmov %p1136_p3 }
  0x6c   : > { %vm264_vm0 = vcmask 1043456   ;;  %vm251_vm1 = vcmask 64512   ;;  %v223_v0 = vld [vmem:[#allocation5] sm:$0xf]  ;;  %v658_v3 = vld [vmem:[%s183_s17 + $0x8] sm:$0xff]   ;;  %v659_v4 = vld [vmem:[%s183_s17 + $0x10] sm:$0xff]  }
  0x6d   : > { %798 = vsyncadd (%p1137_p7), [#allocation6], 4294967216  ;;  %583 = vmatprep.subr.msk.bf16.mxu0 %vm264_vm0, %v223_v0  ;;  %584 = vmatprep.subr.msk.bf16.mxu1 %vm264_vm0, %v223_v0  ;;  %v266_v1 = vsel %vm264_vm0, %v223_v0, 0  ;;  %v657_v2 = vld [vmem:[%s183_s17] sm:$0xff]   ;;  %v660_v5 = vld [vmem:[%s183_s17 + $0x18] sm:$0xff]   ;;  %s525_s23 = sshll.u32 %s1018_s11, 6 }
  0x6e   : > { %572 = vmatpush3.bf16.msra.mxu0 %v266_v1  ;;  %582 = vmatpush3.bf16.msra.mxu1 %v266_v1  ;;  %v526_v6 = vld [vmem:[#allocation7] ss:$0 sm:$0xff]  ;;  %vm341_vm2 = vcmask 60416   ;;  %s1031_s26 = scalar_lea.vmem [#allocation8], %s525_s23  ;;  %s824_s30 = smov 120  }
  0x6f   : > { %573 = vmatprep.mubr.msk.bf16.mxu0 %vm251_vm1, %v657_v2  ;;  %577 = vmatprep.mubr.msk.bf16.mxu1 %vm251_vm1, %v659_v4  ;;  %s565_s8 = sshll.u32 %s869_s16, 10  ;;  %s421_s9 = sshll.u32 %s1031_s26, 4  ;;  %s1068_s9 = int_to_ptr.vmem [resolvable:$true] %s421_s9 }
  0x70   : > { %s1066_s20 = scalar_lea.hbm %s1119_s3, %s565_s8  ;;  %s408_s16 = scalar_lea.sflag [#allocation4], %s1018_s11 }
  0x71   : > { %574 = vmatmul.mubr.msk.bf16.vlgmr.msra.gmra.mrb[0].mxu0 %vm251_vm1, %v658_v3  ;;  %578 = vmatmul.mubr.msk.bf16.vlgmr.msra.gmra.mrb[0].mxu1 %vm251_vm1, %v660_v5  ;;  %s747_s27 = scalar_lea.vmem %s1068_s9, 1024  ;;  %p1138_p4 = scmp.ne.s32.totalorder %s1127_s24, 0 }
  0x72   : > { %p748_p8 = scmp.ne.s32.totalorder %s1068_s9, %s747_s27  ;;  %s825_s22 = smov [#allocation8]  }
  0x73   : > { %s751_s4 = sshll.u32 %s825_s22, 4  ;;  %s752_s4 = int_to_ptr.vmem [resolvable:$false] %s751_s4 }
  0x74   : > { %p749_p5 = pnand %p748_p8, %p1138_p4  ;;  %s753_s6 = scalar_lea.vmem %s752_s4, 2048 }
  0x75   : > { %p754_p2 = scmp.lt.s32.totalorder %s1068_s9, %s752_s4  ;;  %p755_p0 = scmp.lt.s32.totalorder %s753_s6, %s747_s27 }
  0x76   : > { %p750_p10 = pneg %p749_p5 }
  0x77   : > { %p756_p9 = por %p755_p0, %p754_p2 }
  0x79   : > { %p757_p6 = pnand %p756_p9, %p750_p10 }
 0x144   : > { %v575_v7 = vpop.f32.mrb[0].mxu0  ;;  %v579_v10 = vpop.f32.mrb[0].mxu1 }
 0x145   : > { %v311_v8 = vadd.f32 %v575_v7, %v526_v6  ;;  %v302_v9 = vpop.f32.mrb[1].mxu0  ;;  %v327_v12 = vadd.f32 %v579_v10, %v526_v6  ;;  %v318_v14 = vpop.f32.mrb[1].mxu1 }
 0x146   : > { %v303_v11 = vadd.f32 %v526_v6, %v302_v9  ;;  %v576_v13 = vpop.f32.mrb[2].mxu0  ;;  %v319_v17 = vadd.f32 %v526_v6, %v318_v14  ;;  %v580_v19 = vpop.f32.mrb[2].mxu1 }
 0x147   : > { %v335_v15 = vpack.c.bf16 %v311_v8, %v311_v8  ;;  %v314_v16 = vadd.f32 %v576_v13, %v526_v6  ;;  %v305_v18 = vpop.f32.mrb[3].mxu0  ;;  %v339_v21 = vpack.c.bf16 %v327_v12, %v327_v12  ;;  %v330_v23 = vadd.f32 %v580_v19, %v526_v6  ;;  %v321_v24 = vpop.f32.mrb[3].mxu1 }
 0x148   : > { %v333_v20 = vpack.c.bf16 %v303_v11, %v303_v11  ;;  %v306_v22 = vadd.f32 %v526_v6, %v305_v18  ;;  %v337_v26 = vpack.c.bf16 %v319_v17, %v319_v17  ;;  %v322_v27 = vadd.f32 %v526_v6, %v321_v24 }
 0x149   : > { %344 = vst.msk [vmem:[%s1031_s26 + $0x10] sm:$0xf] %vm341_vm2, %v335_v15  ;;  %v336_v25 = vpack.c.bf16 %v314_v16, %v314_v16  ;;  %378 = vrot.lane.b32.xlu1 %v335_v15, %s824_s30  ;;  %348 = vst.msk [vmem:[%s1031_s26 + $0x30] sm:$0xf] %vm341_vm2, %v339_v21  ;;  %v340_v29 = vpack.c.bf16 %v330_v23, %v330_v23 }
 0x14a   : > { %342 = vst.msk [vmem:[%s1031_s26] sm:$0xf] %vm341_vm2, %v333_v20  ;;  %v334_v28 = vpack.c.bf16 %v306_v22, %v306_v22  ;;  %374 = vrot.lane.b32.xlu0 %v333_v20, %s824_s30  ;;  %346 = vst.msk [vmem:[%s1031_s26 + $0x20] sm:$0xf] %vm341_vm2, %v337_v26  ;;  %v338_v30 = vpack.c.bf16 %v322_v27, %v322_v27 }
 0x14b   : > { %345 = vst.msk [vmem:[%s1031_s26 + $0x18] sm:$0xf] %vm341_vm2, %v336_v25  ;;  %349 = vst.msk [vmem:[%s1031_s26 + $0x38] sm:$0xf] %vm341_vm2, %v340_v29 }
 0x14c   : > { %343 = vst.msk [vmem:[%s1031_s26 + $0x8] sm:$0xf] %vm341_vm2, %v334_v28  ;;  %347 = vst.msk [vmem:[%s1031_s26 + $0x28] sm:$0xf] %vm341_vm2, %v338_v30 }
 0x14d   : > { %380 = vrot.lane.b32.xlu1 %v336_v25, %s824_s30 }
 0x14e   : > { %382 = vrot.lane.b32.xlu0 %v337_v26, %s824_s30 }
 0x151   : > { %384 = vrot.lane.b32.xlu1 %v338_v30, %s824_s30 }
 0x152   : > { %376 = vrot.lane.b32.xlu0 %v334_v28, %s824_s30 }
 0x155   : > { %388 = vrot.lane.b32.xlu1 %v340_v29, %s824_s30 }
 0x156   : > { %386 = vrot.lane.b32.xlu0 %v339_v21, %s824_s30 }
 0x1bb   : > { %v379_v31 = vpop.permute.xlu1 %378 }
 0x1bc   : > { %545 = vst.msk [vmem:[%s1031_s26 + $0x14] sm:$0xf] %vm341_vm2, %v379_v31  ;;  %v375_v32 = vpop.permute.xlu0 %374 }
 0x1bd   : > { %543 = vst.msk [vmem:[%s1031_s26 + $0x4] sm:$0xf] %vm341_vm2, %v375_v32 }
 0x1bf   : > { %v381_v33 = vpop.permute.xlu1 %380 }
 0x1c0   : > { %546 = vst.msk [vmem:[%s1031_s26 + $0x1c] sm:$0xf] %vm341_vm2, %v381_v33  ;;  %v383_v34 = vpop.permute.xlu0 %382 }
 0x1c1   : > { %547 = vst.msk [vmem:[%s1031_s26 + $0x24] sm:$0xf] %vm341_vm2, %v383_v34 }
 0x1c3   : > { %v385_v35 = vpop.permute.xlu1 %384 }
 0x1c4   : > { %548 = vst.msk [vmem:[%s1031_s26 + $0x2c] sm:$0xf] %vm341_vm2, %v385_v35  ;;  %v377_v36 = vpop.permute.xlu0 %376 }
 0x1c5   : > { %544 = vst.msk [vmem:[%s1031_s26 + $0xc] sm:$0xf] %vm341_vm2, %v377_v36 }
 0x1c7   : > { %v389_v37 = vpop.permute.xlu1 %388 }
 0x1c8   : > { %550 = vst.msk [vmem:[%s1031_s26 + $0x3c] sm:$0xf] %vm341_vm2, %v389_v37  ;;  %v387_v38 = vpop.permute.xlu0 %386 }
 0x1c9   : > { %549 = vst.msk [vmem:[%s1031_s26 + $0x34] sm:$0xf] %vm341_vm2, %v387_v38 }
 0x1ca   : > { %760 = shalt.err (!%p757_p6)
}
 0x1cb   : > { %s761_s7 = scalar_lea.hbm %s1066_s20, 1024  ;;  %s765_s28 = scalar_lea.hbm %s1119_s3, 2048 }
 0x1cc   : > { %p762_p12 = scmp.ne.s32.totalorder %s1066_s20, %s761_s7  ;;  %p766_p11 = scmp.lt.u32.totalorder %s1066_s20, %s1119_s3 }
 0x1cd   : > { %p767_p3 = scmp.lt.u32.totalorder %s765_s28, %s761_s7  ;;  %p769_p8 = scmp.lt.u32.totalorder %s761_s7, %s1066_s20 }
 0x1ce   : > { %p763_p13 = pnand %p762_p12, %p1138_p4 }
 0x1cf   : > { %p768_p7 = por %p767_p3, %p766_p11 }
 0x1d0   : > { %p764_p1 = pneg %p763_p13 }
 0x1d1   : > { %p770_p5 = por %p769_p8, %p768_p7 }
 0x1d3   : > { %p771_p10 = pnand %p770_p5, %p764_p1 }
 0x1d5   : > { %774 = shalt.err (!%p771_p10)
}
 0x1d6   : > { %s826_s26 = smov 64   ;;  %s827_s30 = smov 4  }
 0x1d7   : > { %595 = dma.vmem_to_hbm [thread:$0]  (%p1138_p4), %s1068_s9, 1024, %s1066_s20, %s408_s16, %s826_s26, %s826_s26, %s827_s30  }
 0x1d8 PF: > { %s436_s8 = sand.u32 1, %s805_s12   ;;  %p1139_p2 = scmp.ne.s32.totalorder %s1128_s25, 0 }
 0x1d9   : > { %p1140_p0 = scmp.ge.s32.totalorder %s817_s15, 2  ;;  %s437_s10 = scalar_lea.sflag [#allocation4], %s436_s8 }
 0x1db   : > { %p609_p9 = pnand %p1140_p0, %p1139_p2 }
 0x1dd   : > { %800 = dma.done.wait (!%p609_p9), %s437_s10, 1024  }
 0x1de   : > { %802 = vsyncadd (!%p609_p9), %s437_s10, 4294966272  ;;  %p17_p6 = scmp.ge.s32.totalorder %s873_s18, 4   ;;  %s1141_s12 = smov %s809_s13 }
 0x1df   : > { %s1142_s13 = smov %s813_s14  ;;  %s1143_s14 = smov %s885_s21 }
 0x1e0   : > { %s1144_s15 = smov %s873_s18  ;;  %19 = sbr.rel (!%p17_p6) target bundleno = 6 (0x6), region = 86 }
 0x1e7   :  { %442 = vsyncpa [#allocation3], 1 }
 0x1e8   :  { %444 = vsyncpa [#allocation3 + $0x1], 1 }
 0x1e9   :  { %445 = vsyncpa [#allocation6], 1 }
 0x1ea   :  { %446 = vsyncpa [#allocation4], 1 }
 0x1eb   :  { %448 = vsyncpa [#allocation4 + $0x1], 1 }

// kernel: decoder_block_forward.7
= control target key start
LH: loop header
LB: loop body
LE: loop exit
PB: predicated region body
PF: predicated region fallthrough
CT: control target
= control target key end

     0   :  { %8 = vsyncpa [#allocation3], 0  ;;  %s1466_s0 = inlined_call_operand.hbm [shape: bf16[2,16,16,4], index: 0, kind: input, shape index: {}]   ;;  %s1467_s1 = inlined_call_operand.hbm [shape: f32[1,4], index: 1, kind: input, shape index: {}]   ;;  %s1468_s2 = inlined_call_operand.hbm [shape: f32[1,4], index: 2, kind: input, shape index: {}]   ;;  %s1469_s3 = inlined_call_operand.hbm [shape: bf16[2,16,16,4], index: 3, kind: output, shape index: {}]  }
   0x1   :  { %10 = vsyncpa [#allocation3 + $0x1], 0 }
   0x2   :  { %11 = vsyncpa [#allocation6], 0 }
   0x3   :  { %12 = vsyncpa [#allocation4], 0 }
   0x4   :  { %14 = vsyncpa [#allocation4 + $0x1], 0  ;;  %s1077_s12 = smov 0   ;;  %s1079_s13 = smov 0  }
   0x5   :  { %s1081_s14 = smov 0   ;;  %s1083_s15 = smov 0  }
   0x6 LB: > { %s1098_s16 = sadd.s32 4294967295, %s1047_s15   ;;  %s655_s17 = sadd.s32 4294967294, %s1047_s15   ;;  %s1047_s15 = sphi %s1083_s15, %s1494_s15   ;;  %s1043_s14 = sphi %s1081_s14, %s1493_s14   ;;  %s1039_s13 = sphi %s1079_s13, %s1492_s13   ;;  %s1035_s12 = sphi %s1077_s12, %s1491_s12  }
   0x7   : > { %s1102_s18 = sadd.s32 1, %s1047_s15   ;;  %s27_s19 = sadd.s32 1, %s1043_s14 }
   0x8   : > { %s24_s20 = ssub.s32 %s1047_s15, %s1102_s18  ;;  %p34_p0 = scmp.ne.s32.totalorder %s1043_s14, %s1039_s13 }
   0x9   : > { %p25_p1 = scmp.eq.s32.totalorder %s24_s20, 0  ;;  %p35_p2 = scmp.eq.s32.totalorder %s1047_s15, 0 }
   0xa   : > { %p40_p3 = scmp.ne.s32.totalorder %s1039_s13, %s1035_s12  ;;  %p1470_p4 = scmp.eq.s32.totalorder %s1098_s16, 0 }
   0xb   : > { %s1114_s21 = scalar_select %p25_p1, %s1043_s14, %s27_s19  }
   0xc   : > { %p1116_p5 = por %p35_p2, %p34_p0  ;;  %p1122_p6 = por %p1470_p4, %p40_p3 }
   0xd   : > { %p106_p7 = scmp.eq.s32.totalorder %s1098_s16, 1  ;;  %p112_p8 = scmp.eq.s32.totalorder %s655_s17, 1 }
   0xe   : > { %s1476_s23 = scalar_select %p1122_p6, 1, 0 }
   0xf   : > { %p656_p9 = scmp.ge.s32.totalorder %s1047_s15, 1  ;;  %p119_p10 = scmp.lt.s32.totalorder %s1047_s15, 3 }
  0x10   : > { %p1129_p11 = por %p106_p7, %p34_p0  ;;  %p1133_p12 = por %p112_p8, %p40_p3 }
  0x11   : > { %p1137_p13 = pnand %p656_p9, %p119_p10  ;;  %s1049_s27 = smov [#allocation5]  }
  0x12   : > { %s1477_s24 = scalar_select %p1129_p11, 1, 0 }
  0x13   : > { %s1478_s25 = scalar_select %p1133_p12, 1, 0 }
  0x14   : > { %s1479_s26 = scalar_select %p1137_p13, 1, 0 }
  0x15   : > { %p832_p2 = pneg %p1137_p13  ;;  %s132_s28 = sshll.u32 %s1049_s27, 4  ;;  %s133_s28 = int_to_ptr.vmem [resolvable:$true] %s132_s28 }
  0x16   : > { %p849_p4 = scmp.lt.s32.totalorder %s1047_s15, 2  ;;  %p1480_p0 = scmp.eq.s32.totalorder %s1098_s16, 0 }
  0x17   : > { %s1050_s4 = smov [#allocation7]   ;;  %s891_s8 = scalar_lea.hbm %s1467_s1, 16 }
  0x18   : > { %p1147_p7 = pnand %p832_p2, %p1480_p0  ;;  %p1153_p3 = pnand %p849_p4, %p1116_p5 }
  0x19   : > { %s143_s5 = sshll.u32 %s1050_s4, 4  ;;  %p892_p8 = scmp.ne.s32.totalorder %s1467_s1, %s891_s8  ;;  %s1157_s5 = int_to_ptr.vmem [resolvable:$true] %s143_s5 }
  0x1a   : > { %s1482_s30 = scalar_select %p1153_p3, 1, 0 }
  0x1b   : > { %p893_p9 = pneg %p1147_p7  ;;  %p898_p10 = scmp.lt.u32.totalorder %s891_s8, %s1467_s1 }
  0x1d   : > { %p894_p4 = pnand %p893_p9, %p892_p8 }
  0x1f   : > { %p895_p5 = pneg %p894_p4 }
  0x21   : > { %p900_p2 = pnand %p898_p10, %p895_p5 }
  0x23   : > { %903 = shalt.err (!%p900_p2)
}
  0x24   : > { %s904_s19 = scalar_lea.vmem %s133_s28, 16  ;;  %s911_s20 = scalar_lea.vmem %s133_s28, 32 }
  0x25   : > { %p905_p0 = scmp.ne.s32.totalorder %s133_s28, %s904_s19  ;;  %p912_p11 = scmp.lt.s32.totalorder %s133_s28, %s133_s28 }
  0x26   : > { %p913_p6 = scmp.lt.s32.totalorder %s911_s20, %s904_s19 }
  0x27   : > { %p907_p1 = pnand %p905_p0, %p893_p9 }
  0x28   : > { %p914_p13 = por %p913_p6, %p912_p11 }
  0x29   : > { %p908_p12 = pneg %p907_p1 }
  0x2b   : > { %p915_p3 = pnand %p914_p13, %p908_p12 }
  0x2d   : > { %918 = shalt.err (!%p915_p3)
}
  0x2e   : > { %835 = dma.hbm_to_vmem [thread:$0]  (!%p1147_p7), %s1467_s1, 16, %s133_s28, [#allocation6]  }
  0x2f   : > { %s154_s4 = sand.u32 1, %s1043_s14   ;;  %s919_s8 = scalar_lea.hbm %s1468_s2, 16 }
  0x30   : > { %p920_p1 = scmp.ne.s32.totalorder %s1468_s2, %s919_s8  ;;  %p926_p12 = scmp.lt.u32.totalorder %s919_s8, %s1468_s2 }
  0x32   : > { %p922_p6 = pnand %p920_p1, %p893_p9 }
  0x34   : > { %p923_p11 = pneg %p922_p6 }
  0x36   : > { %p928_p13 = pnand %p926_p12, %p923_p11 }
  0x38   : > { %931 = shalt.err (!%p928_p13)
}
  0x39   : > { %s932_s28 = scalar_lea.vmem %s1157_s5, 16  ;;  %s939_s19 = scalar_lea.vmem %s1157_s5, 32 }
  0x3a   : > { %p933_p3 = scmp.ne.s32.totalorder %s1157_s5, %s932_s28  ;;  %p940_p5 = scmp.lt.s32.totalorder %s1157_s5, %s1157_s5 }
  0x3b   : > { %p941_p10 = scmp.lt.s32.totalorder %s939_s19, %s932_s28 }
  0x3c   : > { %p935_p8 = pnand %p933_p3, %p893_p9 }
  0x3d   : > { %p942_p2 = por %p941_p10, %p940_p5 }
  0x3e   : > { %p936_p4 = pneg %p935_p8 }
  0x40   : > { %p943_p0 = pnand %p942_p2, %p936_p4 }
  0x42   : > { %946 = shalt.err (!%p943_p0)
}
  0x43   : > { %838 = dma.hbm_to_vmem [thread:$0]  (!%p1147_p7), %s1468_s2, 16, %s1157_s5, [#allocation6]  }
  0x44   : > { %s660_s27 = sshll.u32 %s154_s4, 7  ;;  %s707_s6 = sshll.u32 %s1047_s15, 11 }
  0x45   : > { %s1212_s9 = scalar_lea.hbm %s1466_s0, %s707_s6  ;;  %s158_s29 = scalar_lea.vmem [#allocation2], %s660_s27 }
  0x46   : > { %s165_s10 = sshll.u32 %s158_s29, 4  ;;  %s1216_s11 = scalar_lea.sflag [#allocation3], %s154_s4  ;;  %s1214_s10 = int_to_ptr.vmem [resolvable:$true] %s165_s10 }
  0x47   : > { %s947_s17 = scalar_lea.hbm %s1212_s9, 2048  ;;  %p1483_p7 = scmp.ne.s32.totalorder %s1482_s30, 0 }
  0x48   : > { %p948_p9 = scmp.ne.s32.totalorder %s1212_s9, %s947_s17  ;;  %s952_s19 = scalar_lea.hbm %s1466_s0, 4096 }
  0x49   : > { %p949_p1 = pneg %p1483_p7  ;;  %p953_p12 = scmp.lt.u32.totalorder %s1212_s9, %s1466_s0 }
  0x4a   : > { %p954_p13 = scmp.lt.u32.totalorder %s952_s19, %s947_s17  ;;  %p956_p8 = scmp.lt.u32.totalorder %s947_s17, %s1212_s9 }
  0x4b   : > { %p950_p6 = pnand %p949_p1, %p948_p9 }
  0x4c   : > { %p955_p3 = por %p954_p13, %p953_p12 }
  0x4d   : > { %p951_p11 = pneg %p950_p6 }
  0x4e   : > { %p957_p4 = por %p956_p8, %p955_p3 }
  0x50   : > { %p958_p5 = pnand %p957_p4, %p951_p11 }
  0x52   : > { %961 = shalt.err (!%p958_p5)
}
  0x53   : > { %s962_s4 = scalar_lea.vmem %s1214_s10, 2048  ;;  %s1051_s27 = smov [#allocation2]  }
  0x54   : > { %p963_p10 = scmp.ne.s32.totalorder %s1214_s10, %s962_s4  ;;  %s967_s6 = sshll.u32 %s1051_s27, 4  ;;  %s968_s6 = int_to_ptr.vmem [resolvable:$false] %s967_s6 }
  0x55   : > { %s969_s7 = scalar_lea.vmem %s968_s6, 4096  ;;  %p970_p9 = scmp.lt.s32.totalorder %s1214_s10, %s968_s6 }
  0x56   : > { %p965_p2 = pnand %p963_p10, %p949_p1  ;;  %p971_p6 = scmp.lt.s32.totalorder %s969_s7, %s962_s4 }
  0x58   : > { %p966_p0 = pneg %p965_p2  ;;  %p972_p12 = por %p971_p6, %p970_p9 }
  0x5a   : > { %p973_p13 = pnand %p972_p12, %p966_p0 }
  0x5c   : > { %976 = shalt.err (!%p973_p13)
}
  0x5d   : > { %s1052_s8 = smov 64   ;;  %s1053_s29 = smov 4  }
  0x5e   : > { %842 = dma.hbm_to_vmem [thread:$0]  (!%p1483_p7), %s1212_s9, 2048, %s1214_s10, %s1216_s11, %s1052_s8, %s1052_s8, %s1053_s29  }
  0x5f   : > { %p1484_p1 = scmp.ne.s32.totalorder %s1479_s26, 0 }
  0x60   : > { %s1247_s17 = sand.u32 (!%p1484_p1), 1, %s1039_s13   ;;  %p1485_p11 = scmp.ne.s32.totalorder (!%p1484_p1), %s1476_s23, 0 }
  0x61   : > { %177 = sbr.rel (%p1484_p1) target bundleno = 166 (0xa6), region = 32  ;;  %s664_s5 = sshll.u32 (!%p1484_p1), %s1247_s17, 7 }
  0x62   : > { %s180_s28 = scalar_lea.sflag (!%p1484_p1), [#allocation3], %s1247_s17  ;;  %s1253_s19 = scalar_lea.vmem (!%p1484_p1), [#allocation2], %s664_s5 }
  0x68   : > { %1022 = dma.done.wait (%p1485_p11), %s180_s28, 2048  }
  0x69   : > { %1024 = vsyncadd (%p1485_p11), %s180_s28, 4294965248  ;;  %p1486_p7 = scmp.eq.s32.totalorder %s1098_s16, 0 }
  0x6b   : > { %1026 = dma.done.wait (%p1486_p7), [#allocation6], 32   ;;  %p1487_p3 = pmov %p1486_p7 }
  0x6c   : > { %v742_v0 = vld [vmem:[%s1253_s19] sm:$0xff]   ;;  %vm516_vm0 = vcmask 27648   ;;  %v805_v4 = vld [vmem:[%s1253_s19 + $0x8] sm:$0xff]   ;;  %v806_v5 = vld [vmem:[%s1253_s19 + $0x10] sm:$0xff]   ;;  %s1293_s23 = scalar_lea.vmem [#allocation8], %s664_s5  ;;  %s740_s26 = sshll.u32 %s1098_s16, 11 }
  0x6d   : > { %1028 = vsyncadd (%p1487_p3), [#allocation6], 4294967264  ;;  %v1264_v1 = vld [vmem:[#allocation5] ss:$0 sm:$0xff]  ;;  %v743_v2 = vunpack.c.l.bf16 %v742_v0  ;;  %v744_v3 = vunpack.c.h.bf16 %v742_v0  ;;  %v807_v6 = vld [vmem:[%s1253_s19 + $0x18] sm:$0xff]   ;;  %v747_v8 = vunpack.c.l.bf16 %v805_v4  ;;  %v748_v9 = vunpack.c.h.bf16 %v805_v4  ;;  %s563_s30 = sshll.u32 %s1293_s23, 4  ;;  %s1404_s10 = scalar_lea.hbm %s1469_s3, %s740_s26  ;;  %s1406_s30 = int_to_ptr.vmem [resolvable:$true] %s563_s30 }
  0x6e   : > { %v1269_v7 = vld [vmem:[#allocation7] ss:$0 sm:$0xff]  ;;  %v751_v10 = vunpack.c.l.bf16 %v806_v5  ;;  %v752_v11 = vunpack.c.h.bf16 %v806_v5  ;;  %v755_v14 = vunpack.c.l.bf16 %v807_v6  ;;  %v756_v15 = vunpack.c.h.bf16 %v807_v6  ;;  %v809_v41 = vld [vmem:[%s1253_s19 + $0x28] sm:$0xff]   ;;  %v810_v42 = vld [vmem:[%s1253_s19 + $0x30] sm:$0xff]   ;;  %s550_s11 = scalar_lea.sflag [#allocation4], %s1247_s17  ;;  %s977_s20 = scalar_lea.vmem %s1406_s30, 2048 }
  0x6f   : > { %v285_v12 = vmul.f32 %v743_v2, %v1264_v1  ;;  %v286_v13 = vmul.f32 %v744_v3, %v1264_v1  ;;  %v287_v16 = vmul.f32 %v747_v8, %v1264_v1  ;;  %v288_v17 = vmul.f32 %v748_v9, %v1264_v1  ;;  %v808_v36 = vld [vmem:[%s1253_s19 + $0x20] sm:$0xff]   ;;  %v811_v47 = vld [vmem:[%s1253_s19 + $0x38] sm:$0xff]   ;;  %p978_p8 = scmp.ne.s32.totalorder %s1406_s30, %s977_s20  ;;  %p1488_p4 = scmp.ne.s32.totalorder %s1477_s24, 0 }
  0x70   : > { %v289_v18 = vmul.f32 %v751_v10, %v1264_v1  ;;  %v290_v19 = vmul.f32 %v752_v11, %v1264_v1  ;;  %v291_v22 = vmul.f32 %v755_v14, %v1264_v1  ;;  %v292_v23 = vmul.f32 %v756_v15, %v1264_v1  ;;  %s1054_s22 = smov [#allocation8]  }
  0x71   : > { %v324_v20 = vadd.f32 %v1269_v7, %v285_v12  ;;  %v325_v21 = vadd.f32 %v1269_v7, %v286_v13  ;;  %v326_v24 = vadd.f32 %v1269_v7, %v287_v16  ;;  %v327_v25 = vadd.f32 %v1269_v7, %v288_v17  ;;  %p979_p5 = pnand %p978_p8, %p1488_p4  ;;  %s981_s4 = sshll.u32 %s1054_s22, 4  ;;  %s982_s4 = int_to_ptr.vmem [resolvable:$false] %s981_s4 }
  0x72   : > { %v328_v26 = vadd.f32 %v1269_v7, %v289_v18  ;;  %v329_v27 = vadd.f32 %v1269_v7, %v290_v19  ;;  %v330_v30 = vadd.f32 %v1269_v7, %v291_v22  ;;  %v331_v31 = vadd.f32 %v1269_v7, %v292_v23  ;;  %v812_v18 = vld [vmem:[%s1253_s19 + $0x40] sm:$0xff]   ;;  %v813_v23 = vld [vmem:[%s1253_s19 + $0x48] sm:$0xff]   ;;  %s983_s27 = scalar_lea.vmem %s982_s4, 4096  ;;  %p984_p2 = scmp.lt.s32.totalorder %s1406_s30, %s982_s4 }
  0x73   : > { %v356_v28 = vmax.f32 %v324_v20, 0.0  ;;  %v357_v29 = vmax.f32 %v325_v21, 0.0  ;;  %v358_v32 = vmax.f32 %v326_v24, 0.0  ;;  %v359_v33 = vmax.f32 %v327_v25, 0.0  ;;  %v814_v24 = vld [vmem:[%s1253_s19 + $0x50] sm:$0xff]   ;;  %p980_p10 = pneg %p979_p5  ;;  %p985_p0 = scmp.lt.s32.totalorder %s983_s27, %s977_s20 }
  0x74   : > { %v360_v34 = vmax.f32 %v328_v26, 0.0  ;;  %v361_v35 = vmax.f32 %v329_v27, 0.0  ;;  %v362_v39 = vmax.f32 %v330_v30, 0.0  ;;  %v363_v40 = vmax.f32 %v331_v31, 0.0 }
  0x75   : > { %v708_v37 = vpack.c.bf16 %v356_v28, %v356_v28  ;;  %v709_v38 = vpack.c.bf16 %v357_v29, %v357_v29  ;;  %v710_v43 = vpack.c.bf16 %v358_v32, %v358_v32  ;;  %v711_v44 = vpack.c.bf16 %v359_v33, %v359_v33  ;;  %v815_v29 = vld [vmem:[%s1253_s19 + $0x58] sm:$0xff]   ;;  %p986_p9 = por %p985_p0, %p984_p2 }
  0x76   : > { %v712_v45 = vpack.c.bf16 %v360_v34, %v360_v34  ;;  %v713_v46 = vpack.c.bf16 %v361_v35, %v361_v35  ;;  %v714_v48 = vpack.c.bf16 %v362_v39, %v362_v39  ;;  %v715_v49 = vpack.c.bf16 %v363_v40, %v363_v40 }
  0x77   : > { %517 = vst.msk [vmem:[%s1293_s23] sm:$0xf] %vm516_vm0, %v708_v37  ;;  %518 = vst.msk [vmem:[%s1293_s23 + $0x4] sm:$0xf] %vm516_vm0, %v709_v38  ;;  %v759_v50 = vunpack.c.l.bf16 %v808_v36  ;;  %v760_v51 = vunpack.c.h.bf16 %v808_v36  ;;  %v763_v52 = vunpack.c.l.bf16 %v809_v41  ;;  %v764_v53 = vunpack.c.h.bf16 %v809_v41  ;;  %p987_p6 = pnand %p986_p9, %p980_p10 }
  0x78   : > { %519 = vst.msk [vmem:[%s1293_s23 + $0x8] sm:$0xf] %vm516_vm0, %v710_v43  ;;  %520 = vst.msk [vmem:[%s1293_s23 + $0xc] sm:$0xf] %vm516_vm0, %v711_v44  ;;  %v767_v54 = vunpack.c.l.bf16 %v810_v42  ;;  %v768_v55 = vunpack.c.h.bf16 %v810_v42  ;;  %v771_v58 = vunpack.c.l.bf16 %v811_v47  ;;  %v772_v59 = vunpack.c.h.bf16 %v811_v47 }
  0x79   : > { %521 = vst.msk [vmem:[%s1293_s23 + $0x10] sm:$0xf] %vm516_vm0, %v712_v45  ;;  %522 = vst.msk [vmem:[%s1293_s23 + $0x14] sm:$0xf] %vm516_vm0, %v713_v46  ;;  %v293_v56 = vmul.f32 %v759_v50, %v1264_v1  ;;  %v294_v57 = vmul.f32 %v760_v51, %v1264_v1  ;;  %v295_v60 = vmul.f32 %v763_v52, %v1264_v1  ;;  %v775_v32 = vunpack.c.l.bf16 %v812_v18 }
  0x7a   : > { %523 = vst.msk [vmem:[%s1293_s23 + $0x18] sm:$0xf] %vm516_vm0, %v714_v48  ;;  %524 = vst.msk [vmem:[%s1293_s23 + $0x1c] sm:$0xf] %vm516_vm0, %v715_v49  ;;  %v296_v61 = vmul.f32 %v764_v53, %v1264_v1  ;;  %v297_v62 = vmul.f32 %v767_v54, %v1264_v1  ;;  %v298_v63 = vmul.f32 %v768_v55, %v1264_v1  ;;  %v776_v33 = vunpack.c.h.bf16 %v812_v18 }
  0x7b   : > { %v332_v0 = vadd.f32 %v1269_v7, %v293_v56  ;;  %v333_v2 = vadd.f32 %v1269_v7, %v294_v57  ;;  %v299_v3 = vmul.f32 %v771_v58, %v1264_v1  ;;  %v300_v4 = vmul.f32 %v772_v59, %v1264_v1 }
  0x7c   : > { %v334_v5 = vadd.f32 %v1269_v7, %v295_v60  ;;  %v335_v6 = vadd.f32 %v1269_v7, %v296_v61  ;;  %v336_v8 = vadd.f32 %v1269_v7, %v297_v62  ;;  %v337_v9 = vadd.f32 %v1269_v7, %v298_v63  ;;  %v816_v62 = vld [vmem:[%s1253_s19 + $0x60] sm:$0xff]  }
  0x7d   : > { %v364_v10 = vmax.f32 %v332_v0, 0.0  ;;  %v365_v11 = vmax.f32 %v333_v2, 0.0  ;;  %v338_v12 = vadd.f32 %v1269_v7, %v299_v3  ;;  %v339_v13 = vadd.f32 %v1269_v7, %v300_v4  ;;  %v817_v4 = vld [vmem:[%s1253_s19 + $0x68] sm:$0xff]  }
  0x7e   : > { %v366_v14 = vmax.f32 %v334_v5, 0.0  ;;  %v367_v15 = vmax.f32 %v335_v6, 0.0  ;;  %v368_v16 = vmax.f32 %v336_v8, 0.0  ;;  %v369_v17 = vmax.f32 %v337_v9, 0.0  ;;  %v818_v5 = vld [vmem:[%s1253_s19 + $0x70] sm:$0xff]  }
  0x7f   : > { %v716_v19 = vpack.c.bf16 %v364_v10, %v364_v10  ;;  %v717_v20 = vpack.c.bf16 %v365_v11, %v365_v11  ;;  %v370_v21 = vmax.f32 %v338_v12, 0.0  ;;  %v371_v22 = vmax.f32 %v339_v13, 0.0  ;;  %v819_v11 = vld [vmem:[%s1253_s19 + $0x78] sm:$0xff]  }
  0x80   : > { %v718_v25 = vpack.c.bf16 %v366_v14, %v366_v14  ;;  %v719_v26 = vpack.c.bf16 %v367_v15, %v367_v15  ;;  %v720_v27 = vpack.c.bf16 %v368_v16, %v368_v16  ;;  %v721_v28 = vpack.c.bf16 %v369_v17, %v369_v17 }
  0x81   : > { %525 = vst.msk [vmem:[%s1293_s23 + $0x20] sm:$0xf] %vm516_vm0, %v716_v19  ;;  %526 = vst.msk [vmem:[%s1293_s23 + $0x24] sm:$0xf] %vm516_vm0, %v717_v20  ;;  %v722_v30 = vpack.c.bf16 %v370_v21, %v370_v21  ;;  %v723_v31 = vpack.c.bf16 %v371_v22, %v371_v22  ;;  %v779_v34 = vunpack.c.l.bf16 %v813_v23  ;;  %v780_v35 = vunpack.c.h.bf16 %v813_v23 }
  0x82   : > { %527 = vst.msk [vmem:[%s1293_s23 + $0x28] sm:$0xf] %vm516_vm0, %v718_v25  ;;  %528 = vst.msk [vmem:[%s1293_s23 + $0x2c] sm:$0xf] %vm516_vm0, %v719_v26  ;;  %v783_v36 = vunpack.c.l.bf16 %v814_v24  ;;  %v784_v37 = vunpack.c.h.bf16 %v814_v24  ;;  %v301_v38 = vmul.f32 %v775_v32, %v1264_v1  ;;  %v302_v39 = vmul.f32 %v776_v33, %v1264_v1 }
  0x83   : > { %529 = vst.msk [vmem:[%s1293_s23 + $0x30] sm:$0xf] %vm516_vm0, %v720_v27  ;;  %530 = vst.msk [vmem:[%s1293_s23 + $0x34] sm:$0xf] %vm516_vm0, %v721_v28  ;;  %v787_v40 = vunpack.c.l.bf16 %v815_v29  ;;  %v788_v41 = vunpack.c.h.bf16 %v815_v29  ;;  %v303_v42 = vmul.f32 %v779_v34, %v1264_v1  ;;  %v304_v43 = vmul.f32 %v780_v35, %v1264_v1 }
  0x84   : > { %531 = vst.msk [vmem:[%s1293_s23 + $0x38] sm:$0xf] %vm516_vm0, %v722_v30  ;;  %532 = vst.msk [vmem:[%s1293_s23 + $0x3c] sm:$0xf] %vm516_vm0, %v723_v31  ;;  %v305_v44 = vmul.f32 %v783_v36, %v1264_v1  ;;  %v306_v45 = vmul.f32 %v784_v37, %v1264_v1  ;;  %v340_v46 = vadd.f32 %v1269_v7, %v301_v38  ;;  %v791_v14 = vunpack.c.l.bf16 %v816_v62 }
  0x85   : > { %v341_v47 = vadd.f32 %v1269_v7, %v302_v39  ;;  %v307_v48 = vmul.f32 %v787_v40, %v1264_v1  ;;  %v308_v49 = vmul.f32 %v788_v41, %v1264_v1  ;;  %v342_v50 = vadd.f32 %v1269_v7, %v303_v42 }
  0x86   : > { %v343_v51 = vadd.f32 %v1269_v7, %v304_v43  ;;  %v344_v52 = vadd.f32 %v1269_v7, %v305_v44  ;;  %v345_v53 = vadd.f32 %v1269_v7, %v306_v45  ;;  %v372_v54 = vmax.f32 %v340_v46, 0.0 }
  0x87   : > { %v373_v55 = vmax.f32 %v341_v47, 0.0  ;;  %v346_v56 = vadd.f32 %v1269_v7, %v307_v48  ;;  %v347_v57 = vadd.f32 %v1269_v7, %v308_v49  ;;  %v374_v58 = vmax.f32 %v342_v50, 0.0 }
  0x88   : > { %v375_v59 = vmax.f32 %v343_v51, 0.0  ;;  %v376_v60 = vmax.f32 %v344_v52, 0.0  ;;  %v377_v61 = vmax.f32 %v345_v53, 0.0  ;;  %v724_v63 = vpack.c.bf16 %v372_v54, %v372_v54 }
  0x89   : > { %v725_v0 = vpack.c.bf16 %v373_v55, %v373_v55  ;;  %v378_v2 = vmax.f32 %v346_v56, 0.0  ;;  %v379_v3 = vmax.f32 %v347_v57, 0.0  ;;  %v726_v6 = vpack.c.bf16 %v374_v58, %v374_v58 }
  0x8a   : > { %v727_v8 = vpack.c.bf16 %v375_v59, %v375_v59  ;;  %v728_v9 = vpack.c.bf16 %v376_v60, %v376_v60  ;;  %v729_v10 = vpack.c.bf16 %v377_v61, %v377_v61  ;;  %533 = vst.msk [vmem:[%s1293_s23 + $0x40] sm:$0xf] %vm516_vm0, %v724_v63  ;;  %v792_v15 = vunpack.c.h.bf16 %v816_v62 }
  0x8b   : > { %534 = vst.msk [vmem:[%s1293_s23 + $0x44] sm:$0xf] %vm516_vm0, %v725_v0  ;;  %v730_v12 = vpack.c.bf16 %v378_v2, %v378_v2  ;;  %v731_v13 = vpack.c.bf16 %v379_v3, %v379_v3  ;;  %535 = vst.msk [vmem:[%s1293_s23 + $0x48] sm:$0xf] %vm516_vm0, %v726_v6  ;;  %v795_v16 = vunpack.c.l.bf16 %v817_v4  ;;  %v796_v17 = vunpack.c.h.bf16 %v817_v4 }
  0x8c   : > { %536 = vst.msk [vmem:[%s1293_s23 + $0x4c] sm:$0xf] %vm516_vm0, %v727_v8  ;;  %537 = vst.msk [vmem:[%s1293_s23 + $0x50] sm:$0xf] %vm516_vm0, %v728_v9  ;;  %v799_v18 = vunpack.c.l.bf16 %v818_v5  ;;  %v800_v19 = vunpack.c.h.bf16 %v818_v5  ;;  %v309_v20 = vmul.f32 %v791_v14, %v1264_v1  ;;  %v310_v21 = vmul.f32 %v792_v15, %v1264_v1 }
  0x8d   : > { %538 = vst.msk [vmem:[%s1293_s23 + $0x54] sm:$0xf] %vm516_vm0, %v729_v10  ;;  %539 = vst.msk [vmem:[%s1293_s23 + $0x58] sm:$0xf] %vm516_vm0, %v730_v12  ;;  %v803_v22 = vunpack.c.l.bf16 %v819_v11  ;;  %v804_v23 = vunpack.c.h.bf16 %v819_v11  ;;  %v311_v24 = vmul.f32 %v795_v16, %v1264_v1  ;;  %v312_v25 = vmul.f32 %v796_v17, %v1264_v1 }
  0x8e   : > { %540 = vst.msk [vmem:[%s1293_s23 + $0x5c] sm:$0xf] %vm516_vm0, %v731_v13  ;;  %v313_v26 = vmul.f32 %v799_v18, %v1264_v1  ;;  %v314_v27 = vmul.f32 %v800_v19, %v1264_v1  ;;  %v348_v28 = vadd.f32 %v1269_v7, %v309_v20  ;;  %v349_v29 = vadd.f32 %v1269_v7, %v310_v21 }
  0x8f   : > { %v315_v30 = vmul.f32 %v803_v22, %v1264_v1  ;;  %v316_v31 = vmul.f32 %v804_v23, %v1264_v1  ;;  %v350_v32 = vadd.f32 %v1269_v7, %v311_v24  ;;  %v351_v33 = vadd.f32 %v1269_v7, %v312_v25 }
  0x90   : > { %v352_v34 = vadd.f32 %v1269_v7, %v313_v26  ;;  %v353_v35 = vadd.f32 %v1269_v7, %v314_v27  ;;  %v380_v36 = vmax.f32 %v348_v28, 0.0  ;;  %v381_v37 = vmax.f32 %v349_v29, 0.0 }
  0x91   : > { %v354_v38 = vadd.f32 %v1269_v7, %v315_v30  ;;  %v355_v39 = vadd.f32 %v1269_v7, %v316_v31  ;;  %v382_v40 = vmax.f32 %v350_v32, 0.0  ;;  %v383_v1 = vmax.f32 %v351_v33, 0.0 }
  0x92   : > { %v384_v41 = vmax.f32 %v352_v34, 0.0  ;;  %v385_v42 = vmax.f32 %v353_v35, 0.0  ;;  %v732_v43 = vpack.c.bf16 %v380_v36, %v380_v36  ;;  %v733_v44 = vpack.c.bf16 %v381_v37, %v381_v37 }
  0x93   : > { %v386_v45 = vmax.f32 %v354_v38, 0.0  ;;  %v387_v46 = vmax.f32 %v355_v39, 0.0  ;;  %v734_v47 = vpack.c.bf16 %v382_v40, %v382_v40  ;;  %v735_v7 = vpack.c.bf16 %v383_v1, %v383_v1 }
  0x94   : > { %v736_v48 = vpack.c.bf16 %v384_v41, %v384_v41  ;;  %v737_v49 = vpack.c.bf16 %v385_v42, %v385_v42  ;;  %541 = vst.msk [vmem:[%s1293_s23 + $0x60] sm:$0xf] %vm516_vm0, %v732_v43  ;;  %542 = vst.msk [vmem:[%s1293_s23 + $0x64] sm:$0xf] %vm516_vm0, %v733_v44 }
  0x95   : > { %v738_v50 = vpack.c.bf16 %v386_v45, %v386_v45  ;;  %v739_v51 = vpack.c.bf16 %v387_v46, %v387_v46  ;;  %543 = vst.msk [vmem:[%s1293_s23 + $0x68] sm:$0xf] %vm516_vm0, %v734_v47  ;;  %544 = vst.msk [vmem:[%s1293_s23 + $0x6c] sm:$0xf] %vm516_vm0, %v735_v7 }
  0x96   : > { %545 = vst.msk [vmem:[%s1293_s23 + $0x70] sm:$0xf] %vm516_vm0, %v736_v48  ;;  %546 = vst.msk [vmem:[%s1293_s23 + $0x74] sm:$0xf] %vm516_vm0, %v737_v49 }
  0x97   : > { %547 = vst.msk [vmem:[%s1293_s23 + $0x78] sm:$0xf] %vm516_vm0, %v738_v50  ;;  %548 = vst.msk [vmem:[%s1293_s23 + $0x7c] sm:$0xf] %vm516_vm0, %v739_v51 }
  0x98   : > { %990 = shalt.err (!%p987_p6)
}
  0x99   : > { %s991_s6 = scalar_lea.hbm %s1404_s10, 2048  ;;  %s995_s29 = scalar_lea.hbm %s1469_s3, 4096 }
  0x9a   : > { %p992_p12 = scmp.ne.s32.totalorder %s1404_s10, %s991_s6  ;;  %p996_p11 = scmp.lt.u32.totalorder %s1404_s10, %s1469_s3 }
  0x9b   : > { %p997_p7 = scmp.lt.u32.totalorder %s995_s29, %s991_s6  ;;  %p999_p8 = scmp.lt.u32.totalorder %s991_s6, %s1404_s10 }
  0x9c   : > { %p993_p13 = pnand %p992_p12, %p1488_p4 }
  0x9d   : > { %p998_p3 = por %p997_p7, %p996_p11 }
  0x9e   : > { %p994_p1 = pneg %p993_p13 }
  0x9f   : > { %p1000_p5 = por %p999_p8, %p998_p3 }
  0xa1   : > { %p1001_p10 = pnand %p1000_p5, %p994_p1 }
  0xa3   : > { %1004 = shalt.err (!%p1001_p10)
}
  0xa4   : > { %s1055_s19 = smov 64   ;;  %s1056_s23 = smov 4  }
  0xa5   : > { %830 = dma.vmem_to_hbm [thread:$0]  (%p1488_p4), %s1406_s30, 2048, %s1404_s10, %s550_s11, %s1055_s19, %s1055_s19, %s1056_s23  }
  0xa6 PF: > { %s578_s26 = sand.u32 1, %s1035_s12   ;;  %p1489_p2 = scmp.ne.s32.totalorder %s1478_s25, 0 }
  0xa7   : > { %p1490_p0 = scmp.ge.s32.totalorder %s1047_s15, 2  ;;  %s579_s16 = scalar_lea.sflag [#allocation4], %s578_s26 }
  0xa9   : > { %p844_p9 = pnand %p1490_p0, %p1489_p2 }
  0xab   : > { %1030 = dma.done.wait (!%p844_p9), %s579_s16, 2048  }
  0xac   : > { %1032 = vsyncadd (!%p844_p9), %s579_s16, 4294965248  ;;  %p17_p6 = scmp.ge.s32.totalorder %s1102_s18, 4   ;;  %s1491_s12 = smov %s1039_s13 }
  0xad   : > { %s1492_s13 = smov %s1043_s14  ;;  %s1493_s14 = smov %s1114_s21 }
  0xae   : > { %s1494_s15 = smov %s1102_s18  ;;  %19 = sbr.rel (!%p17_p6) target bundleno = 6 (0x6), region = 85 }
  0xb5   :  { %584 = vsyncpa [#allocation3], 1 }
  0xb6   :  { %586 = vsyncpa [#allocation3 + $0x1], 1 }
  0xb7   :  { %587 = vsyncpa [#allocation6], 1 }
  0xb8   :  { %588 = vsyncpa [#allocation4], 1 }
  0xb9   :  { %590 = vsyncpa [#allocation4 + $0x1], 1 }

// kernel: decoder_block_forward.6
= control target key start
LH: loop header
LB: loop body
LE: loop exit
PB: predicated region body
PF: predicated region fallthrough
CT: control target
= control target key end

     0   :  { %11 = vsyncpa [#allocation4], 0  ;;  %s4377_s0 = inlined_call_operand.hbm [shape: bf16[2,16,16,4], index: 0, kind: input, shape index: {}]   ;;  %s4378_s1 = inlined_call_operand.hbm [shape: f32[1,4], index: 1, kind: input, shape index: {}]   ;;  %s4379_s2 = inlined_call_operand.hbm [shape: f32[1,4], index: 2, kind: input, shape index: {}]   ;;  %s4380_s3 = inlined_call_operand.hbm [shape: bf16[3,12,4], index: 3, kind: input, shape index: {}]   ;;  %s4381_s4 = inlined_call_operand.hbm [shape: bf16[2,16,16,4], index: 4, kind: output, shape index: {0}]   ;;  %s4382_s5 = inlined_call_operand.hbm [shape: f32[2,2,4], index: 5, kind: output, shape index: {1}]  }
   0x1   :  { %13 = vsyncpa [#allocation4 + $0x1], 0 }
   0x2   :  { %14 = vsyncpa [#allocation7], 0 }
   0x3   :  { %15 = vsyncpa [#allocation10], 0 }
   0x4   :  { %16 = vsyncpa [#allocation5], 0 }
   0x5   :  { %18 = vsyncpa [#allocation5 + $0x1], 0 }
   0x6   :  { %19 = vsyncpa [#allocation13], 0 }
   0x7   :  { %21 = vsyncpa [#allocation13 + $0x1], 0  ;;  %s3057_s18 = smov 0   ;;  %s3059_s19 = smov 0  }
   0x8   :  { %s3061_s20 = smov 0   ;;  %s3063_s21 = smov 0  }
   0x9 LB: > { %s3078_s22 = sadd.s32 4294967295, %s3013_s21   ;;  %s2258_s23 = sadd.s32 4294967294, %s3013_s21   ;;  %s3013_s21 = sphi %s3063_s21, %s4415_s21   ;;  %s3009_s20 = sphi %s3061_s20, %s4414_s20   ;;  %s3005_s19 = sphi %s3059_s19, %s4413_s19   ;;  %s3001_s18 = sphi %s3057_s18, %s4412_s18  }
   0xa   : > { %p47_p0 = scmp.ne.s32.totalorder %s3005_s19, %s3001_s18  ;;  %p4383_p1 = scmp.eq.s32.totalorder %s3078_s22, 0 }
   0xb   : > { %p140_p3 = scmp.eq.s32.totalorder %s2258_s23, 1  ;;  %p2259_p5 = scmp.ge.s32.totalorder %s3013_s21, 1 }
   0xc   : > { %p3087_p4 = por %p4383_p1, %p47_p0  ;;  %p173_p7 = scmp.lt.s32.totalorder %s3013_s21, 3 }
   0xd   : > { %p3092_p6 = por %p140_p3, %p47_p0  ;;  %s3015_s27 = smov [#allocation6]  }
   0xe   : > { %s4387_s24 = scalar_select %p3087_p4, 1, 0 }
   0xf   : > { %s4388_s25 = scalar_select %p3092_p6, 1, 0 }
  0x10   : > { %p3097_p8 = pnand %p2259_p5, %p173_p7  ;;  %s186_s28 = sshll.u32 %s3015_s27, 4  ;;  %s187_s28 = int_to_ptr.vmem [resolvable:$true] %s186_s28 }
  0x11   : > { %s3016_s29 = smov [#allocation8]   ;;  %s3017_s7 = smov [#allocation9]  }
  0x12   : > { %s4389_s26 = scalar_select %p3097_p8, 1, 0 }
  0x13   : > { %p2720_p10 = pneg %p3097_p8  ;;  %s197_s30 = sshll.u32 %s3016_s29, 4  ;;  %s3110_s30 = int_to_ptr.vmem [resolvable:$true] %s197_s30 }
  0x14   : > { %s207_s8 = sshll.u32 %s3017_s7, 4  ;;  %s2793_s11 = scalar_lea.hbm %s4378_s1, 16  ;;  %s3112_s8 = int_to_ptr.vmem [resolvable:$true] %s207_s8 }
  0x15   : > { %p3106_p11 = pnand %p2720_p10, %p4383_p1  ;;  %p2794_p12 = scmp.ne.s32.totalorder %s4378_s1, %s2793_s11 }
  0x16   : > { %p2800_p5 = scmp.lt.u32.totalorder %s2793_s11, %s4378_s1 }
  0x17   : > { %p3122_p13 = pneg %p3106_p11 }
  0x19   : > { %p2796_p0 = pnand %p3122_p13, %p2794_p12 }
  0x1b   : > { %p2797_p3 = pneg %p2796_p0 }
  0x1d   : > { %p2802_p7 = pnand %p2800_p5, %p2797_p3 }
  0x1f   : > { %2805 = shalt.err (!%p2802_p7)
}
  0x20   : > { %s2806_s17 = scalar_lea.vmem %s187_s28, 16  ;;  %s2813_s23 = scalar_lea.vmem %s187_s28, 32 }
  0x21   : > { %p2807_p10 = scmp.ne.s32.totalorder %s187_s28, %s2806_s17  ;;  %p2814_p2 = scmp.lt.s32.totalorder %s187_s28, %s187_s28 }
  0x22   : > { %p2815_p6 = scmp.lt.s32.totalorder %s2813_s23, %s2806_s17 }
  0x23   : > { %p2809_p9 = pnand %p2807_p10, %p3122_p13 }
  0x24   : > { %p2816_p4 = por %p2815_p6, %p2814_p2 }
  0x25   : > { %p2810_p1 = pneg %p2809_p9 }
  0x27   : > { %p2817_p8 = pnand %p2816_p4, %p2810_p1 }
  0x29   : > { %2820 = shalt.err (!%p2817_p8)
}
  0x2a   : > { %2723 = dma.hbm_to_vmem [thread:$0]  (!%p3106_p11), %s4378_s1, 16, %s187_s28, [#allocation7]  }
  0x2b   : > { %s2821_s10 = scalar_lea.hbm %s4379_s2, 16 }
  0x2c   : > { %p2822_p9 = scmp.ne.s32.totalorder %s4379_s2, %s2821_s10  ;;  %p2828_p1 = scmp.lt.u32.totalorder %s2821_s10, %s4379_s2 }
  0x2e   : > { %p2824_p12 = pnand %p2822_p9, %p3122_p13 }
  0x30   : > { %p2825_p2 = pneg %p2824_p12 }
  0x32   : > { %p2830_p4 = pnand %p2828_p1, %p2825_p2 }
  0x34   : > { %2833 = shalt.err (!%p2830_p4)
}
  0x35   : > { %s2834_s28 = scalar_lea.vmem %s3110_s30, 16  ;;  %s2841_s16 = scalar_lea.vmem %s3110_s30, 32 }
  0x36   : > { %p2835_p6 = scmp.ne.s32.totalorder %s3110_s30, %s2834_s28  ;;  %p2842_p3 = scmp.lt.s32.totalorder %s3110_s30, %s3110_s30 }
  0x37   : > { %p2843_p5 = scmp.lt.s32.totalorder %s2841_s16, %s2834_s28 }
  0x38   : > { %p2837_p8 = pnand %p2835_p6, %p3122_p13 }
  0x39   : > { %p2844_p7 = por %p2843_p5, %p2842_p3 }
  0x3a   : > { %p2838_p0 = pneg %p2837_p8 }
  0x3c   : > { %p2845_p10 = pnand %p2844_p7, %p2838_p0 }
  0x3e   : > { %2848 = shalt.err (!%p2845_p10)
}
  0x3f   : > { %2726 = dma.hbm_to_vmem [thread:$0]  (!%p3106_p11), %s4379_s2, 16, %s3110_s30, [#allocation7]  }
  0x40   : > { %s2849_s7 = scalar_lea.hbm %s4380_s3, 384 }
  0x41   : > { %p2850_p9 = scmp.ne.s32.totalorder %s4380_s3, %s2849_s7  ;;  %p2856_p1 = scmp.lt.u32.totalorder %s2849_s7, %s4380_s3 }
  0x43   : > { %p2852_p12 = pnand %p2850_p9, %p3122_p13 }
  0x45   : > { %p2853_p2 = pneg %p2852_p12 }
  0x47   : > { %p2858_p4 = pnand %p2856_p1, %p2853_p2 }
  0x49   : > { %2861 = shalt.err (!%p2858_p4)
}
  0x4a   : > { %s2862_s30 = scalar_lea.vmem %s3112_s8, 384  ;;  %p2870_p3 = scmp.lt.s32.totalorder %s3112_s8, %s3112_s8 }
  0x4b   : > { %p2863_p6 = scmp.ne.s32.totalorder %s3112_s8, %s2862_s30  ;;  %p2871_p5 = scmp.lt.s32.totalorder %s2862_s30, %s2862_s30 }
  0x4d   : > { %p2865_p8 = pnand %p2863_p6, %p3122_p13  ;;  %p2872_p7 = por %p2871_p5, %p2870_p3 }
  0x4f   : > { %p2866_p0 = pneg %p2865_p8 }
  0x51   : > { %p2873_p10 = pnand %p2872_p7, %p2866_p0 }
  0x53   : > { %2876 = shalt.err (!%p2873_p10)
}
  0x54   : > { %s3018_s13 = smov 64   ;;  %s3019_s14 = smov 4  }
  0x55   : > { %2729 = dma.hbm_to_vmem [thread:$0]  (!%p3106_p11), %s4380_s3, 384, %s3112_s8, [#allocation10], %s3018_s13, %s3018_s13, %s3019_s14  }
  0x56   : > { %s3189_s16 = sadd.s32 1, %s3013_s21   ;;  %s34_s23 = sadd.s32 1, %s3009_s20 }
  0x57   : > { %s31_s17 = ssub.s32 %s3013_s21, %s3189_s16  ;;  %p41_p9 = scmp.ne.s32.totalorder %s3009_s20, %s3005_s19 }
  0x58   : > { %p32_p13 = scmp.eq.s32.totalorder %s31_s17, 0  ;;  %p42_p12 = scmp.eq.s32.totalorder %s3013_s21, 0 }
  0x59   : > { %p2744_p2 = scmp.lt.s32.totalorder %s3013_s21, 2  ;;  %p4392_p4 = scmp.eq.s32.totalorder %s3078_s22, 1 }
  0x5a   : > { %s3199_s27 = scalar_select %p32_p13, %s3009_s20, %s34_s23  }
  0x5b   : > { %p43_p1 = por %p42_p12, %p41_p9  ;;  %p3203_p6 = por %p4392_p4, %p41_p9 }
  0x5c   : > { %s221_s29 = sand.u32 1, %s3009_s20   ;;  %s2366_s7 = sshll.u32 %s3013_s21, 11 }
  0x5d   : > { %s2264_s8 = sshll.u32 %s221_s29, 7  ;;  %s3212_s11 = scalar_lea.hbm %s4377_s0, %s2366_s7 }
  0x5e   : > { %s225_s12 = scalar_lea.vmem [#allocation3], %s2264_s8  ;;  %p3214_p11 = pnand %p2744_p2, %p43_p1 }
  0x5f   : > { %s232_s30 = sshll.u32 %s225_s12, 4  ;;  %s3220_s28 = scalar_lea.sflag [#allocation4], %s221_s29  ;;  %s3218_s30 = int_to_ptr.vmem [resolvable:$true] %s232_s30 }
  0x60   : > { %s2877_s17 = scalar_lea.hbm %s3212_s11, 2048  ;;  %p2879_p0 = pneg %p3214_p11 }
  0x61   : > { %p2878_p8 = scmp.ne.s32.totalorder %s3212_s11, %s2877_s17  ;;  %s2882_s8 = scalar_lea.hbm %s4377_s0, 4096 }
  0x62   : > { %p2883_p7 = scmp.lt.u32.totalorder %s3212_s11, %s4377_s0  ;;  %p2884_p10 = scmp.lt.u32.totalorder %s2882_s8, %s2877_s17 }
  0x63   : > { %p2880_p3 = pnand %p2879_p0, %p2878_p8  ;;  %p2886_p9 = scmp.lt.u32.totalorder %s2877_s17, %s3212_s11 }
  0x64   : > { %p2885_p13 = por %p2884_p10, %p2883_p7 }
  0x65   : > { %p2881_p5 = pneg %p2880_p3 }
  0x66   : > { %p2887_p12 = por %p2886_p9, %p2885_p13 }
  0x68   : > { %p2888_p2 = pnand %p2887_p12, %p2881_p5 }
  0x6a   : > { %2891 = shalt.err (!%p2888_p2)
}
  0x6b   : > { %s2892_s29 = scalar_lea.vmem %s3218_s30, 2048  ;;  %s3020_s12 = smov [#allocation3]  }
  0x6c   : > { %p2893_p1 = scmp.ne.s32.totalorder %s3218_s30, %s2892_s29  ;;  %s2897_s23 = sshll.u32 %s3020_s12, 4  ;;  %s2898_s23 = int_to_ptr.vmem [resolvable:$false] %s2897_s23 }
  0x6d   : > { %s2899_s7 = scalar_lea.vmem %s2898_s23, 4096  ;;  %p2900_p3 = scmp.lt.s32.totalorder %s3218_s30, %s2898_s23 }
  0x6e   : > { %p2895_p4 = pnand %p2893_p1, %p2879_p0  ;;  %p2901_p7 = scmp.lt.s32.totalorder %s2899_s7, %s2892_s29 }
  0x70   : > { %p2896_p8 = pneg %p2895_p4  ;;  %p2902_p10 = por %p2901_p7, %p2900_p3 }
  0x72   : > { %p2903_p13 = pnand %p2902_p10, %p2896_p8 }
  0x74   : > { %2906 = shalt.err (!%p2903_p13)
}
  0x75   : > { %2733 = dma.hbm_to_vmem [thread:$0]  (!%p3214_p11), %s3212_s11, 2048, %s3218_s30, %s3220_s28, %s3018_s13, %s3018_s13, %s3019_s14  }
  0x76   : > { %p4395_p0 = scmp.ne.s32.totalorder %s4389_s26, 0 }
  0x77   : > { %s3254_s17 = sand.u32 (!%p4395_p0), 1, %s3005_s19   ;;  %p4396_p5 = scmp.ne.s32.totalorder (!%p4395_p0), %s4387_s24, 0 }
  0x78   : > { %244 = sbr.rel (%p4395_p0) target bundleno = 710 (0x2c6), region = 36  ;;  %s2268_s8 = sshll.u32 (!%p4395_p0), %s3254_s17, 7 }
  0x79   : > { %s247_s9 = scalar_lea.sflag (!%p4395_p0), [#allocation4], %s3254_s17  ;;  %s3260_s15 = scalar_lea.vmem (!%p4395_p0), [#allocation3], %s2268_s8 }
  0x7f   : > { %2980 = dma.done.wait (%p4396_p5), %s247_s9, 2048  }
  0x80   : > { %2982 = vsyncadd (%p4396_p5), %s247_s9, 4294965248  ;;  %p4397_p11 = scmp.eq.s32.totalorder %s3078_s22, 0 }
  0x82   : > { %2984 = dma.done.wait (%p4397_p11), [#allocation7], 32   ;;  %p4398_p9 = pmov %p4397_p11 }
  0x84   : > { %2986 = vsyncadd (%p4398_p9), [#allocation7], 4294967264  ;;  %p4399_p12 = pmov %p4398_p9 }
  0x85   : > { %p4400_p2 = pmov %p4398_p9 }
  0x86   : > { %2988 = dma.done.wait (%p4399_p12), [#allocation10], 384  }
  0x87   : > { %2990 = vsyncadd (%p4400_p2), [#allocation10], 4294966912  ;;  %vm485_vm0 = vcmask 97280   ;;  %v3021_v0 = vmov 0   ;;  %v2401_v1 = vld [vmem:[%s3260_s15] sm:$0xff]   ;;  %v2465_v5 = vld [vmem:[%s3260_s15 + $0x10] sm:$0xff]  }
  0x88   : > { %486 = vst.msk [vmem:[#allocation2] sm:$0xff] %vm485_vm0, %v3021_v0  ;;  %488 = vst.msk [vmem:[#allocation2 + $0x88] sm:$0xff] %vm485_vm0, %v3021_v0  ;;  %v3277_v2 = vld [vmem:[#allocation6] ss:$0 sm:$0xff]  ;;  %v2402_v3 = vunpack.c.l.bf16 %v2401_v1  ;;  %v2403_v4 = vunpack.c.h.bf16 %v2401_v1  ;;  %v2464_v6 = vld [vmem:[%s3260_s15 + $0x8] sm:$0xff]   ;;  %v2410_v9 = vunpack.c.l.bf16 %v2465_v5  ;;  %v2411_v10 = vunpack.c.h.bf16 %v2465_v5  ;;  %s3022_s24 = smov 4  }
  0x89   : > { %v2466_v7 = vld [vmem:[%s3260_s15 + $0x18] sm:$0xff]   ;;  %v3282_v8 = vld [vmem:[#allocation8] ss:$0 sm:$0xff]  ;;  %v2406_v11 = vunpack.c.l.bf16 %v2464_v6  ;;  %v2407_v12 = vunpack.c.h.bf16 %v2464_v6  ;;  %v2468_v40 = vld [vmem:[%s3260_s15 + $0x28] sm:$0xff]   ;;  %s3023_s26 = smov 8   ;;  %vm490_vm1 = vcmask 24576  }
  0x8a   : > { %v366_v13 = vmul.f32 %v2402_v3, %v3277_v2  ;;  %v367_v14 = vmul.f32 %v2403_v4, %v3277_v2  ;;  %v2414_v15 = vunpack.c.l.bf16 %v2466_v7  ;;  %v2415_v16 = vunpack.c.h.bf16 %v2466_v7  ;;  %v2467_v29 = vld [vmem:[%s3260_s15 + $0x20] sm:$0xff]   ;;  %v2469_v62 = vld [vmem:[%s3260_s15 + $0x30] sm:$0xff]   ;;  %v2470_v63 = vld [vmem:[%s3260_s15 + $0x38] sm:$0xff]   ;;  %s3892_s13 = scalar_lea.vmem [#allocation11], %s2268_s8  ;;  %s2399_s14 = sshll.u32 %s3078_s22, 11 }
  0x8b   : > { %v370_v17 = vmul.f32 %v2410_v9, %v3277_v2  ;;  %v371_v18 = vmul.f32 %v2411_v10, %v3277_v2  ;;  %v368_v19 = vmul.f32 %v2406_v11, %v3277_v2  ;;  %v369_v20 = vmul.f32 %v2407_v12, %v3277_v2  ;;  %s2111_s11 = sshll.u32 %s3892_s13, 4  ;;  %s4134_s10 = scalar_lea.hbm %s4381_s4, %s2399_s14  ;;  %s4142_s11 = int_to_ptr.vmem [resolvable:$true] %s2111_s11 }
  0x8c   : > { %v405_v21 = vadd.f32 %v3282_v8, %v366_v13  ;;  %v406_v22 = vadd.f32 %v3282_v8, %v367_v14  ;;  %v372_v23 = vmul.f32 %v2414_v15, %v3277_v2  ;;  %v373_v24 = vmul.f32 %v2415_v16, %v3277_v2  ;;  %s2093_s29 = scalar_lea.sflag [#allocation5], %s3254_s17  ;;  %s2907_s12 = scalar_lea.vmem %s4142_s11, 2048 }
  0x8d   : > { %v409_v25 = vadd.f32 %v3282_v8, %v370_v17  ;;  %v410_v26 = vadd.f32 %v3282_v8, %v371_v18  ;;  %v407_v27 = vadd.f32 %v3282_v8, %v368_v19  ;;  %v408_v28 = vadd.f32 %v3282_v8, %v369_v20  ;;  %p2908_p1 = scmp.ne.s32.totalorder %s4142_s11, %s2907_s12  ;;  %s3024_s23 = smov [#allocation11]  }
  0x8e   : > { %v437_v30 = vmax.f32 %v405_v21, 0.0  ;;  %v438_v31 = vmax.f32 %v406_v22, 0.0  ;;  %v411_v32 = vadd.f32 %v3282_v8, %v372_v23  ;;  %v412_v33 = vadd.f32 %v3282_v8, %v373_v24  ;;  %v2471_v23 = vld [vmem:[%s3260_s15 + $0x40] sm:$0xff]   ;;  %s2911_s7 = sshll.u32 %s3024_s23, 4  ;;  %s2912_s7 = int_to_ptr.vmem [resolvable:$false] %s2911_s7 }
  0x8f   : > { %v441_v34 = vmax.f32 %v409_v25, 0.0  ;;  %v442_v35 = vmax.f32 %v410_v26, 0.0  ;;  %v439_v36 = vmax.f32 %v407_v27, 0.0  ;;  %v440_v37 = vmax.f32 %v408_v28, 0.0  ;;  %v983_v57 = vld [vmem:[#allocation2] sm:$0xff]  ;;  %p2909_p4 = pnand %p2908_p1, %p3203_p6  ;;  %s2913_s8 = scalar_lea.vmem %s2912_s7, 4096 }
  0x90   : > { %v3301_v38 = vpack.c.bf16 %v438_v31, %v437_v30  ;;  %v2418_v39 = vunpack.c.l.bf16 %v2467_v29  ;;  %v443_v43 = vmax.f32 %v411_v32, 0.0  ;;  %v2419_v44 = vunpack.c.h.bf16 %v2467_v29  ;;  %2566 = vmatprep.mubr.msk.bf16.mxu0 %vm485_vm0, %v983_v57  ;;  %p2914_p3 = scmp.lt.s32.totalorder %s4142_s11, %s2912_s7  ;;  %p2915_p7 = scmp.lt.s32.totalorder %s2913_s8, %s2907_s12 }
  0x91   : > { %v3304_v41 = vpack.c.bf16 %v442_v35, %v441_v34  ;;  %v3306_v42 = vpack.c.bf16 %v440_v37, %v439_v36  ;;  %v444_v47 = vmax.f32 %v412_v33, 0.0  ;;  %v2422_v51 = vunpack.c.l.bf16 %v2468_v40  ;;  %p2910_p8 = pneg %p2909_p4 }
  0x92   : > { %787 = vrot.lane.b32.xlu0 %v3301_v38, %s3022_s24  ;;  %v593_v45 = vshrl.u32 %v3301_v38, 16  ;;  %v596_v46 = vshll.u32 %v3301_v38, 16  ;;  %v374_v48 = vmul.f32 %v2418_v39, %v3277_v2  ;;  %v375_v54 = vmul.f32 %v2419_v44, %v3277_v2  ;;  %p2916_p10 = por %p2915_p7, %p2914_p3 }
  0x93   : > { %791 = vrot.lane.b32.xlu1 %v3304_v41, %s3022_s24  ;;  %v603_v49 = vshll.u32 %v3306_v42, 16  ;;  %v610_v50 = vshll.u32 %v3304_v41, 16  ;;  %v600_v53 = vshrl.u32 %v3306_v42, 16  ;;  %v3328_v59 = vpack.c.bf16 %v444_v47, %v443_v43 }
  0x94   : > { %v852_v52 = vrot.slane %v596_v46, 1  ;;  %v413_v55 = vadd.f32 %v3282_v8, %v374_v48  ;;  %v414_v60 = vadd.f32 %v3282_v8, %v375_v54  ;;  %v607_v0 = vshrl.u32 %v3304_v41, 16  ;;  %v2472_v48 = vld [vmem:[%s3260_s15 + $0x48] sm:$0xff]   ;;  %p2917_p13 = pnand %p2916_p10, %p2910_p8 }
  0x95   : > { %v854_v56 = vrot.slane %v603_v49, 1  ;;  %v856_v1 = vrot.slane %v610_v50, 1  ;;  %v2423_v5 = vunpack.c.h.bf16 %v2468_v40  ;;  %v376_v6 = vmul.f32 %v2422_v51, %v3277_v2 }
  0x96   : > { %789 = vrot.lane.b32.xlu0 %v3306_v42, %s3022_s24  ;;  %v853_v58 = vor.u32 %v852_v52, %v593_v45  ;;  %v445_v61 = vmax.f32 %v413_v55, 0.0  ;;  %v446_v4 = vmax.f32 %v414_v60, 0.0  ;;  %v614_v7 = vshrl.u32 %v3328_v59, 16 }
  0x97   : > { %v855_v3 = vor.u32 %v854_v56, %v600_v53  ;;  %v617_v9 = vshll.u32 %v3328_v59, 16  ;;  %v2426_v10 = vunpack.c.l.bf16 %v2469_v62  ;;  %v2427_v11 = vunpack.c.h.bf16 %v2469_v62 }
  0x98   : > { %884 = vrot.lane.b32.xlu1 %v853_v58, %s3023_s26  ;;  %v3345_v12 = vpack.c.bf16 %v446_v4, %v445_v61  ;;  %v377_v13 = vmul.f32 %v2423_v5, %v3277_v2  ;;  %v415_v14 = vadd.f32 %v3282_v8, %v376_v6  ;;  %v2430_v15 = vunpack.c.l.bf16 %v2470_v63  ;;  %v2473_v4 = vld [vmem:[%s3260_s15 + $0x50] sm:$0xff]  }
  0x99   : > { %v858_v16 = vrot.slane %v617_v9, 1  ;;  %v378_v17 = vmul.f32 %v2426_v10, %v3277_v2  ;;  %v379_v18 = vmul.f32 %v2427_v11, %v3277_v2  ;;  %v2431_v19 = vunpack.c.h.bf16 %v2470_v63 }
  0x9a   : > { %793 = vrot.lane.b32.xlu0 %v3328_v59, %s3022_s24  ;;  %v857_v20 = vor.u32 %v856_v1, %v607_v0  ;;  %v416_v21 = vadd.f32 %v3282_v8, %v377_v13  ;;  %v447_v22 = vmax.f32 %v415_v14, 0.0  ;;  %v624_v26 = vshll.u32 %v3345_v12, 16  ;;  %v2474_v13 = vld [vmem:[%s3260_s15 + $0x58] sm:$0xff]  }
  0x9b   : > { %v417_v24 = vadd.f32 %v3282_v8, %v378_v17  ;;  %v418_v25 = vadd.f32 %v3282_v8, %v379_v18  ;;  %v621_v28 = vshrl.u32 %v3345_v12, 16  ;;  %v380_v29 = vmul.f32 %v2430_v15, %v3277_v2 }
  0x9c   : > { %886 = vrot.lane.b32.xlu1 %v855_v3, %s3023_s26  ;;  %v448_v27 = vmax.f32 %v416_v21, 0.0  ;;  %v381_v30 = vmul.f32 %v2431_v19, %v3277_v2  ;;  %v859_v31 = vor.u32 %v858_v16, %v614_v7  ;;  %v2434_v34 = vunpack.c.l.bf16 %v2471_v23 }
  0x9d   : > { %v449_v32 = vmax.f32 %v417_v24, 0.0  ;;  %v450_v33 = vmax.f32 %v418_v25, 0.0  ;;  %v860_v36 = vrot.slane %v624_v26, 1  ;;  %v419_v37 = vadd.f32 %v3282_v8, %v380_v29 }
  0x9e   : > { %795 = vrot.lane.b32.xlu0 %v3345_v12, %s3022_s24  ;;  %v3367_v35 = vpack.c.bf16 %v448_v27, %v447_v22  ;;  %v420_v39 = vadd.f32 %v3282_v8, %v381_v30  ;;  %v595_v40 = vrot.slane %v593_v45, 7  ;;  %v2435_v44 = vunpack.c.h.bf16 %v2471_v23  ;;  %v2475_v27 = vld [vmem:[%s3260_s15 + $0x60] sm:$0xff]  }
  0x9f   : > { %v3375_v43 = vpack.c.bf16 %v450_v33, %v449_v32  ;;  %v382_v47 = vmul.f32 %v2434_v34, %v3277_v2  ;;  %v451_v51 = vmax.f32 %v419_v37, 0.0  ;;  %v861_v58 = vor.u32 %v860_v36, %v621_v28 }
  0xa0   : > { %888 = vrot.lane.b32.xlu1 %v857_v20, %s3023_s26  ;;  %v452_v52 = vmax.f32 %v420_v39, 0.0  ;;  %v631_v54 = vshll.u32 %v3367_v35, 16  ;;  %v628_v55 = vshrl.u32 %v3367_v35, 16  ;;  %v383_v56 = vmul.f32 %v2435_v44, %v3277_v2 }
  0xa1   : > { %v421_v45 = vadd.f32 %v3282_v8, %v382_v47  ;;  %v638_v57 = vshll.u32 %v3375_v43, 16  ;;  %v2438_v61 = vunpack.c.l.bf16 %v2472_v48  ;;  %v3393_v62 = vor.u32 %v596_v46, %v595_v40 }
  0xa2   : > { %797 = vrot.lane.b32.xlu0 %v3367_v35, %s3022_s24  ;;  %v862_v60 = vrot.slane %v631_v54, 1  ;;  %v602_v63 = vrot.slane %v600_v53, 7  ;;  %v609_v1 = vrot.slane %v607_v0, 7  ;;  %v422_v3 = vadd.f32 %v3282_v8, %v383_v56 }
  0xa3   : > { %v3401_v5 = vpack.c.bf16 %v452_v52, %v451_v51  ;;  %v453_v6 = vmax.f32 %v421_v45, 0.0  ;;  %v2439_v10 = vunpack.c.h.bf16 %v2472_v48  ;;  %v384_v11 = vmul.f32 %v2438_v61, %v3277_v2  ;;  %v2476_v48 = vld [vmem:[%s3260_s15 + $0x68] sm:$0xff]  }
  0xa4   : > { %890 = vrot.lane.b32.xlu1 %v859_v31, %s3023_s26  ;;  %v863_v38 = vor.u32 %v862_v60, %v628_v55  ;;  %v454_v46 = vmax.f32 %v422_v3, 0.0  ;;  %v635_v53 = vshrl.u32 %v3375_v43, 16  ;;  %v864_v0 = vrot.slane %v638_v57, 1 }
  0xa5   : > { %v385_v14 = vmul.f32 %v2439_v10, %v3277_v2  ;;  %v423_v15 = vadd.f32 %v3282_v8, %v384_v11  ;;  %v645_v16 = vshll.u32 %v3401_v5, 16  ;;  %v2442_v17 = vunpack.c.l.bf16 %v2473_v4 }
  0xa6   : > { %799 = vrot.lane.b32.xlu0 %v3375_v43, %s3022_s24  ;;  %v3416_v18 = vor.u32 %v603_v49, %v602_v63  ;;  %v3420_v19 = vor.u32 %v610_v50, %v609_v1  ;;  %v2443_v20 = vunpack.c.h.bf16 %v2473_v4  ;;  %v2446_v21 = vunpack.c.l.bf16 %v2474_v13 }
  0xa7   : > { %v3424_v22 = vpack.c.bf16 %v454_v46, %v453_v6  ;;  %v424_v23 = vadd.f32 %v3282_v8, %v385_v14  ;;  %v455_v24 = vmax.f32 %v423_v15, 0.0  ;;  %v386_v25 = vmul.f32 %v2442_v17, %v3277_v2  ;;  %v2477_v15 = vld [vmem:[%s3260_s15 + $0x70] sm:$0xff]  }
  0xa8   : > { %892 = vrot.lane.b32.xlu1 %v861_v58, %s3023_s26  ;;  %v865_v42 = vor.u32 %v864_v0, %v635_v53  ;;  %v642_v49 = vshrl.u32 %v3401_v5, 16  ;;  %v866_v41 = vrot.slane %v645_v16, 1  ;;  %v387_v50 = vmul.f32 %v2443_v20, %v3277_v2 }
  0xa9   : > { %v456_v29 = vmax.f32 %v424_v23, 0.0  ;;  %v425_v30 = vadd.f32 %v3282_v8, %v386_v25  ;;  %v652_v31 = vshll.u32 %v3424_v22, 16  ;;  %v2447_v32 = vunpack.c.h.bf16 %v2474_v13 }
  0xaa   : > { %801 = vrot.lane.b32.xlu0 %v3401_v5, %s3022_s24  ;;  %v616_v33 = vrot.slane %v614_v7, 7  ;;  %v623_v34 = vrot.slane %v621_v28, 7  ;;  %v426_v36 = vadd.f32 %v3282_v8, %v387_v50  ;;  %v388_v37 = vmul.f32 %v2446_v21, %v3277_v2 }
  0xab   : > { %v3446_v39 = vpack.c.bf16 %v456_v29, %v455_v24  ;;  %v457_v40 = vmax.f32 %v425_v30, 0.0  ;;  %v389_v44 = vmul.f32 %v2447_v32, %v3277_v2  ;;  %v2450_v47 = vunpack.c.l.bf16 %v2475_v27 }
  0xac   : > { %894 = vrot.lane.b32.xlu1 %v863_v38, %s3023_s26  ;;  %vm491_vm2 = vsmask.f32 256  ;;  %v867_v7 = vor.u32 %v866_v41, %v642_v49  ;;  %v458_v51 = vmax.f32 %v426_v36, 0.0  ;;  %v649_v28 = vshrl.u32 %v3424_v22, 16 }
  0xad   : > { %v427_v52 = vadd.f32 %v3282_v8, %v388_v37  ;;  %v868_v56 = vrot.slane %v652_v31, 1  ;;  %v428_v45 = vadd.f32 %v3282_v8, %v389_v44  ;;  %v659_v58 = vshll.u32 %v3446_v39, 16  ;;  %vm3510_vm5 = vmand %vm490_vm1, %vm491_vm2  ;;  %v493_v37 = vld [vmem:[#allocation2 + $0x8] sm:$0x1] }
  0xae   : > { %803 = vrot.lane.b32.xlu0 %v3424_v22, %s3022_s24  ;;  %v2451_v60 = vunpack.c.h.bf16 %v2475_v27  ;;  %v3459_v61 = vor.u32 %v617_v9, %v616_v33  ;;  %v630_v63 = vrot.slane %v628_v55, 7  ;;  %v390_v1 = vmul.f32 %v2450_v47, %v3277_v2 }
  0xaf   : > { %v2454_v3 = vunpack.c.l.bf16 %v2476_v48  ;;  %vm541_vm3 = vcmask 97351   ;;  %vm542_vm4 = vsmask.f32 7966  ;;  %v3466_v4 = vpack.c.bf16 %v458_v51, %v457_v40 }
  0xb0   : > { %896 = vrot.lane.b32.xlu1 %v865_v42, %s3023_s26  ;;  %v459_v6 = vmax.f32 %v427_v52, 0.0  ;;  %v460_v10 = vmax.f32 %v428_v45, 0.0  ;;  %v391_v59 = vmul.f32 %v2451_v60, %v3277_v2  ;;  %v656_v9 = vshrl.u32 %v3446_v39, 16  ;;  %v2478_v42 = vld [vmem:[%s3260_s15 + $0x78] sm:$0xff]   ;;  %vm3538_vm8 = vmand %vm541_vm3, %vm542_vm4 }
  0xb1   : > { %v870_v55 = vrot.slane %v659_v58, 1  ;;  %v429_v11 = vadd.f32 %v3282_v8, %v390_v1  ;;  %v2455_v13 = vunpack.c.h.bf16 %v2476_v48  ;;  %v3475_v38 = vor.u32 %v624_v26, %v623_v34  ;;  %v544_v60 = vld [vmem:[#allocation2 + $0x8] sm:$0x80] }
  0xb2   : > { %805 = vrot.lane.b32.xlu0 %v3446_v39, %s3022_s24  ;;  %v869_v46 = vor.u32 %v868_v56, %v649_v28  ;;  %v430_v0 = vadd.f32 %v3282_v8, %v391_v59  ;;  %v666_v14 = vshll.u32 %v3466_v4, 16  ;;  %v3485_v17 = vor.u32 %v631_v54, %v630_v63  ;;  %v499_v63 = vld [vmem:[#allocation2 + $0x18] sm:$0x1]  ;;  %v550_v59 = vld [vmem:[#allocation2 + $0x18] sm:$0x80] }
  0xb3   : > { %v637_v12 = vrot.slane %v635_v53, 7  ;;  %v461_v20 = vmax.f32 %v429_v11, 0.0  ;;  %v392_v26 = vmul.f32 %v2454_v3, %v3277_v2  ;;  %v644_v21 = vrot.slane %v642_v49, 7 }
  0xb4   : > { %898 = vrot.lane.b32.xlu1 %v867_v7, %s3023_s26  ;;  %v3492_v23 = vpack.c.bf16 %v460_v10, %v459_v6  ;;  %v462_v24 = vmax.f32 %v430_v0, 0.0  ;;  %v393_v25 = vmul.f32 %v2455_v13, %v3277_v2  ;;  %v871_v35 = vor.u32 %v870_v55, %v656_v9  ;;  %v496_v55 = vld [vmem:[#allocation2 + $0x10] sm:$0x1] }
  0xb5   : > { %v663_v54 = vshrl.u32 %v3466_v4, 16  ;;  %v431_v53 = vadd.f32 %v3282_v8, %v392_v26  ;;  %v2458_v41 = vunpack.c.l.bf16 %v2477_v15  ;;  %v872_v50 = vrot.slane %v666_v14, 1  ;;  %v502_v26 = vld [vmem:[#allocation2 + $0x20] sm:$0x1] }
  0xb6   : > { %807 = vrot.lane.b32.xlu0 %v3466_v4, %s3022_s24  ;;  %v3501_v49 = vpack.c.bf16 %v462_v24, %v461_v20  ;;  %v432_v27 = vadd.f32 %v3282_v8, %v393_v25  ;;  %v673_v29 = vshll.u32 %v3492_v23, 16  ;;  %v2459_v32 = vunpack.c.h.bf16 %v2477_v15  ;;  %v547_v15 = vld [vmem:[#allocation2 + $0x10] sm:$0x80] }
  0xb7   : > { %v463_v30 = vmax.f32 %v431_v53, 0.0  ;;  %v394_v33 = vmul.f32 %v2458_v41, %v3277_v2  ;;  %v2462_v34 = vunpack.c.l.bf16 %v2478_v42  ;;  %v3516_v40 = vor.u32 %v638_v57, %v637_v12  ;;  %v3560_v24 = vld [vmem:[#allocation9] sm:$0x3f]   ;;  %v505_v53 = vld [vmem:[#allocation2 + $0x28] sm:$0x1] }
  0xb8   : > { %900 = vrot.lane.b32.xlu1 %v869_v46, %s3023_s26  ;;  %v3520_v44 = vor.u32 %v645_v16, %v644_v21  ;;  %v464_v47 = vmax.f32 %v432_v27, 0.0  ;;  %v670_v48 = vshrl.u32 %v3492_v23, 16  ;;  %vm720_vm6 = vcmask 31744   ;;  %v553_v21 = vld [vmem:[#allocation2 + $0x20] sm:$0x80] }
  0xb9   : > { %vm721_vm7 = vsmask.f32 7938  ;;  %v395_v7 = vmul.f32 %v2459_v32, %v3277_v2  ;;  %v433_v51 = vadd.f32 %v3282_v8, %v394_v33  ;;  %v680_v43 = vshll.u32 %v3501_v49, 16  ;;  %v2791_v32 = vld [vmem:[#allocation9 + $0x8] sm:$0x3f]  }
  0xba   : > { %809 = vrot.lane.b32.xlu0 %v3492_v23, %s3022_s24  ;;  %v2463_v57 = vunpack.c.h.bf16 %v2478_v42  ;;  %v873_v5 = vor.u32 %v872_v50, %v663_v54  ;;  %v874_v16 = vrot.slane %v673_v29, 1  ;;  %v396_v52 = vmul.f32 %v2462_v34, %v3277_v2  ;;  %vm3607_vm10 = vmand %vm720_vm6, %vm721_vm7 }
  0xbb   : > { %v494_v56 = vsel %vm3510_vm5, 0, %v493_v37  ;;  %v3542_v1 = vpack.c.bf16 %v464_v47, %v463_v30  ;;  %v434_v3 = vadd.f32 %v3282_v8, %v395_v7  ;;  %v465_v6 = vmax.f32 %v433_v51, 0.0  ;;  %v556_v30 = vld [vmem:[#allocation2 + $0x28] sm:$0x80]  ;;  %v508_v7 = vld [vmem:[#allocation2 + $0x30] sm:$0x1] }
  0xbc   : > { %902 = vrot.lane.b32.xlu1 %v871_v35, %s3023_s26  ;;  %v397_v10 = vmul.f32 %v2463_v57, %v3277_v2  ;;  %495 = vst [vmem:[#allocation2 + $0x8] sm:$0x1] %v494_v56  ;;  %v3548_v11 = vrot.slane %v649_v28, 7  ;;  %v677_v13 = vshrl.u32 %v3501_v49, 16  ;;  %v876_v46 = vrot.slane %v680_v43, 1 }
  0xbd   : > { %v435_v0 = vadd.f32 %v3282_v8, %v396_v52  ;;  %v466_v12 = vmax.f32 %v434_v3, 0.0  ;;  %v687_v20 = vshll.u32 %v3542_v1, 16  ;;  %v545_v28 = vsel %vm3538_vm8, 0, %v544_v60  ;;  %v511_v52 = vld [vmem:[#allocation2 + $0x38] sm:$0x1] }
  0xbe   : > { %811 = vrot.lane.b32.xlu0 %v3501_v49, %s3022_s24  ;;  %v436_v2 = vadd.f32 %v3282_v8, %v397_v10  ;;  %v3564_v25 = vrot.slane %v656_v9, 7  ;;  %v875_v42 = vor.u32 %v874_v16, %v670_v48  ;;  %546 = vst [vmem:[#allocation2 + $0x8] sm:$0x80] %v545_v28  ;;  %v500_v8 = vsel %vm3510_vm5, 0, %v499_v63  ;;  %v2792_v16 = vld [vmem:[#allocation9 + $0x10] sm:$0x3f]  }
  0xbf   : > { %v467_v35 = vmax.f32 %v435_v0, 0.0  ;;  %v3569_v41 = vpack.c.bf16 %v466_v12, %v465_v6  ;;  %501 = vst [vmem:[#allocation2 + $0x18] sm:$0x1] %v500_v8  ;;  %v551_v27 = vsel %vm3538_vm8, 0, %v550_v59  ;;  %v497_v9 = vsel %vm3510_vm5, 0, %v496_v55 }
  0xc0   : > { %904 = vrot.lane.b32.xlu1 %v873_v5, %s3023_s26  ;;  %v468_v50 = vmax.f32 %v436_v2, 0.0  ;;  %v3577_v33 = vrot.slane %v663_v54, 7  ;;  %v3581_v34 = vrot.slane %v670_v48, 7  ;;  %v684_v37 = vshrl.u32 %v3542_v1, 16  ;;  %552 = vst [vmem:[#allocation2 + $0x18] sm:$0x80] %v551_v27 }
  0xc1   : > { %498 = vst [vmem:[#allocation2 + $0x10] sm:$0x1] %v497_v9  ;;  %v548_v47 = vsel %vm3538_vm8, 0, %v547_v15  ;;  %v877_v51 = vor.u32 %v876_v46, %v677_v13  ;;  %v878_v54 = vrot.slane %v687_v20, 1  ;;  %v694_v5 = vshll.u32 %v3569_v41, 16 }
  0xc2   : > { %813 = vrot.lane.b32.xlu0 %v3542_v1, %s3022_s24  ;;  %v3588_v57 = vpack.c.bf16 %v468_v50, %v467_v35  ;;  %549 = vst [vmem:[#allocation2 + $0x10] sm:$0x80] %v548_v47  ;;  %v559_v48 = vld [vmem:[#allocation2 + $0x30] sm:$0x80]  ;;  %v503_v56 = vsel %vm3510_vm5, 0, %v502_v26  ;;  %v554_v60 = vsel %vm3538_vm8, 0, %v553_v21  ;;  %v661_v36 = vor.u32 %v659_v58, %v3564_v25 }
  0xc3   : > { %vm1073_vm9 = vcmask 1045504   ;;  %v506_v63 = vsel %vm3510_vm5, 0, %v505_v53  ;;  %v562_v3 = vld [vmem:[#allocation2 + $0x38] sm:$0x80]  ;;  %v514_v6 = vld [vmem:[#allocation2 + $0x40] sm:$0x1]  ;;  %v879_v9 = vor.u32 %v878_v54, %v684_v37 }
  0xc4   : > { %906 = vrot.lane.b32.xlu1 %v875_v42, %s3023_s26  ;;  %v691_v10 = vshrl.u32 %v3569_v41, 16  ;;  %v880_v59 = vrot.slane %v694_v5, 1  ;;  %v698_v55 = vshrl.u32 %v3588_v57, 16  ;;  %v4386_v46 = vshll.u32 %v3588_v57, 16  ;;  %504 = vst [vmem:[#allocation2 + $0x20] sm:$0x1] %v503_v56  ;;  %2699 = vmatprep.subr.msk.bf16.mxu0 %vm1073_vm9, %v3560_v24 }
  0xc5   : > { %555 = vst [vmem:[#allocation2 + $0x20] sm:$0x80] %v554_v60  ;;  %507 = vst [vmem:[#allocation2 + $0x28] sm:$0x1] %v506_v63  ;;  %2698 = vmatprep.subr.msk.bf16.mxu1 %vm1073_vm9, %v2791_v32  ;;  %v565_v15 = vld [vmem:[#allocation2 + $0x40] sm:$0x80] }
  0xc6   : > { %v517_v12 = vld [vmem:[#allocation2 + $0x48] sm:$0x1]  ;;  %v568_v2 = vld [vmem:[#allocation2 + $0x48] sm:$0x80]  ;;  %815 = vrot.lane.b32.xlu0 %v3569_v41, %s3022_s24  ;;  %v3618_v28 = vsel %vm1073_vm9, %v3560_v24, 0  ;;  %v557_v26 = vsel %vm3538_vm8, 0, %v556_v30 }
  0xc7   : > { %v1075_v21 = vsel %vm1073_vm9, %v2791_v32, 0  ;;  %v509_v42 = vsel %vm3510_vm5, 0, %v508_v7  ;;  %v520_v35 = vld [vmem:[#allocation2 + $0x50] sm:$0x1]  ;;  %v571_v8 = vld [vmem:[#allocation2 + $0x50] sm:$0x80]  ;;  %2565 = vmatpush3.bf16.msra.mxu0 %v3618_v28 }
  0xc8   : > { %v523_v53 = vld [vmem:[#allocation2 + $0x58] sm:$0x1]  ;;  %v3627_v50 = vrot.slane %v677_v13, 7  ;;  %v3629_v27 = vrot.slane %v684_v37, 7  ;;  %v882_v47 = vrot.slane %v4386_v46, 1  ;;  %v723_v56 = vld [vmem:[#allocation2 + $0x8] sm:$0xff]  ;;  %2531 = vmatpush3.bf16.msra.mxu1 %v1075_v21  ;;  %908 = vrot.lane.b32.xlu1 %v877_v51, %s3023_s26  ;;  %v881_v51 = vor.u32 %v880_v59, %v691_v10 }
  0xc9   : > { %558 = vst [vmem:[#allocation2 + $0x28] sm:$0x80] %v557_v26  ;;  %510 = vst [vmem:[#allocation2 + $0x30] sm:$0x1] %v509_v42  ;;  %v574_v30 = vld [vmem:[#allocation2 + $0x58] sm:$0x80]  ;;  %v724_v13 = vsel %vm3607_vm10, %v3393_v62, %v723_v56  ;;  %2700 = vmatprep.subr.msk.bf16.mxu1 %vm1073_vm9, %v3560_v24  ;;  %2701 = vmatprep.subr.msk.bf16.mxu0 %vm1073_vm9, %v2792_v16 }
  0xca   : > { %v526_v32 = vld [vmem:[#allocation2 + $0x60] sm:$0x1]  ;;  %v577_v7 = vld [vmem:[#allocation2 + $0x60] sm:$0x80]  ;;  %v529_v60 = vld [vmem:[#allocation2 + $0x68] sm:$0x1]  ;;  %v3651_v62 = vor.u32 %v882_v47, %v698_v55  ;;  %817 = vrot.lane.b32.xlu0 %v3588_v57, %s3022_s24  ;;  %v682_v39 = vor.u32 %v680_v43, %v3627_v50  ;;  %v689_v58 = vor.u32 %v687_v20, %v3629_v27 }
  0xcb   : > { %v560_v37 = vsel %vm3538_vm8, 0, %v559_v48  ;;  %v3643_v54 = vsel %vm1073_vm9, %v2792_v16, 0  ;;  %v512_v63 = vsel %vm3510_vm5, 0, %v511_v52  ;;  %v580_v26 = vld [vmem:[#allocation2 + $0x68] sm:$0x80]  ;;  %725 = vst [vmem:[#allocation2 + $0x8] sm:$0xff] %v724_v13 }
  0xcc   : > { %v532_v21 = vld [vmem:[#allocation2 + $0x70] sm:$0x1]  ;;  %v583_v42 = vld [vmem:[#allocation2 + $0x70] sm:$0x80]  ;;  %v729_v48 = vld [vmem:[#allocation2 + $0x18] sm:$0xff]  ;;  %v563_v24 = vsel %vm3538_vm8, 0, %v562_v3  ;;  %910 = vrot.lane.b32.xlu1 %v879_v9, %s3023_s26 }
  0xcd   : > { %561 = vst [vmem:[#allocation2 + $0x30] sm:$0x80] %v560_v37  ;;  %513 = vst [vmem:[#allocation2 + $0x38] sm:$0x1] %v512_v63  ;;  %v515_v52 = vsel %vm3510_vm5, 0, %v514_v6  ;;  %v730_v59 = vsel %vm3607_vm10, %v3420_v19, %v729_v48  ;;  %v726_v47 = vld [vmem:[#allocation2 + $0x10] sm:$0xff] }
  0xce   : > { %v535_v56 = vld [vmem:[#allocation2 + $0x78] sm:$0x1]  ;;  %v586_v46 = vld [vmem:[#allocation2 + $0x78] sm:$0x80]  ;;  %564 = vst [vmem:[#allocation2 + $0x38] sm:$0x80] %v563_v24  ;;  %v727_v37 = vsel %vm3607_vm10, %v3416_v18, %v726_v47  ;;  %912 = vrot.lane.b32.xlu0 %v881_v51, %s3023_s26 }
  0xcf   : > { %516 = vst [vmem:[#allocation2 + $0x40] sm:$0x1] %v515_v52  ;;  %v566_v16 = vsel %vm3538_vm8, 0, %v565_v15  ;;  %v518_v3 = vsel %vm3510_vm5, 0, %v517_v12  ;;  %v569_v6 = vsel %vm3538_vm8, 0, %v568_v2  ;;  %731 = vst [vmem:[#allocation2 + $0x18] sm:$0xff] %v730_v59 }
  0xd0   : > { %v538_v13 = vld [vmem:[#allocation2 + $0x80] sm:$0x1]  ;;  %567 = vst [vmem:[#allocation2 + $0x40] sm:$0x80] %v566_v16  ;;  %519 = vst [vmem:[#allocation2 + $0x48] sm:$0x1] %v518_v3  ;;  %914 = vrot.lane.b32.xlu1 %v3651_v62, %s3023_s26 }
  0xd1   : > { %570 = vst [vmem:[#allocation2 + $0x48] sm:$0x80] %v569_v6  ;;  %v521_v19 = vsel %vm3510_vm5, 0, %v520_v35  ;;  %v572_v15 = vsel %vm3538_vm8, 0, %v571_v8  ;;  %v524_v12 = vsel %vm3510_vm5, 0, %v523_v53  ;;  %728 = vst [vmem:[#allocation2 + $0x10] sm:$0xff] %v727_v37 }
  0xd2   : > { %v589_v63 = vld [vmem:[#allocation2 + $0x80] sm:$0x80]  ;;  %522 = vst [vmem:[#allocation2 + $0x50] sm:$0x1] %v521_v19  ;;  %573 = vst [vmem:[#allocation2 + $0x50] sm:$0x80] %v572_v15 }
  0xd3   : > { %v732_v2 = vld [vmem:[#allocation2 + $0x20] sm:$0xff]  ;;  %525 = vst [vmem:[#allocation2 + $0x58] sm:$0x1] %v524_v12  ;;  %v575_v18 = vsel %vm3538_vm8, 0, %v574_v30  ;;  %v527_v35 = vsel %vm3510_vm5, 0, %v526_v32  ;;  %v578_v8 = vsel %vm3538_vm8, 0, %v577_v7 }
  0xd4   : > { %v530_v53 = vsel %vm3510_vm5, 0, %v529_v60  ;;  %v733_v9 = vsel %vm3607_vm10, %v3459_v61, %v732_v2  ;;  %576 = vst [vmem:[#allocation2 + $0x58] sm:$0x80] %v575_v18  ;;  %528 = vst [vmem:[#allocation2 + $0x60] sm:$0x1] %v527_v35  ;;  %v581_v30 = vsel %vm3538_vm8, 0, %v580_v26 }
  0xd5   : > { %579 = vst [vmem:[#allocation2 + $0x60] sm:$0x80] %v578_v8  ;;  %531 = vst [vmem:[#allocation2 + $0x68] sm:$0x1] %v530_v53  ;;  %v533_v32 = vsel %vm3510_vm5, 0, %v532_v21  ;;  %v584_v7 = vsel %vm3538_vm8, 0, %v583_v42  ;;  %v654_v42 = vor.u32 %v652_v31, %v3548_v11  ;;  %v668_v31 = vor.u32 %v666_v14, %v3577_v33 }
  0xd6   : > { %734 = vst [vmem:[#allocation2 + $0x20] sm:$0xff] %v733_v9  ;;  %v735_v60 = vld [vmem:[#allocation2 + $0x28] sm:$0xff]  ;;  %582 = vst [vmem:[#allocation2 + $0x68] sm:$0x80] %v581_v30  ;;  %v536_v61 = vsel %vm3510_vm5, 0, %v535_v56  ;;  %v587_v48 = vsel %vm3538_vm8, 0, %v586_v46 }
  0xd7   : > { %534 = vst [vmem:[#allocation2 + $0x70] sm:$0x1] %v533_v32  ;;  %585 = vst [vmem:[#allocation2 + $0x70] sm:$0x80] %v584_v7  ;;  %v539_v26 = vsel %vm3510_vm5, 0, %v538_v13  ;;  %v590_v21 = vsel %vm3538_vm8, 0, %v589_v63  ;;  %v736_v46 = vsel %vm3607_vm10, %v3475_v38, %v735_v60  ;;  %v675_v38 = vor.u32 %v673_v29, %v3581_v34 }
  0xd8   : > { %v693_v51 = vrot.slane %v691_v10, 7  ;;  %v700_v24 = vrot.slane %v698_v55, 7  ;;  %537 = vst [vmem:[#allocation2 + $0x78] sm:$0x1] %v536_v61  ;;  %588 = vst [vmem:[#allocation2 + $0x78] sm:$0x80] %v587_v48 }
  0xd9   : > { %540 = vst [vmem:[#allocation2 + $0x80] sm:$0x1] %v539_v26  ;;  %591 = vst [vmem:[#allocation2 + $0x80] sm:$0x80] %v590_v21  ;;  %v738_v22 = vld [vmem:[#allocation2 + $0x30] sm:$0xff]  ;;  %v741_v11 = vld [vmem:[#allocation2 + $0x38] sm:$0xff] }
  0xda   : > { %737 = vst [vmem:[#allocation2 + $0x28] sm:$0xff] %v736_v46  ;;  %v739_v45 = vsel %vm3607_vm10, %v3485_v17, %v738_v22  ;;  %v742_v4 = vsel %vm3607_vm10, %v3516_v40, %v741_v11  ;;  %v744_v14 = vld [vmem:[#allocation2 + $0x40] sm:$0xff]  ;;  %v747_v23 = vld [vmem:[#allocation2 + $0x48] sm:$0xff]  ;;  %v696_v29 = vor.u32 %v694_v5, %v693_v51  ;;  %v4407_v17 = vshll.u32 %v3588_v57, 16  ;;  %v750_v1 = vld [vmem:[#allocation2 + $0x50] sm:$0xff] }
  0xdb   : > { %740 = vst [vmem:[#allocation2 + $0x30] sm:$0xff] %v739_v45  ;;  %743 = vst [vmem:[#allocation2 + $0x38] sm:$0xff] %v742_v4  ;;  %v745_v49 = vsel %vm3607_vm10, %v3520_v44, %v744_v14  ;;  %v748_v43 = vsel %vm3607_vm10, %v654_v42, %v747_v23  ;;  %v751_v40 = vsel %vm3607_vm10, %v661_v36, %v750_v1  ;;  %v753_v20 = vld [vmem:[#allocation2 + $0x58] sm:$0xff]  ;;  %vm835_vm11 = vcmask 64544  }
  0xdc   : > { %v703_v25 = vor.u32 %v4407_v17, %v700_v24  ;;  %746 = vst [vmem:[#allocation2 + $0x40] sm:$0xff] %v745_v49  ;;  %749 = vst [vmem:[#allocation2 + $0x48] sm:$0xff] %v748_v43  ;;  %v756_v41 = vld [vmem:[#allocation2 + $0x60] sm:$0xff]  ;;  %v754_v33 = vsel %vm3607_vm10, %v668_v31, %v753_v20  ;;  %vm932_vm12 = vcmask 97344   ;;  %vm933_vm13 = vsmask.f32 7424 }
  0xdd   : > { %752 = vst [vmem:[#allocation2 + $0x50] sm:$0xff] %v751_v40  ;;  %v757_v34 = vsel %vm3607_vm10, %v675_v38, %v756_v41  ;;  %v759_v57 = vld [vmem:[#allocation2 + $0x68] sm:$0xff]  ;;  %755 = vst [vmem:[#allocation2 + $0x58] sm:$0xff] %v754_v33  ;;  %vm1852_vm15 = vcmask 27648  }
  0xde   : > { %v762_v44 = vld [vmem:[#allocation2 + $0x70] sm:$0xff]  ;;  %758 = vst [vmem:[#allocation2 + $0x60] sm:$0xff] %v757_v34  ;;  %v760_v5 = vsel %vm3607_vm10, %v682_v39, %v759_v57  ;;  %vm3764_vm14 = vmand %vm932_vm12, %vm933_vm13 }
  0xdf   : > { %v763_v10 = vsel %vm3607_vm10, %v689_v58, %v762_v44  ;;  %v765_v55 = vld [vmem:[#allocation2 + $0x78] sm:$0xff]  ;;  %761 = vst [vmem:[#allocation2 + $0x68] sm:$0xff] %v760_v5 }
  0xe0   : > { %v768_v50 = vld [vmem:[#allocation2 + $0x80] sm:$0xff]  ;;  %764 = vst [vmem:[#allocation2 + $0x70] sm:$0xff] %v763_v10  ;;  %v766_v27 = vsel %vm3607_vm10, %v696_v29, %v765_v55 }
  0xe1   : > { %v769_v62 = vsel %vm3607_vm10, %v703_v25, %v768_v50  ;;  %767 = vst [vmem:[#allocation2 + $0x78] sm:$0xff] %v766_v27 }
  0xe2   : > { %770 = vst [vmem:[#allocation2 + $0x80] sm:$0xff] %v769_v62 }
 0x104   : > { %v788_v52 = vpop.permute.xlu0 %787 }
 0x105   : > { %836 = vst.msk [vmem:[#allocation2 + $0x8] sm:$0xff] %vm835_vm11, %v788_v52  ;;  %v792_v56 = vpop.permute.xlu1 %791 }
 0x106   : > { %838 = vst.msk [vmem:[#allocation2 + $0x18] sm:$0xff] %vm835_vm11, %v792_v56  ;;  %v1471_v56 = vld [vmem:[#allocation2 + $0x88] sm:$0xff] }
 0x108   : > { %v790_v59 = vpop.permute.xlu0 %789 }
 0x109   : > { %837 = vst.msk [vmem:[#allocation2 + $0x10] sm:$0xff] %vm835_vm11, %v790_v59 }
 0x10a   : > { %v885_v0 = vpop.permute.xlu1 %884 }
 0x10c   : > { %v935_v16 = vld [vmem:[#allocation2 + $0x8] sm:$0xff]  ;;  %v794_v3 = vpop.permute.xlu0 %793 }
 0x10d   : > { %v936_v6 = vsel %vm3764_vm14, %v885_v0, %v935_v16  ;;  %839 = vst.msk [vmem:[#allocation2 + $0x20] sm:$0xff] %vm835_vm11, %v794_v3  ;;  %v941_v12 = vld [vmem:[#allocation2 + $0x18] sm:$0xff] }
 0x10e   : > { %937 = vst [vmem:[#allocation2 + $0x8] sm:$0xff] %v936_v6  ;;  %v887_v13 = vpop.permute.xlu1 %886  ;;  %2532 = vmatprep.mubr.msk.bf16.mxu1 %vm485_vm0, %v936_v6  ;;  %2567 = vmatmul.mubr.msk.bf16.vlgmr.msra.gmra.mrb[0].mxu0 %vm485_vm0, %v936_v6 }
 0x10f   : > { %2599 = vmatpush3.bf16.msra.mxu0 %v3643_v54 }
 0x110   : > { %v938_v37 = vld [vmem:[#allocation2 + $0x10] sm:$0xff]  ;;  %v796_v19 = vpop.permute.xlu0 %795 }
 0x111   : > { %v939_v15 = vsel %vm3764_vm14, %v887_v13, %v938_v37  ;;  %840 = vst.msk [vmem:[#allocation2 + $0x28] sm:$0xff] %vm835_vm11, %v796_v19 }
 0x112   : > { %940 = vst [vmem:[#allocation2 + $0x10] sm:$0xff] %v939_v15  ;;  %v889_v63 = vpop.permute.xlu1 %888  ;;  %2533 = vmatmul.mubr.msk.bf16.vlgmr.msra.gmra.mrb[0].mxu1 %vm485_vm0, %v939_v15  ;;  %2570 = vmatprep.mubr.msk.bf16.mxu0 %vm485_vm0, %v939_v15 }
 0x113   : > { %v942_v2 = vsel %vm3764_vm14, %v889_v63, %v941_v12  ;;  %2633 = vmatpush3.bf16.msra.mxu1 %v3618_v28 }
 0x114   : > { %943 = vst [vmem:[#allocation2 + $0x18] sm:$0xff] %v942_v2  ;;  %v798_v54 = vpop.permute.xlu0 %797  ;;  %v944_v18 = vld [vmem:[#allocation2 + $0x20] sm:$0xff]  ;;  %2536 = vmatprep.mubr.msk.bf16.mxu1 %vm485_vm0, %v942_v2 }
 0x115   : > { %841 = vst.msk [vmem:[#allocation2 + $0x30] sm:$0xff] %vm835_vm11, %v798_v54 }
 0x116   : > { %v891_v35 = vpop.permute.xlu1 %890  ;;  %2571 = vmatmul.mubr.msk.bf16.gmra.mrb[4].mxu0 %vm485_vm0, %v942_v2 }
 0x117   : > { %v945_v8 = vsel %vm3764_vm14, %v891_v35, %v944_v18 }
 0x118   : > { %946 = vst [vmem:[#allocation2 + $0x20] sm:$0xff] %v945_v8  ;;  %v800_v53 = vpop.permute.xlu0 %799  ;;  %v947_v9 = vld [vmem:[#allocation2 + $0x28] sm:$0xff]  ;;  %2574 = vmatprep.mubr.msk.bf16.mxu0 %vm485_vm0, %v945_v8 }
 0x119   : > { %842 = vst.msk [vmem:[#allocation2 + $0x38] sm:$0xff] %vm835_vm11, %v800_v53 }
 0x11a   : > { %v893_v28 = vpop.permute.xlu1 %892  ;;  %2537 = vmatmul.mubr.msk.bf16.gmra.mrb[4].mxu1 %vm485_vm0, %v945_v8 }
 0x11b   : > { %v948_v30 = vsel %vm3764_vm14, %v893_v28, %v947_v9 }
 0x11c   : > { %949 = vst [vmem:[#allocation2 + $0x28] sm:$0xff] %v948_v30  ;;  %v802_v32 = vpop.permute.xlu0 %801  ;;  %v950_v7 = vld [vmem:[#allocation2 + $0x30] sm:$0xff]  ;;  %2540 = vmatprep.mubr.msk.bf16.mxu1 %vm485_vm0, %v948_v30 }
 0x11d   : > { %843 = vst.msk [vmem:[#allocation2 + $0x40] sm:$0xff] %vm835_vm11, %v802_v32 }
 0x11e   : > { %v895_v60 = vpop.permute.xlu1 %894  ;;  %2575 = vmatmul.mubr.msk.bf16.gmra.mrb[8].mxu0 %vm485_vm0, %v948_v30 }
 0x11f   : > { %v951_v61 = vsel %vm3764_vm14, %v895_v60, %v950_v7 }
 0x120   : > { %952 = vst [vmem:[#allocation2 + $0x30] sm:$0xff] %v951_v61  ;;  %v804_v48 = vpop.permute.xlu0 %803  ;;  %v953_v26 = vld [vmem:[#allocation2 + $0x38] sm:$0xff]  ;;  %2578 = vmatprep.mubr.msk.bf16.mxu0 %vm485_vm0, %v951_v61 }
 0x121   : > { %844 = vst.msk [vmem:[#allocation2 + $0x48] sm:$0xff] %vm835_vm11, %v804_v48 }
 0x122   : > { %v897_v21 = vpop.permute.xlu1 %896  ;;  %2541 = vmatmul.mubr.msk.bf16.gmra.mrb[8].mxu1 %vm485_vm0, %v951_v61 }
 0x123   : > { %v954_v42 = vsel %vm3764_vm14, %v897_v21, %v953_v26 }
 0x124   : > { %955 = vst [vmem:[#allocation2 + $0x38] sm:$0xff] %v954_v42  ;;  %v806_v51 = vpop.permute.xlu0 %805  ;;  %v956_v24 = vld [vmem:[#allocation2 + $0x40] sm:$0xff]  ;;  %2544 = vmatprep.mubr.msk.bf16.mxu1 %vm485_vm0, %v954_v42 }
 0x125   : > { %845 = vst.msk [vmem:[#allocation2 + $0x50] sm:$0xff] %vm835_vm11, %v806_v51 }
 0x126   : > { %v899_v46 = vpop.permute.xlu1 %898  ;;  %2579 = vmatmul.mubr.msk.bf16.gmra.mrb[12].mxu0 %vm485_vm0, %v954_v42 }
 0x127   : > { %v3807_v36 = vsel %vm3764_vm14, %v899_v46, %v956_v24  ;;  %2600 = vmatprep.mubr.msk.bf16.mxu0 %vm485_vm0, %v939_v15 }
 0x128   : > { %958 = vst [vmem:[#allocation2 + $0x40] sm:$0xff] %v3807_v36  ;;  %v808_v22 = vpop.permute.xlu0 %807  ;;  %v959_v31 = vld [vmem:[#allocation2 + $0x48] sm:$0xff] }
 0x129   : > { %846 = vst.msk [vmem:[#allocation2 + $0x58] sm:$0xff] %vm835_vm11, %v808_v22 }
 0x12a   : > { %v901_v38 = vpop.permute.xlu1 %900  ;;  %2545 = vmatmul.mubr.msk.bf16.gmra.mrb[12].mxu1 %vm485_vm0, %v3807_v36 }
 0x12b   : > { %v960_v45 = vsel %vm3764_vm14, %v901_v38, %v959_v31 }
 0x12c   : > { %961 = vst [vmem:[#allocation2 + $0x48] sm:$0xff] %v960_v45  ;;  %v810_v11 = vpop.permute.xlu0 %809  ;;  %v962_v39 = vld [vmem:[#allocation2 + $0x50] sm:$0xff]  ;;  %2548 = vmatprep.mubr.msk.bf16.mxu1 %vm485_vm0, %v960_v45 }
 0x12d   : > { %847 = vst.msk [vmem:[#allocation2 + $0x60] sm:$0xff] %vm835_vm11, %v810_v11 }
 0x12e   : > { %v903_v58 = vpop.permute.xlu1 %902  ;;  %2601 = vmatmul.mubr.msk.bf16.vlgmr.msra.gmra.mrb[0].mxu0 %vm485_vm0, %v942_v2 }
 0x12f   : > { %v963_v4 = vsel %vm3764_vm14, %v903_v58, %v962_v39  ;;  %2604 = vmatprep.mubr.msk.bf16.mxu0 %vm485_vm0, %v945_v8 }
 0x130   : > { %964 = vst [vmem:[#allocation2 + $0x50] sm:$0xff] %v963_v4  ;;  %v812_v14 = vpop.permute.xlu0 %811  ;;  %v965_v23 = vld [vmem:[#allocation2 + $0x58] sm:$0xff] }
 0x131   : > { %848 = vst.msk [vmem:[#allocation2 + $0x68] sm:$0xff] %vm835_vm11, %v812_v14 }
 0x132   : > { %v905_v29 = vpop.permute.xlu1 %904  ;;  %2549 = vmatmul.mubr.msk.bf16.gmra.mrb[16].mxu1 %vm485_vm0, %v963_v4 }
 0x133   : > { %v966_v17 = vsel %vm3764_vm14, %v905_v29, %v965_v23 }
 0x134   : > { %967 = vst [vmem:[#allocation2 + $0x58] sm:$0xff] %v966_v17  ;;  %v814_v25 = vpop.permute.xlu0 %813  ;;  %v968_v49 = vld [vmem:[#allocation2 + $0x60] sm:$0xff]  ;;  %2552 = vmatprep.mubr.msk.bf16.mxu1 %vm485_vm0, %v966_v17 }
 0x135   : > { %849 = vst.msk [vmem:[#allocation2 + $0x70] sm:$0xff] %vm835_vm11, %v814_v25 }
 0x136   : > { %v907_v43 = vpop.permute.xlu1 %906  ;;  %2605 = vmatmul.mubr.msk.bf16.gmra.mrb[4].mxu0 %vm485_vm0, %v948_v30 }
 0x137   : > { %v969_v1 = vsel %vm3764_vm14, %v907_v43, %v968_v49  ;;  %2608 = vmatprep.mubr.msk.bf16.mxu0 %vm485_vm0, %v951_v61 }
 0x138   : > { %970 = vst [vmem:[#allocation2 + $0x60] sm:$0xff] %v969_v1  ;;  %v816_v40 = vpop.permute.xlu0 %815  ;;  %v971_v20 = vld [vmem:[#allocation2 + $0x68] sm:$0xff] }
 0x139   : > { %850 = vst.msk [vmem:[#allocation2 + $0x78] sm:$0xff] %vm835_vm11, %v816_v40 }
 0x13a   : > { %v909_v41 = vpop.permute.xlu1 %908  ;;  %2553 = vmatmul.mubr.msk.bf16.gmra.mrb[20].mxu1 %vm485_vm0, %v969_v1 }
 0x13b   : > { %v972_v33 = vsel %vm3764_vm14, %v909_v41, %v971_v20 }
 0x13c   : > { %973 = vst [vmem:[#allocation2 + $0x68] sm:$0xff] %v972_v33  ;;  %v818_v34 = vpop.permute.xlu0 %817  ;;  %v974_v57 = vld [vmem:[#allocation2 + $0x70] sm:$0xff]  ;;  %2556 = vmatprep.mubr.msk.bf16.mxu1 %vm485_vm0, %v972_v33 }
 0x13d   : > { %851 = vst.msk [vmem:[#allocation2 + $0x80] sm:$0xff] %vm835_vm11, %v818_v34 }
 0x13e   : > { %v911_v44 = vpop.permute.xlu1 %910  ;;  %2609 = vmatmul.mubr.msk.bf16.gmra.mrb[8].mxu0 %vm485_vm0, %v954_v42 }
 0x13f   : > { %v975_v5 = vsel %vm3764_vm14, %v911_v44, %v974_v57  ;;  %2612 = vmatprep.mubr.msk.bf16.mxu0 %vm485_vm0, %v3807_v36 }
 0x140   : > { %976 = vst [vmem:[#allocation2 + $0x70] sm:$0xff] %v975_v5  ;;  %v977_v10 = vld [vmem:[#allocation2 + $0x78] sm:$0xff]  ;;  %v913_v55 = vpop.permute.xlu0 %912 }
 0x141   : > { %v978_v50 = vsel %vm3764_vm14, %v913_v55, %v977_v10 }
 0x142   : > { %979 = vst [vmem:[#allocation2 + $0x78] sm:$0xff] %v978_v50  ;;  %v915_v27 = vpop.permute.xlu1 %914  ;;  %2557 = vmatmul.mubr.msk.bf16.gmra.mrb[24].mxu1 %vm485_vm0, %v975_v5 }
 0x143   : > { %2560 = vmatprep.mubr.msk.bf16.mxu1 %vm485_vm0, %v978_v50 }
 0x144   : > { %v980_v62 = vld [vmem:[#allocation2 + $0x80] sm:$0xff] }
 0x145   : > { %v981_v52 = vsel %vm3764_vm14, %v915_v27, %v980_v62 }
 0x146   : > { %982 = vst [vmem:[#allocation2 + $0x80] sm:$0xff] %v981_v52  ;;  %2613 = vmatmul.mubr.msk.bf16.gmra.mrb[12].mxu0 %vm485_vm0, %v960_v45 }
 0x147   : > { %2616 = vmatprep.mubr.msk.bf16.mxu0 %vm485_vm0, %v963_v4 }
 0x14a   : > { %2561 = vmatmul.mubr.msk.bf16.gmra.mrb[28].mxu1 %vm485_vm0, %v981_v52 }
 0x14b   : > { %2582 = vmatprep.mubr.msk.bf16.mxu1 %vm485_vm0, %v3807_v36 }
 0x14e   : > { %2617 = vmatmul.mubr.msk.bf16.gmra.mrb[16].mxu0 %vm485_vm0, %v966_v17 }
 0x14f   : > { %2620 = vmatprep.mubr.msk.bf16.mxu0 %vm485_vm0, %v969_v1 }
 0x152   : > { %2583 = vmatmul.mubr.msk.bf16.vlgmr.msra.gmra.mrb[16].mxu1 %vm485_vm0, %v960_v45 }
 0x153   : > { %2586 = vmatprep.mubr.msk.bf16.mxu1 %vm485_vm0, %v963_v4 }
 0x156   : > { %2621 = vmatmul.mubr.msk.bf16.gmra.mrb[20].mxu0 %vm485_vm0, %v972_v33 }
 0x157   : > { %2624 = vmatprep.mubr.msk.bf16.mxu0 %vm485_vm0, %v975_v5 }
 0x15a   : > { %2587 = vmatmul.mubr.msk.bf16.gmra.mrb[20].mxu1 %vm485_vm0, %v966_v17 }
 0x15b   : > { %2590 = vmatprep.mubr.msk.bf16.mxu1 %vm485_vm0, %v969_v1 }
 0x15e   : > { %2625 = vmatmul.mubr.msk.bf16.gmra.mrb[24].mxu0 %vm485_vm0, %v978_v50 }
 0x15f   : > { %2628 = vmatprep.mubr.msk.bf16.mxu0 %vm485_vm0, %v981_v52 }
 0x162   : > { %2591 = vmatmul.mubr.msk.bf16.gmra.mrb[24].mxu1 %vm485_vm0, %v972_v33 }
 0x163   : > { %2594 = vmatprep.mubr.msk.bf16.mxu1 %vm485_vm0, %v975_v5 }
 0x166   : > { %2629 = vmatmul.mubr.msk.bf16.gmra.mrb[28].mxu0 %vm485_vm0, %v1471_v56 }
 0x16a   : > { %2595 = vmatmul.mubr.msk.bf16.gmra.mrb[28].mxu1 %vm485_vm0, %v978_v50 }
 0x1e5   : > { %v2534_v59 = vpop.f32.mrb[0].mxu1 }
 0x1e6   : > { %v1111_v47 = vpop.f32.mrb[1].mxu1 }
 0x1e7   : > { %v2535_v0 = vpop.f32.mrb[2].mxu1 }
 0x1e8   : > { %v1114_v16 = vpop.f32.mrb[3].mxu1 }
 0x1ed   : > { %v2538_v3 = vpop.f32.mrb[4].mxu1 }
 0x1ee   : > { %v1127_v6 = vpop.f32.mrb[5].mxu1 }
 0x1ef   : > { %v2539_v13 = vpop.f32.mrb[6].mxu1 }
 0x1f0   : > { %v1130_v37 = vpop.f32.mrb[7].mxu1 }
 0x1f5   : > { %v2542_v19 = vpop.f32.mrb[8].mxu1 }
 0x1f6   : > { %v1143_v15 = vpop.f32.mrb[9].mxu1 }
 0x1f7   : > { %v2543_v12 = vpop.f32.mrb[10].mxu1 }
 0x1f8   : > { %v3868_v63 = vpop.f32.mrb[11].mxu1 }
 0x1fd   : > { %v3870_v2 = vpop.f32.mrb[12].mxu1 }
 0x1fe   : > { %v3872_v54 = vpop.f32.mrb[13].mxu1 }
 0x1ff   : > { %v3874_v18 = vpop.f32.mrb[14].mxu1 }
 0x200   : > { %v3876_v35 = vpop.f32.mrb[15].mxu1 }
 0x201   : > { %v2602_v8 = vpop.f32.mrb[0].mxu0 }
 0x202   : > { %v3878_v53 = vadd.f32 %v2602_v8, %v2534_v59  ;;  %v1565_v9 = vpop.f32.mrb[1].mxu0 }
 0x203   : > { %v3880_v28 = vadd.f32 %v1565_v9, %v1111_v47  ;;  %v2603_v30 = vpop.f32.mrb[2].mxu0 }
 0x204   : > { %v2369_v32 = vpack.c.bf16 %v3878_v53, %v3878_v53  ;;  %v3884_v7 = vadd.f32 %v2603_v30, %v2535_v0  ;;  %v1568_v60 = vpop.f32.mrb[3].mxu0  ;;  %v1889_v46 = vsel %vm720_vm6, %v3878_v53, 0.0 }
 0x205   : > { %v2367_v61 = vpack.c.bf16 %v3880_v28, %v3880_v28  ;;  %v3888_v48 = vadd.f32 %v1568_v60, %v1114_v16  ;;  %v1886_v21 = vsel %vm720_vm6, %v3880_v28, 0.0 }
 0x206   : > { %1855 = vst.msk [vmem:[%s3892_s13 + $0x8] sm:$0xf] %vm1852_vm15, %v2369_v32  ;;  %v2370_v26 = vpack.c.bf16 %v3884_v7, %v3884_v7  ;;  %v1891_v45 = vsel %vm720_vm6, %v3884_v7, 0.0 }
 0x207   : > { %1853 = vst.msk [vmem:[%s3892_s13] sm:$0xf] %vm1852_vm15, %v2367_v61  ;;  %v2368_v42 = vpack.c.bf16 %v3888_v48, %v3888_v48  ;;  %v1887_v51 = vsel %vm720_vm6, %v3888_v48, 0.0 }
 0x208   : > { %1856 = vst.msk [vmem:[%s3892_s13 + $0xc] sm:$0xf] %vm1852_vm15, %v2370_v26  ;;  %v1888_v24 = vadd.f32 %v1887_v51, %v1886_v21 }
 0x209   : > { %1854 = vst.msk [vmem:[%s3892_s13 + $0x4] sm:$0xf] %vm1852_vm15, %v2368_v42  ;;  %v2606_v36 = vpop.f32.mrb[4].mxu0 }
 0x20a   : > { %v1890_v22 = vadd.f32 %v1889_v46, %v1888_v24  ;;  %v3912_v31 = vadd.f32 %v2606_v36, %v2538_v3  ;;  %v1581_v38 = vpop.f32.mrb[5].mxu0 }
 0x20b   : > { %v3916_v11 = vadd.f32 %v1581_v38, %v1127_v6  ;;  %v2607_v39 = vpop.f32.mrb[6].mxu0 }
 0x20c   : > { %v2373_v58 = vpack.c.bf16 %v3912_v31, %v3912_v31  ;;  %v1892_v4 = vadd.f32 %v1891_v45, %v1890_v22  ;;  %v3920_v14 = vadd.f32 %v2607_v39, %v2539_v13  ;;  %v1584_v23 = vpop.f32.mrb[7].mxu0  ;;  %v1897_v41 = vsel %vm720_vm6, %v3912_v31, 0.0 }
 0x20d   : > { %v2371_v29 = vpack.c.bf16 %v3916_v11, %v3916_v11  ;;  %v1893_v17 = vsel %vm720_vm6, %v3916_v11, 0.0  ;;  %v3926_v25 = vadd.f32 %v1584_v23, %v1130_v37 }
 0x20e   : > { %1859 = vst.msk [vmem:[%s3892_s13 + $0x18] sm:$0xf] %vm1852_vm15, %v2373_v58  ;;  %v1894_v49 = vadd.f32 %v1893_v17, %v1892_v4  ;;  %v2374_v43 = vpack.c.bf16 %v3920_v14, %v3920_v14  ;;  %v1899_v5 = vsel %vm720_vm6, %v3920_v14, 0.0 }
 0x20f   : > { %1857 = vst.msk [vmem:[%s3892_s13 + $0x10] sm:$0xf] %vm1852_vm15, %v2371_v29  ;;  %v2372_v1 = vpack.c.bf16 %v3926_v25, %v3926_v25  ;;  %v1895_v40 = vsel %vm720_vm6, %v3926_v25, 0.0 }
 0x210   : > { %1860 = vst.msk [vmem:[%s3892_s13 + $0x1c] sm:$0xf] %vm1852_vm15, %v2374_v43  ;;  %v1896_v20 = vadd.f32 %v1895_v40, %v1894_v49 }
 0x211   : > { %1858 = vst.msk [vmem:[%s3892_s13 + $0x14] sm:$0xf] %vm1852_vm15, %v2372_v1  ;;  %v2610_v33 = vpop.f32.mrb[8].mxu0 }
 0x212   : > { %v1898_v34 = vadd.f32 %v1897_v41, %v1896_v20  ;;  %v3944_v57 = vadd.f32 %v2610_v33, %v2542_v19  ;;  %v1597_v44 = vpop.f32.mrb[9].mxu0 }
 0x213   : > { %v3948_v10 = vadd.f32 %v1597_v44, %v1143_v15  ;;  %v2611_v55 = vpop.f32.mrb[10].mxu0 }
 0x214   : > { %v2377_v50 = vpack.c.bf16 %v3944_v57, %v3944_v57  ;;  %v1900_v27 = vadd.f32 %v1899_v5, %v1898_v34  ;;  %v3952_v62 = vadd.f32 %v2611_v55, %v2543_v12  ;;  %v1600_v52 = vpop.f32.mrb[11].mxu0  ;;  %v1905_v37 = vsel %vm720_vm6, %v3944_v57, 0.0 }
 0x215   : > { %v2375_v56 = vpack.c.bf16 %v3948_v10, %v3948_v10  ;;  %v1901_v59 = vsel %vm720_vm6, %v3948_v10, 0.0  ;;  %v3959_v47 = vadd.f32 %v1600_v52, %v3868_v63 }
 0x216   : > { %1863 = vst.msk [vmem:[%s3892_s13 + $0x28] sm:$0xf] %vm1852_vm15, %v2377_v50  ;;  %v1902_v0 = vadd.f32 %v1901_v59, %v1900_v27  ;;  %v2378_v16 = vpack.c.bf16 %v3952_v62, %v3952_v62  ;;  %v1907_v8 = vsel %vm720_vm6, %v3952_v62, 0.0 }
 0x217   : > { %1861 = vst.msk [vmem:[%s3892_s13 + $0x20] sm:$0xf] %vm1852_vm15, %v2375_v56  ;;  %v2376_v3 = vpack.c.bf16 %v3959_v47, %v3959_v47  ;;  %v1903_v6 = vsel %vm720_vm6, %v3959_v47, 0.0 }
 0x218   : > { %1864 = vst.msk [vmem:[%s3892_s13 + $0x2c] sm:$0xf] %vm1852_vm15, %v2378_v16  ;;  %v1904_v13 = vadd.f32 %v1903_v6, %v1902_v0 }
 0x219   : > { %1862 = vst.msk [vmem:[%s3892_s13 + $0x24] sm:$0xf] %vm1852_vm15, %v2376_v3  ;;  %v2614_v19 = vpop.f32.mrb[12].mxu0 }
 0x21a   : > { %v1906_v15 = vadd.f32 %v1905_v37, %v1904_v13  ;;  %v3978_v12 = vadd.f32 %v2614_v19, %v3870_v2  ;;  %v1613_v63 = vpop.f32.mrb[13].mxu0 }
 0x21b   : > { %v3983_v9 = vadd.f32 %v1613_v63, %v3872_v54  ;;  %v2615_v30 = vpop.f32.mrb[14].mxu0 }
 0x21c   : > { %v2381_v32 = vpack.c.bf16 %v3978_v12, %v3978_v12  ;;  %v1908_v60 = vadd.f32 %v1907_v8, %v1906_v15  ;;  %v3988_v61 = vadd.f32 %v2615_v30, %v3874_v18  ;;  %v1616_v26 = vpop.f32.mrb[15].mxu0 }
 0x21d   : > { %v2379_v2 = vpack.c.bf16 %v3983_v9, %v3983_v9  ;;  %v1909_v21 = vsel %vm720_vm6, %v3983_v9, 0.0  ;;  %v3995_v42 = vadd.f32 %v1616_v26, %v3876_v35  ;;  %v1913_v35 = vsel %vm720_vm6, %v3978_v12, 0.0 }
 0x21e   : > { %1867 = vst.msk [vmem:[%s3892_s13 + $0x38] sm:$0xf] %vm1852_vm15, %v2381_v32  ;;  %v1910_v54 = vadd.f32 %v1909_v21, %v1908_v60  ;;  %v2382_v51 = vpack.c.bf16 %v3988_v61, %v3988_v61  ;;  %v1915_v45 = vsel %vm720_vm6, %v3988_v61, 0.0 }
 0x21f   : > { %1865 = vst.msk [vmem:[%s3892_s13 + $0x30] sm:$0xf] %vm1852_vm15, %v2379_v2  ;;  %v2380_v18 = vpack.c.bf16 %v3995_v42, %v3995_v42  ;;  %v1911_v24 = vsel %vm720_vm6, %v3995_v42, 0.0 }
 0x220   : > { %1868 = vst.msk [vmem:[%s3892_s13 + $0x3c] sm:$0xf] %vm1852_vm15, %v2382_v51  ;;  %v1912_v46 = vadd.f32 %v1911_v24, %v1910_v54 }
 0x221   : > { %1866 = vst.msk [vmem:[%s3892_s13 + $0x34] sm:$0xf] %vm1852_vm15, %v2380_v18  ;;  %v2618_v36 = vpop.f32.mrb[16].mxu0 }
 0x222   : > { %v1914_v22 = vadd.f32 %v1913_v35, %v1912_v46  ;;  %v1629_v38 = vpop.f32.mrb[17].mxu0 }
 0x223   : > { %v2619_v39 = vpop.f32.mrb[18].mxu0 }
 0x224   : > { %v1632_v58 = vpop.f32.mrb[19].mxu0  ;;  %v1916_v4 = vadd.f32 %v1915_v45, %v1914_v22 }
 0x225   : > { %v2584_v23 = vpop.f32.mrb[16].mxu1 }
 0x226   : > { %v4015_v29 = vadd.f32 %v2618_v36, %v2584_v23  ;;  %v1392_v17 = vpop.f32.mrb[17].mxu1 }
 0x227   : > { %v4017_v49 = vadd.f32 %v1629_v38, %v1392_v17  ;;  %v2585_v43 = vpop.f32.mrb[18].mxu1 }
 0x228   : > { %v2385_v1 = vpack.c.bf16 %v4015_v29, %v4015_v29  ;;  %v4021_v40 = vadd.f32 %v2619_v39, %v2585_v43  ;;  %v1395_v20 = vpop.f32.mrb[19].mxu1  ;;  %v1921_v16 = vsel %vm720_vm6, %v4015_v29, 0.0 }
 0x229   : > { %v2383_v41 = vpack.c.bf16 %v4017_v49, %v4017_v49  ;;  %v1917_v33 = vsel %vm720_vm6, %v4017_v49, 0.0  ;;  %v4027_v34 = vadd.f32 %v1632_v58, %v1395_v20  ;;  %v2622_v44 = vpop.f32.mrb[20].mxu0 }
 0x22a   : > { %1871 = vst.msk [vmem:[%s3892_s13 + $0x48] sm:$0xf] %vm1852_vm15, %v2385_v1  ;;  %v1918_v5 = vadd.f32 %v1917_v33, %v1916_v4  ;;  %v2386_v55 = vpack.c.bf16 %v4021_v40, %v4021_v40  ;;  %v1645_v50 = vpop.f32.mrb[21].mxu0  ;;  %v1923_v19 = vsel %vm720_vm6, %v4021_v40, 0.0 }
 0x22b   : > { %1869 = vst.msk [vmem:[%s3892_s13 + $0x40] sm:$0xf] %vm1852_vm15, %v2383_v41  ;;  %v2384_v27 = vpack.c.bf16 %v4027_v34, %v4027_v34  ;;  %v1919_v52 = vsel %vm720_vm6, %v4027_v34, 0.0  ;;  %v2623_v56 = vpop.f32.mrb[22].mxu0 }
 0x22c   : > { %1872 = vst.msk [vmem:[%s3892_s13 + $0x4c] sm:$0xf] %vm1852_vm15, %v2386_v55  ;;  %v1920_v59 = vadd.f32 %v1919_v52, %v1918_v5  ;;  %v1648_v0 = vpop.f32.mrb[23].mxu0 }
 0x22d   : > { %1870 = vst.msk [vmem:[%s3892_s13 + $0x44] sm:$0xf] %vm1852_vm15, %v2384_v27  ;;  %v2588_v3 = vpop.f32.mrb[20].mxu1 }
 0x22e   : > { %v1922_v6 = vadd.f32 %v1921_v16, %v1920_v59  ;;  %v4045_v13 = vadd.f32 %v2622_v44, %v2588_v3  ;;  %v1408_v37 = vpop.f32.mrb[21].mxu1 }
 0x22f   : > { %v4049_v15 = vadd.f32 %v1645_v50, %v1408_v37  ;;  %v2589_v63 = vpop.f32.mrb[22].mxu1 }
 0x230   : > { %v2389_v8 = vpack.c.bf16 %v4045_v13, %v4045_v13  ;;  %v1924_v30 = vadd.f32 %v1923_v19, %v1922_v6  ;;  %v4053_v32 = vadd.f32 %v2623_v56, %v2589_v63  ;;  %v1411_v60 = vpop.f32.mrb[23].mxu1  ;;  %v1929_v45 = vsel %vm720_vm6, %v4045_v13, 0.0 }
 0x231   : > { %v2387_v26 = vpack.c.bf16 %v4049_v15, %v4049_v15  ;;  %v1925_v2 = vsel %vm720_vm6, %v4049_v15, 0.0  ;;  %v4059_v21 = vadd.f32 %v1648_v0, %v1411_v60  ;;  %v2626_v54 = vpop.f32.mrb[24].mxu0 }
 0x232   : > { %1875 = vst.msk [vmem:[%s3892_s13 + $0x58] sm:$0xf] %vm1852_vm15, %v2389_v8  ;;  %v1926_v51 = vadd.f32 %v1925_v2, %v1924_v30  ;;  %v2390_v18 = vpack.c.bf16 %v4053_v32, %v4053_v32  ;;  %v1661_v24 = vpop.f32.mrb[25].mxu0  ;;  %v1931_v17 = vsel %vm720_vm6, %v4053_v32, 0.0 }
 0x233   : > { %1873 = vst.msk [vmem:[%s3892_s13 + $0x50] sm:$0xf] %vm1852_vm15, %v2387_v26  ;;  %v2388_v46 = vpack.c.bf16 %v4059_v21, %v4059_v21  ;;  %v1927_v35 = vsel %vm720_vm6, %v4059_v21, 0.0  ;;  %v2627_v36 = vpop.f32.mrb[26].mxu0 }
 0x234   : > { %1876 = vst.msk [vmem:[%s3892_s13 + $0x5c] sm:$0xf] %vm1852_vm15, %v2390_v18  ;;  %v1928_v22 = vadd.f32 %v1927_v35, %v1926_v51  ;;  %v1664_v38 = vpop.f32.mrb[27].mxu0 }
 0x235   : > { %1874 = vst.msk [vmem:[%s3892_s13 + $0x54] sm:$0xf] %vm1852_vm15, %v2388_v46  ;;  %v2592_v39 = vpop.f32.mrb[24].mxu1 }
 0x236   : > { %v1930_v58 = vadd.f32 %v1929_v45, %v1928_v22  ;;  %v4077_v4 = vadd.f32 %v2626_v54, %v2592_v39  ;;  %v1424_v23 = vpop.f32.mrb[25].mxu1 }
 0x237   : > { %v4081_v43 = vadd.f32 %v1661_v24, %v1424_v23  ;;  %v2593_v1 = vpop.f32.mrb[26].mxu1 }
 0x238   : > { %v2393_v20 = vpack.c.bf16 %v4077_v4, %v4077_v4  ;;  %v1932_v41 = vadd.f32 %v1931_v17, %v1930_v58  ;;  %v4085_v33 = vadd.f32 %v2627_v36, %v2593_v1  ;;  %v1427_v44 = vpop.f32.mrb[27].mxu1  ;;  %v1937_v19 = vsel %vm720_vm6, %v4077_v4, 0.0 }
 0x239   : > { %v2391_v5 = vpack.c.bf16 %v4081_v43, %v4081_v43  ;;  %v1933_v55 = vsel %vm720_vm6, %v4081_v43, 0.0  ;;  %v4091_v50 = vadd.f32 %v1664_v38, %v1427_v44  ;;  %v2630_v27 = vpop.f32.mrb[28].mxu0 }
 0x23a   : > { %1879 = vst.msk [vmem:[%s3892_s13 + $0x68] sm:$0xf] %vm1852_vm15, %v2393_v20  ;;  %v1934_v52 = vadd.f32 %v1933_v55, %v1932_v41  ;;  %v2394_v56 = vpack.c.bf16 %v4085_v33, %v4085_v33  ;;  %v1677_v59 = vpop.f32.mrb[29].mxu0  ;;  %v1939_v26 = vsel %vm720_vm6, %v4085_v33, 0.0 }
 0x23b   : > { %1877 = vst.msk [vmem:[%s3892_s13 + $0x60] sm:$0xf] %vm1852_vm15, %v2391_v5  ;;  %v2392_v0 = vpack.c.bf16 %v4091_v50, %v4091_v50  ;;  %v1935_v16 = vsel %vm720_vm6, %v4091_v50, 0.0  ;;  %v2631_v3 = vpop.f32.mrb[30].mxu0 }
 0x23c   : > { %1880 = vst.msk [vmem:[%s3892_s13 + $0x6c] sm:$0xf] %vm1852_vm15, %v2394_v56  ;;  %v1936_v6 = vadd.f32 %v1935_v16, %v1934_v52  ;;  %v1680_v37 = vpop.f32.mrb[31].mxu0 }
 0x23d   : > { %1878 = vst.msk [vmem:[%s3892_s13 + $0x64] sm:$0xf] %vm1852_vm15, %v2392_v0  ;;  %v2596_v63 = vpop.f32.mrb[28].mxu1 }
 0x23e   : > { %v1938_v8 = vadd.f32 %v1937_v19, %v1936_v6  ;;  %v4109_v30 = vadd.f32 %v2630_v27, %v2596_v63  ;;  %v1440_v60 = vpop.f32.mrb[29].mxu1 }
 0x23f   : > { %v4113_v2 = vadd.f32 %v1677_v59, %v1440_v60  ;;  %v2597_v54 = vpop.f32.mrb[30].mxu1 }
 0x240   : > { %v2397_v51 = vpack.c.bf16 %v4109_v30, %v4109_v30  ;;  %v1940_v18 = vadd.f32 %v1939_v26, %v1938_v8  ;;  %v4118_v24 = vadd.f32 %v2631_v3, %v2597_v54  ;;  %v1443_v46 = vpop.f32.mrb[31].mxu1  ;;  %v1945_v17 = vsel %vm720_vm6, %v4109_v30, 0.0 }
 0x241   : > { %v2395_v35 = vpack.c.bf16 %v4113_v2, %v4113_v2  ;;  %v1941_v36 = vsel %vm720_vm6, %v4113_v2, 0.0  ;;  %v4125_v22 = vadd.f32 %v1680_v37, %v1443_v46 }
 0x242   : > { %1883 = vst.msk [vmem:[%s3892_s13 + $0x78] sm:$0xf] %vm1852_vm15, %v2397_v51  ;;  %v1942_v38 = vadd.f32 %v1941_v36, %v1940_v18  ;;  %v2398_v45 = vpack.c.bf16 %v4118_v24, %v4118_v24 }
 0x243   : > { %1881 = vst.msk [vmem:[%s3892_s13 + $0x70] sm:$0xf] %vm1852_vm15, %v2395_v35  ;;  %v2396_v39 = vpack.c.bf16 %v4125_v22, %v4125_v22  ;;  %v1943_v58 = vsel %vm720_vm6, %v4125_v22, 0.0 }
 0x244   : > { %1884 = vst.msk [vmem:[%s3892_s13 + $0x7c] sm:$0xf] %vm1852_vm15, %v2398_v45  ;;  %v1944_v23 = vadd.f32 %v1943_v58, %v1942_v38 }
 0x245   : > { %1882 = vst.msk [vmem:[%s3892_s13 + $0x74] sm:$0xf] %vm1852_vm15, %v2396_v39 }
 0x246   : > { %v1946_v1 = vadd.f32 %v1945_v17, %v1944_v23 }
 0x247   : > { %2920 = shalt.err (!%p2917_p13)
}
 0x248   : > { %s2921_s9 = scalar_lea.hbm %s4134_s10, 2048  ;;  %s2925_s13 = scalar_lea.hbm %s4381_s4, 4096 }
 0x249   : > { %p2922_p0 = scmp.ne.s32.totalorder %s4134_s10, %s2921_s9  ;;  %p2926_p9 = scmp.lt.u32.totalorder %s4134_s10, %s4381_s4 }
 0x24a   : > { %p2927_p12 = scmp.lt.u32.totalorder %s2925_s13, %s2921_s9  ;;  %p2929_p1 = scmp.lt.u32.totalorder %s2921_s9, %s4134_s10 }
 0x24b   : > { %p2923_p5 = pnand %p2922_p0, %p3203_p6 }
 0x24c   : > { %p2928_p2 = por %p2927_p12, %p2926_p9 }
 0x24d   : > { %p2924_p11 = pneg %p2923_p5 }
 0x24e   : > { %p2930_p4 = por %p2929_p1, %p2928_p2 }
 0x250   : > { %p2931_p8 = pnand %p2930_p4, %p2924_p11 }
 0x252   : > { %2934 = shalt.err (!%p2931_p8)
}
 0x253   : > { %s3025_s28 = smov 64   ;;  %v1947_v20 = vsel %vm720_vm6, %v4118_v24, 0.0  ;;  %s2273_s12 = sshll.u32 %s3254_s17, 1 }
 0x254   : > { %2716 = dma.vmem_to_hbm [thread:$0]  (%p3203_p6), %s4142_s11, 2048, %s4134_s10, %s2093_s29, %s3025_s28, %s3025_s28, %s3022_s24   ;;  %v1948_v41 = vadd.f32 %v1947_v20, %v1946_v1 }
 0x255   : > { %s4178_s23 = scalar_lea.vmem [#allocation12], %s2273_s12  ;;  %s2363_s24 = sshll.u32 %s3078_s22, 5 }
 0x256   : > { %v1949_v44 = vrot.slane %v1948_v41, 4  ;;  %s2127_s11 = sshll.u32 %s4178_s23, 4  ;;  %s4331_s7 = scalar_lea.hbm %s4382_s5, %s2363_s24  ;;  %s4333_s11 = int_to_ptr.vmem [resolvable:$true] %s2127_s11 }
 0x257   : > { %s2098_s8 = scalar_lea.sflag [#allocation13], %s3254_s17  ;;  %s2935_s9 = scalar_lea.vmem %s4333_s11, 32 }
 0x258   : > { %v1950_v5 = vadd.f32 %v1949_v44, %v1948_v41  ;;  %p2936_p3 = scmp.ne.s32.totalorder %s4333_s11, %s2935_s9  ;;  %s3026_s22 = smov [#allocation12]  }
 0x259   : > { %s2939_s15 = sshll.u32 %s3026_s22, 4  ;;  %s2940_s15 = int_to_ptr.vmem [resolvable:$false] %s2939_s15 }
 0x25a   : > { %v1951_v55 = vrot.slane %v1950_v5, 2  ;;  %p2937_p7 = pnand %p2936_p3, %p3203_p6  ;;  %s2941_s26 = scalar_lea.vmem %s2940_s15, 64 }
 0x25b   : > { %p2942_p13 = scmp.lt.s32.totalorder %s4333_s11, %s2940_s15  ;;  %p2943_p0 = scmp.lt.s32.totalorder %s2941_s26, %s2935_s9 }
 0x25c   : > { %v1952_v27 = vadd.f32 %v1951_v55, %v1950_v5  ;;  %p2938_p10 = pneg %p2937_p7 }
 0x25d   : > { %p2944_p5 = por %p2943_p0, %p2942_p13 }
 0x25e   : > { %v1953_v52 = vrot.slane %v1952_v27, 1 }
 0x25f   : > { %p2945_p11 = pnand %p2944_p5, %p2938_p10 }
 0x260   : > { %v1954_v56 = vadd.f32 %v1953_v52, %v1952_v27 }
 0x262   : > { %v1955_v59 = vmul.f32 0.00390625, %v1954_v56 }
 0x264   : > { %1989 = vst.msk [vmem:[%s4178_s23] sm:$0x1] %vm490_vm1, %v1955_v59  ;;  %v4183_v0 = vsub.f32 %v3983_v9, %v1955_v59  ;;  %v4186_v16 = vsub.f32 %v3995_v42, %v1955_v59  ;;  %v4189_v3 = vsub.f32 %v3978_v12, %v1955_v59  ;;  %v4192_v6 = vsub.f32 %v3988_v61, %v1955_v59 }
 0x265   : > { %v4195_v37 = vsub.f32 %v4017_v49, %v1955_v59  ;;  %v4198_v19 = vsub.f32 %v4027_v34, %v1955_v59  ;;  %v4201_v63 = vsub.f32 %v4015_v29, %v1955_v59  ;;  %v4204_v9 = vsub.f32 %v4021_v40, %v1955_v59 }
 0x266   : > { %v4207_v42 = vsub.f32 %v4049_v15, %v1955_v59  ;;  %v4210_v12 = vsub.f32 %v4059_v21, %v1955_v59  ;;  %v4213_v61 = vsub.f32 %v4045_v13, %v1955_v59  ;;  %v4216_v49 = vsub.f32 %v4053_v32, %v1955_v59 }
 0x267   : > { %v4219_v34 = vsub.f32 %v4081_v43, %v1955_v59  ;;  %v4222_v29 = vsub.f32 %v4091_v50, %v1955_v59  ;;  %v4225_v40 = vsub.f32 %v4077_v4, %v1955_v59  ;;  %v4228_v15 = vsub.f32 %v4085_v33, %v1955_v59 }
 0x268   : > { %v4231_v21 = vsub.f32 %v4113_v2, %v1955_v59  ;;  %v4234_v13 = vsub.f32 %v4125_v22, %v1955_v59  ;;  %v4237_v32 = vsub.f32 %v4109_v30, %v1955_v59  ;;  %v4240_v43 = vsub.f32 %v4118_v24, %v1955_v59 }
 0x269   : > { %v1956_v50 = vsub.f32 %v3880_v28, %v1955_v59  ;;  %v1957_v4 = vsub.f32 %v3888_v48, %v1955_v59  ;;  %v1958_v8 = vsub.f32 %v3878_v53, %v1955_v59  ;;  %v1959_v33 = vsub.f32 %v3884_v7, %v1955_v59 }
 0x26a   : > { %v1960_v2 = vsub.f32 %v3916_v11, %v1955_v59  ;;  %v1961_v51 = vsub.f32 %v3926_v25, %v1955_v59  ;;  %v1962_v28 = vsub.f32 %v3912_v31, %v1955_v59  ;;  %v1963_v7 = vsub.f32 %v3920_v14, %v1955_v59 }
 0x26b   : > { %v1990_v60 = vmul.f32 %v1956_v50, %v1956_v50  ;;  %v1991_v26 = vmul.f32 %v1957_v4, %v1957_v4  ;;  %v1992_v54 = vmul.f32 %v1958_v8, %v1958_v8  ;;  %v1993_v30 = vmul.f32 %v1959_v33, %v1959_v33 }
 0x26c   : > { %v1994_v48 = vmul.f32 %v1960_v2, %v1960_v2  ;;  %v1995_v36 = vmul.f32 %v1961_v51, %v1961_v51  ;;  %v1964_v25 = vsub.f32 %v3948_v10, %v1955_v59  ;;  %v1996_v38 = vmul.f32 %v1962_v28, %v1962_v28 }
 0x26d   : > { %v2022_v18 = vsel %vm720_vm6, %v1990_v60, 0.0  ;;  %v2023_v24 = vsel %vm720_vm6, %v1991_v26, 0.0  ;;  %v2025_v53 = vsel %vm720_vm6, %v1992_v54, 0.0  ;;  %v2027_v11 = vsel %vm720_vm6, %v1993_v30, 0.0 }
 0x26e   : > { %v2024_v46 = vadd.f32 %v2023_v24, %v2022_v18  ;;  %v2029_v45 = vsel %vm720_vm6, %v1994_v48, 0.0  ;;  %v1965_v58 = vsub.f32 %v3959_v47, %v1955_v59  ;;  %v1997_v23 = vmul.f32 %v1963_v7, %v1963_v7 }
 0x26f   : > { %v2031_v31 = vsel %vm720_vm6, %v1995_v36, 0.0  ;;  %v1966_v1 = vsub.f32 %v3944_v57, %v1955_v59  ;;  %v1998_v20 = vmul.f32 %v1964_v25, %v1964_v25  ;;  %v2033_v14 = vsel %vm720_vm6, %v1996_v38, 0.0 }
 0x270   : > { %v2026_v35 = vadd.f32 %v2025_v53, %v2024_v46  ;;  %v1967_v44 = vsub.f32 %v3952_v62, %v1955_v59  ;;  %v1999_v5 = vmul.f32 %v1965_v58, %v1965_v58  ;;  %v2035_v10 = vsel %vm720_vm6, %v1997_v23, 0.0 }
 0x271   : > { %v2000_v27 = vmul.f32 %v1966_v1, %v1966_v1  ;;  %v2037_v52 = vsel %vm720_vm6, %v1998_v20, 0.0  ;;  %v2002_v57 = vmul.f32 %v4183_v0, %v4183_v0  ;;  %v2003_v62 = vmul.f32 %v4186_v16, %v4186_v16 }
 0x272   : > { %v2028_v22 = vadd.f32 %v2027_v11, %v2026_v35  ;;  %v2001_v56 = vmul.f32 %v1967_v44, %v1967_v44  ;;  %v2039_v50 = vsel %vm720_vm6, %v1999_v5, 0.0  ;;  %v2004_v26 = vmul.f32 %v4189_v3, %v4189_v3 }
 0x273   : > { %v2041_v8 = vsel %vm720_vm6, %v2000_v27, 0.0  ;;  %v2045_v2 = vsel %vm720_vm6, %v2002_v57, 0.0  ;;  %v2005_v51 = vmul.f32 %v4192_v6, %v4192_v6  ;;  %v2047_v0 = vsel %vm720_vm6, %v2003_v62, 0.0 }
 0x274   : > { %v2030_v39 = vadd.f32 %v2029_v45, %v2028_v22  ;;  %v2043_v59 = vsel %vm720_vm6, %v2001_v56, 0.0  ;;  %v2006_v18 = vmul.f32 %v4195_v37, %v4195_v37  ;;  %v2049_v16 = vsel %vm720_vm6, %v2004_v26, 0.0 }
 0x275   : > { %v2007_v46 = vmul.f32 %v4198_v19, %v4198_v19  ;;  %v2051_v3 = vsel %vm720_vm6, %v2005_v51, 0.0  ;;  %v2008_v48 = vmul.f32 %v4201_v63, %v4201_v63  ;;  %v2009_v35 = vmul.f32 %v4204_v9, %v4204_v9 }
 0x276   : > { %v2032_v17 = vadd.f32 %v2031_v31, %v2030_v39  ;;  %v2053_v6 = vsel %vm720_vm6, %v2006_v18, 0.0  ;;  %v2010_v36 = vmul.f32 %v4207_v42, %v4207_v42  ;;  %v2011_v22 = vmul.f32 %v4210_v12, %v4210_v12 }
 0x277   : > { %v2055_v37 = vsel %vm720_vm6, %v2007_v46, 0.0  ;;  %v2057_v19 = vsel %vm720_vm6, %v2008_v48, 0.0  ;;  %v2059_v63 = vsel %vm720_vm6, %v2009_v35, 0.0  ;;  %v2012_v38 = vmul.f32 %v4213_v61, %v4213_v61 }
 0x278   : > { %v2034_v41 = vadd.f32 %v2033_v14, %v2032_v17  ;;  %v2061_v9 = vsel %vm720_vm6, %v2010_v36, 0.0  ;;  %v2013_v39 = vmul.f32 %v4216_v49, %v4216_v49  ;;  %v2063_v42 = vsel %vm720_vm6, %v2011_v22, 0.0 }
 0x279   : > { %v2014_v23 = vmul.f32 %v4219_v34, %v4219_v34  ;;  %v2065_v12 = vsel %vm720_vm6, %v2012_v38, 0.0  ;;  %v2015_v17 = vmul.f32 %v4222_v29, %v4222_v29  ;;  %v2016_v20 = vmul.f32 %v4225_v40, %v4225_v40 }
 0x27a   : > { %v2036_v55 = vadd.f32 %v2035_v10, %v2034_v41  ;;  %v2067_v61 = vsel %vm720_vm6, %v2013_v39, 0.0  ;;  %v2017_v41 = vmul.f32 %v4228_v15, %v4228_v15  ;;  %v2018_v5 = vmul.f32 %v4231_v21, %v4231_v21 }
 0x27b   : > { %v2069_v49 = vsel %vm720_vm6, %v2014_v23, 0.0  ;;  %v2071_v34 = vsel %vm720_vm6, %v2015_v17, 0.0  ;;  %v2073_v29 = vsel %vm720_vm6, %v2016_v20, 0.0  ;;  %v2020_v15 = vmul.f32 %v4237_v32, %v4237_v32 }
 0x27c   : > { %v2038_v47 = vadd.f32 %v2037_v52, %v2036_v55  ;;  %v2019_v55 = vmul.f32 %v4234_v13, %v4234_v13  ;;  %v2075_v40 = vsel %vm720_vm6, %v2017_v41, 0.0  ;;  %v2077_v52 = vsel %vm720_vm6, %v2018_v5, 0.0 }
 0x27d   : > { %v2021_v21 = vmul.f32 %v4240_v43, %v4240_v43  ;;  %v2081_v13 = vsel %vm720_vm6, %v2020_v15, 0.0 }
 0x27e   : > { %v2040_v4 = vadd.f32 %v2039_v50, %v2038_v47  ;;  %v2079_v56 = vsel %vm720_vm6, %v2019_v55, 0.0 }
 0x27f   : > { %v2083_v57 = vsel %vm720_vm6, %v2021_v21, 0.0 }
 0x280   : > { %v2042_v33 = vadd.f32 %v2041_v8, %v2040_v4 }
 0x282   : > { %v2044_v60 = vadd.f32 %v2043_v59, %v2042_v33 }
 0x284   : > { %v2046_v54 = vadd.f32 %v2045_v2, %v2044_v60 }
 0x286   : > { %v2048_v30 = vadd.f32 %v2047_v0, %v2046_v54 }
 0x288   : > { %v2050_v24 = vadd.f32 %v2049_v16, %v2048_v30 }
 0x28a   : > { %v2052_v28 = vadd.f32 %v2051_v3, %v2050_v24 }
 0x28c   : > { %v2054_v53 = vadd.f32 %v2053_v6, %v2052_v28 }
 0x28e   : > { %v2056_v7 = vadd.f32 %v2055_v37, %v2054_v53 }
 0x290   : > { %v2058_v11 = vadd.f32 %v2057_v19, %v2056_v7 }
 0x292   : > { %v2060_v25 = vadd.f32 %v2059_v63, %v2058_v11 }
 0x294   : > { %v2062_v45 = vadd.f32 %v2061_v9, %v2060_v25 }
 0x296   : > { %v2064_v58 = vadd.f32 %v2063_v42, %v2062_v45 }
 0x298   : > { %v2066_v31 = vadd.f32 %v2065_v12, %v2064_v58 }
 0x29a   : > { %v2068_v1 = vadd.f32 %v2067_v61, %v2066_v31 }
 0x29c   : > { %v2070_v14 = vadd.f32 %v2069_v49, %v2068_v1 }
 0x29e   : > { %v2072_v44 = vadd.f32 %v2071_v34, %v2070_v14 }
 0x2a0   : > { %v2074_v10 = vadd.f32 %v2073_v29, %v2072_v44 }
 0x2a2   : > { %v2076_v27 = vadd.f32 %v2075_v40, %v2074_v10 }
 0x2a4   : > { %v2078_v47 = vadd.f32 %v2077_v52, %v2076_v27 }
 0x2a6   : > { %v2080_v50 = vadd.f32 %v2079_v56, %v2078_v47 }
 0x2a8   : > { %v2082_v4 = vadd.f32 %v2081_v13, %v2080_v50 }
 0x2aa   : > { %v2084_v8 = vadd.f32 %v2083_v57, %v2082_v4 }
 0x2ac   : > { %v2085_v33 = vrot.slane %v2084_v8, 4 }
 0x2ae   : > { %v2086_v32 = vadd.f32 %v2085_v33, %v2084_v8 }
 0x2b0   : > { %v2087_v62 = vrot.slane %v2086_v32, 2 }
 0x2b2   : > { %v2088_v59 = vadd.f32 %v2087_v62, %v2086_v32 }
 0x2b4   : > { %v2089_v60 = vrot.slane %v2088_v59, 1 }
 0x2b6   : > { %v2090_v43 = vadd.f32 %v2089_v60, %v2088_v59 }
 0x2b8   : > { %2091 = vst.msk [vmem:[%s4178_s23 + $0x1] sm:$0x1] %vm490_vm1, %v2090_v43 }
 0x2b9   : > { %2948 = shalt.err (!%p2945_p11)
}
 0x2ba   : > { %s2949_s17 = scalar_lea.hbm %s4331_s7, 32  ;;  %s2953_s30 = scalar_lea.hbm %s4382_s5, 64 }
 0x2bb   : > { %p2950_p9 = scmp.ne.s32.totalorder %s4331_s7, %s2949_s17  ;;  %p2954_p1 = scmp.lt.u32.totalorder %s4331_s7, %s4382_s5 }
 0x2bc   : > { %p2955_p4 = scmp.lt.u32.totalorder %s2953_s30, %s2949_s17  ;;  %p2957_p3 = scmp.lt.u32.totalorder %s2949_s17, %s4331_s7 }
 0x2bd   : > { %p2951_p12 = pnand %p2950_p9, %p3203_p6 }
 0x2be   : > { %p2956_p8 = por %p2955_p4, %p2954_p1 }
 0x2bf   : > { %p2952_p2 = pneg %p2951_p12 }
 0x2c0   : > { %p2958_p7 = por %p2957_p3, %p2956_p8 }
 0x2c2   : > { %p2959_p10 = pnand %p2958_p7, %p2952_p2 }
 0x2c4   : > { %2962 = shalt.err (!%p2959_p10)
}
 0x2c5   : > { %2717 = dma.vmem_to_hbm [thread:$0]  (%p3203_p6), %s4333_s11, 32, %s4331_s7, %s2098_s8  }
 0x2c6 PF: > { %s2139_s23 = sand.u32 1, %s3001_s18   ;;  %p4410_p13 = scmp.ne.s32.totalorder %s4388_s25, 0 }
 0x2c7   : > { %p4411_p0 = scmp.ge.s32.totalorder %s3013_s21, 2  ;;  %s2140_s24 = scalar_lea.sflag [#allocation5], %s2139_s23 }
 0x2c9   : > { %p2735_p5 = pnand %p4411_p0, %p4410_p13 }
 0x2cb   : > { %2992 = dma.done.wait (!%p2735_p5), %s2140_s24, 2048  }
 0x2cc   : > { %2994 = vsyncadd (!%p2735_p5), %s2140_s24, 4294965248  ;;  %s2149_s10 = scalar_lea.sflag [#allocation13], %s2139_s23 }
 0x2cd   : > { %2996 = dma.done.wait (!%p2735_p5), %s2149_s10, 32  }
 0x2ce   : > { %2998 = vsyncadd (!%p2735_p5), %s2149_s10, 4294967264  ;;  %p24_p6 = scmp.ge.s32.totalorder %s3189_s16, 4   ;;  %s4412_s18 = smov %s3005_s19 }
 0x2cf   : > { %s4413_s19 = smov %s3009_s20  ;;  %s4414_s20 = smov %s3199_s27 }
 0x2d0   : > { %s4415_s21 = smov %s3189_s16  ;;  %26 = sbr.rel (!%p24_p6) target bundleno = 9 (0x9), region = 115 }
 0x2d7   :  { %2154 = vsyncpa [#allocation4], 1 }
 0x2d8   :  { %2156 = vsyncpa [#allocation4 + $0x1], 1 }
 0x2d9   :  { %2157 = vsyncpa [#allocation7], 1 }
 0x2da   :  { %2158 = vsyncpa [#allocation10], 1 }
 0x2db   :  { %2159 = vsyncpa [#allocation5], 1 }
 0x2dc   :  { %2161 = vsyncpa [#allocation5 + $0x1], 1 }
 0x2dd   :  { %2162 = vsyncpa [#allocation13], 1 }
 0x2de   :  { %2164 = vsyncpa [#allocation13 + $0x1], 1 }

// kernel: decoder_block_forward.5
= control target key start
LH: loop header
LB: loop body
LE: loop exit
PB: predicated region body
PF: predicated region fallthrough
CT: control target
= control target key end

     0   :  { %s5170_s0 = inlined_call_operand.hbm [shape: bf16[2,16,16,4], index: 0, kind: input, shape index: {}]   ;;  %s5171_s1 = inlined_call_operand.hbm [shape: bf16[2,16,16,4], index: 1, kind: input, shape index: {}]   ;;  %s5172_s2 = inlined_call_operand.hbm [shape: bf16[3,24,4], index: 2, kind: input, shape index: {}]   ;;  %s5173_s3 = inlined_call_operand.hbm [shape: bf16[2,16,16,4], index: 3, kind: output, shape index: {0}]   ;;  %s5174_s4 = inlined_call_operand.hbm [shape: f32[2,2,4], index: 4, kind: output, shape index: {1}]  }
   0x1   :  { %5205 = sst [smem:[#allocation18_spill]] %s5170_s0 }
   0x2   :  { %5206 = sst [smem:[#allocation19_spill]] %s5172_s2 }
   0x3   :  { %10 = vsyncpa [#allocation4], 0 }
   0x4   :  { %12 = vsyncpa [#allocation4 + $0x1], 0 }
   0x5   :  { %13 = vsyncpa [#allocation7], 0 }
   0x6   :  { %15 = vsyncpa [#allocation7 + $0x1], 0 }
   0x7   :  { %16 = vsyncpa [#allocation5], 0 }
   0x8   :  { %18 = vsyncpa [#allocation5 + $0x1], 0 }
   0x9   :  { %19 = vsyncpa [#allocation11], 0 }
   0xa   :  { %21 = vsyncpa [#allocation11 + $0x1], 0  ;;  %s3445_s15 = smov 0   ;;  %s3447_s16 = smov 0  }
   0xb   :  { %s3449_s17 = smov 0   ;;  %s3451_s18 = smov 0  }
   0xc LB: > { %s3466_s19 = sadd.s32 4294967295, %s3404_s18   ;;  %s2686_s20 = sadd.s32 4294967294, %s3404_s18   ;;  %s3404_s18 = sphi %s3451_s18, %s5270_s18   ;;  %s3400_s17 = sphi %s3449_s17, %s5269_s17   ;;  %s3396_s16 = sphi %s3447_s16, %s5268_s16   ;;  %s3392_s15 = sphi %s3445_s15, %s5267_s15  }
   0xd   : > { %p47_p0 = scmp.ne.s32.totalorder %s3396_s16, %s3392_s15  ;;  %p5175_p1 = scmp.eq.s32.totalorder %s3466_s19, 0 }
   0xe   : > { %p124_p3 = scmp.eq.s32.totalorder %s2686_s20, 1  ;;  %p2687_p5 = scmp.ge.s32.totalorder %s3404_s18, 1 }
   0xf   : > { %p3475_p4 = por %p5175_p1, %p47_p0  ;;  %p157_p7 = scmp.lt.s32.totalorder %s3404_s18, 3 }
  0x10   : > { %p3480_p6 = por %p124_p3, %p47_p0  ;;  %s3406_s24 = smov [#allocation8]  }
  0x11   : > { %s5207_s21 = scalar_select %p3475_p4, 1, 0 }
  0x12   : > { %s5208_s22 = scalar_select %p3480_p6, 1, 0 }
  0x13   : > { %p3485_p8 = pnand %p2687_p5, %p157_p7  ;;  %s169_s25 = sshll.u32 %s3406_s24, 4  ;;  %s3489_s25 = int_to_ptr.vmem [resolvable:$true] %s169_s25 }
  0x14   : > { %s3501_s27 = sadd.s32 1, %s3404_s18   ;;  %s34_s28 = sadd.s32 1, %s3400_s17 }
  0x15   : > { %s5209_s23 = scalar_select %p3485_p8, 1, 0 }
  0x16   : > { %p3108_p9 = pneg %p3485_p8  ;;  %s31_s29 = ssub.s32 %s3404_s18, %s3501_s27 }
  0x17   : > { %s5211_s2 = sld [smem:[#allocation19_spill]] }
  0x18   : > { %p3496_p11 = pnand %p3108_p9, %p5175_p1 }
  0x1a   : > { %p3212_p13 = pneg %p3496_p11 }
  0x1d   : > { %s3210_s6 = scalar_lea.hbm %s5211_s2, 576 }
  0x1e   : > { %p3211_p12 = scmp.ne.s32.totalorder %s5211_s2, %s3210_s6  ;;  %p3217_p5 = scmp.lt.u32.totalorder %s3210_s6, %s5211_s2 }
  0x20   : > { %p3213_p0 = pnand %p3212_p13, %p3211_p12 }
  0x22   : > { %p3214_p3 = pneg %p3213_p0 }
  0x24   : > { %p3219_p7 = pnand %p3217_p5, %p3214_p3 }
  0x26   : > { %3222 = shalt.err (!%p3219_p7)
}
  0x27   : > { %s3223_s11 = scalar_lea.vmem %s3489_s25, 576  ;;  %p3231_p2 = scmp.lt.s32.totalorder %s3489_s25, %s3489_s25 }
  0x28   : > { %p3224_p9 = scmp.ne.s32.totalorder %s3489_s25, %s3223_s11  ;;  %p3232_p6 = scmp.lt.s32.totalorder %s3223_s11, %s3223_s11 }
  0x2a   : > { %p3226_p10 = pnand %p3224_p9, %p3212_p13  ;;  %p3233_p4 = por %p3232_p6, %p3231_p2 }
  0x2c   : > { %p3227_p1 = pneg %p3226_p10 }
  0x2e   : > { %p3234_p8 = pnand %p3233_p4, %p3227_p1 }
  0x30   : > { %3237 = shalt.err (!%p3234_p8)
}
  0x31   : > { %s5178_s12 = smov 64   ;;  %s5180_s13 = smov 4  }
  0x32   : > { %3111 = dma.hbm_to_vmem [thread:$0]  (!%p3496_p11), %s5211_s2, 576, %s3489_s25, [#allocation7], %s5178_s12, %s5178_s12, %s5180_s13  }
  0x33   : > { %p32_p1 = scmp.eq.s32.totalorder %s31_s29, 0  ;;  %p41_p2 = scmp.ne.s32.totalorder %s3400_s17, %s3396_s16 }
  0x34   : > { %p42_p4 = scmp.eq.s32.totalorder %s3404_s18, 0  ;;  %p3127_p6 = scmp.lt.s32.totalorder %s3404_s18, 2 }
  0x35   : > { %s3535_s24 = scalar_select %p32_p1, %s3400_s17, %s34_s28  }
  0x36   : > { %p43_p8 = por %p42_p4, %p41_p2  ;;  %p5213_p10 = scmp.eq.s32.totalorder %s3466_s19, 1 }
  0x37   : > { %5212 = sst [smem:[#allocation17_spill]] %s3535_s24  ;;  %s183_s26 = sand.u32 1, %s3400_s17  }
  0x38   : > { %p3539_p12 = por %p5213_p10, %p41_p2  ;;  %s2827_s5 = sshll.u32 %s3404_s18, 11 }
  0x39   : > { %s3545_s6 = sshll.u32 %s183_s26, 7  ;;  %s5215_s0 = sld [smem:[#allocation18_spill]] }
  0x3a   : > { %s187_s28 = scalar_lea.vmem [#allocation3], %s3545_s6  ;;  %p3553_p11 = pnand %p3127_p6, %p43_p8 }
  0x3b   : > { %s194_s29 = sshll.u32 %s187_s28, 4  ;;  %s3562_s14 = scalar_lea.hbm %s5171_s1, %s2827_s5  ;;  %s3557_s29 = int_to_ptr.vmem [resolvable:$true] %s194_s29 }
  0x3c   : > { %s3564_s20 = scalar_lea.sflag [#allocation4], %s183_s26  ;;  %p3240_p0 = pneg %p3553_p11 }
  0x3f   : > { %s3550_s25 = scalar_lea.hbm %s5215_s0, %s2827_s5  ;;  %s3243_s12 = scalar_lea.hbm %s5215_s0, 4096 }
  0x40   : > { %s3238_s7 = scalar_lea.hbm %s3550_s25, 2048  ;;  %p3244_p7 = scmp.lt.u32.totalorder %s3550_s25, %s5215_s0 }
  0x41   : > { %p3239_p13 = scmp.ne.s32.totalorder %s3550_s25, %s3238_s7  ;;  %p3245_p9 = scmp.lt.u32.totalorder %s3243_s12, %s3238_s7 }
  0x42   : > { %p3247_p2 = scmp.lt.u32.totalorder %s3238_s7, %s3550_s25 }
  0x43   : > { %p3241_p3 = pnand %p3240_p0, %p3239_p13  ;;  %p3246_p1 = por %p3245_p9, %p3244_p7 }
  0x45   : > { %p3242_p5 = pneg %p3241_p3  ;;  %p3248_p4 = por %p3247_p2, %p3246_p1 }
  0x47   : > { %p3249_p6 = pnand %p3248_p4, %p3242_p5 }
  0x49   : > { %3252 = shalt.err (!%p3249_p6)
}
  0x4a   : > { %s3253_s26 = scalar_lea.vmem %s3557_s29, 2048  ;;  %s3409_s5 = smov [#allocation3]  }
  0x4b   : > { %p3254_p8 = scmp.ne.s32.totalorder %s3557_s29, %s3253_s26  ;;  %s3258_s10 = sshll.u32 %s3409_s5, 4  ;;  %s3259_s10 = int_to_ptr.vmem [resolvable:$false] %s3258_s10 }
  0x4c   : > { %s3260_s2 = scalar_lea.vmem %s3259_s10, 4096  ;;  %p3261_p3 = scmp.lt.s32.totalorder %s3557_s29, %s3259_s10 }
  0x4d   : > { %p3256_p10 = pnand %p3254_p8, %p3240_p0  ;;  %p3262_p7 = scmp.lt.s32.totalorder %s3260_s2, %s3253_s26 }
  0x4f   : > { %p3257_p13 = pneg %p3256_p10  ;;  %p3263_p9 = por %p3262_p7, %p3261_p3 }
  0x51   : > { %p3264_p1 = pnand %p3263_p9, %p3257_p13 }
  0x53   : > { %3267 = shalt.err (!%p3264_p1)
}
  0x54   : > { %s5217_s12 = smov 4   ;;  %s5218_s13 = smov 64  }
  0x55   : > { %3115 = dma.hbm_to_vmem [thread:$0]  (!%p3553_p11), %s3550_s25, 2048, %s3557_s29, %s3564_s20, %s5218_s13, %s5218_s13, %s5217_s12  }
  0x56   : > { %s208_s11 = scalar_lea.vmem [#allocation6], %s3545_s6  ;;  %s204_s8 = sand.u32 1, %s3404_s18  }
  0x57   : > { %s215_s7 = sshll.u32 %s208_s11, 4  ;;  %s3599_s28 = scalar_lea.sflag [#allocation7], %s204_s8  ;;  %s3597_s7 = int_to_ptr.vmem [resolvable:$true] %s215_s7 }
  0x58   : > { %s3268_s26 = scalar_lea.hbm %s3562_s14, 2048  ;;  %s3273_s2 = scalar_lea.hbm %s5171_s1, 4096 }
  0x59   : > { %p3269_p5 = scmp.ne.s32.totalorder %s3562_s14, %s3268_s26  ;;  %p3274_p6 = scmp.lt.u32.totalorder %s3562_s14, %s5171_s1 }
  0x5a   : > { %p3275_p8 = scmp.lt.u32.totalorder %s3273_s2, %s3268_s26  ;;  %p3277_p13 = scmp.lt.u32.totalorder %s3268_s26, %s3562_s14 }
  0x5b   : > { %p3271_p2 = pnand %p3269_p5, %p3240_p0 }
  0x5c   : > { %p3276_p10 = por %p3275_p8, %p3274_p6 }
  0x5d   : > { %p3272_p4 = pneg %p3271_p2 }
  0x5e   : > { %p3278_p3 = por %p3277_p13, %p3276_p10 }
  0x60   : > { %p3279_p7 = pnand %p3278_p3, %p3272_p4 }
  0x62   : > { %3282 = shalt.err (!%p3279_p7)
}
  0x63   : > { %s3283_s6 = scalar_lea.vmem %s3597_s7, 2048  ;;  %s3410_s25 = smov [#allocation6]  }
  0x64   : > { %p3284_p9 = scmp.ne.s32.totalorder %s3597_s7, %s3283_s6  ;;  %s3288_s29 = sshll.u32 %s3410_s25, 4  ;;  %s3289_s29 = int_to_ptr.vmem [resolvable:$false] %s3288_s29 }
  0x65   : > { %s3290_s0 = scalar_lea.vmem %s3289_s29, 4096  ;;  %p3291_p2 = scmp.lt.s32.totalorder %s3597_s7, %s3289_s29 }
  0x66   : > { %p3286_p1 = pnand %p3284_p9, %p3240_p0  ;;  %p3292_p6 = scmp.lt.s32.totalorder %s3290_s0, %s3283_s6 }
  0x68   : > { %p3287_p5 = pneg %p3286_p1  ;;  %p3293_p8 = por %p3292_p6, %p3291_p2 }
  0x6a   : > { %p3294_p10 = pnand %p3293_p8, %p3287_p5 }
  0x6c   : > { %3297 = shalt.err (!%p3294_p10)
}
  0x6d   : > { %3118 = dma.hbm_to_vmem [thread:$0]  (!%p3553_p11), %s3562_s14, 2048, %s3597_s7, %s3599_s28, %s5218_s13, %s5218_s13, %s5217_s12  }
  0x6e   : > { %p5219_p0 = scmp.ne.s32.totalorder %s5209_s23, 0 }
  0x6f   : > { %s3631_s24 = sand.u32 (!%p5219_p0), 1, %s3396_s16   ;;  %p5220_p4 = scmp.ne.s32.totalorder (!%p5219_p0), %s5207_s21, 0 }
  0x70   : > { %227 = sbr.rel (%p5219_p0) target bundleno = 784 (0x310), region = 32  ;;  %s3634_s20 = sshll.u32 (!%p5219_p0), %s3631_s24, 7 }
  0x71   : > { %s230_s9 = scalar_lea.sflag (!%p5219_p0), [#allocation4], %s3631_s24  ;;  %s3638_s11 = scalar_lea.vmem (!%p5219_p0), [#allocation3], %s3634_s20 }
  0x77   : > { %3371 = dma.done.wait (%p5220_p4), %s230_s9, 2048  }
  0x78   : > { %3373 = vsyncadd (%p5220_p4), %s230_s9, 4294965248  ;;  %s238_s23 = sand.u32 1, %s3466_s19   ;;  %s3646_s12 = scalar_lea.vmem [#allocation6], %s3634_s20 }
  0x79   : > { %s239_s14 = scalar_lea.sflag [#allocation7], %s238_s23 }
  0x7a   : > { %3375 = dma.done.wait (%p5220_p4), %s239_s14, 2048  }
  0x7b   : > { %3377 = vsyncadd (%p5220_p4), %s239_s14, 4294965248  ;;  %p5221_p11 = scmp.eq.s32.totalorder %s3466_s19, 0 }
  0x7d   : > { %3379 = dma.done.wait (%p5221_p11), [#allocation7], 576   ;;  %p5222_p13 = pmov %p5221_p11 }
  0x7e   : > { %vm352_vm0 = vsmask.f32 256  ;;  %vm403_vm1 = vsmask.f32 7966  ;;  %v3657_v0 = vld [vmem:[%s3646_s12] sm:$0xff]   ;;  %vm351_vm2 = vcmask 57344  }
  0x7f   : > { %3381 = vsyncadd (%p5222_p13), [#allocation7], 4294966720  ;;  %v3660_v1 = vld [vmem:[%s3638_s11] sm:$0xff]   ;;  %vm402_vm3 = vcmask 195719   ;;  %s3411_s21 = smov 12   ;;  %v3665_v2 = vld [vmem:[%s3638_s11 + $0x10] sm:$0xff]  }
  0x80   : > { %1067 = vrot.lane.b32.xlu0 %v3657_v0, %s3411_s21  ;;  %v793_v3 = vshrl.u32 %v3657_v0, 16  ;;  %s3412_s13 = smov 8   ;;  %v3671_v4 = vld [vmem:[%s3638_s11 + $0x8] sm:$0xff]   ;;  %v796_v5 = vshll.u32 %v3657_v0, 16  ;;  %vm3680_vm4 = vmand %vm351_vm2, %vm352_vm0  ;;  %v3699_v13 = vld [vmem:[%s3646_s12 + $0x10] sm:$0xff]   ;;  %v534_v14 = vshrl.u32 %v3660_v1, 16 }
  0x81   : > { %1002 = vrot.lane.b32.xlu1 %v3660_v1, %s3412_s13  ;;  %v3677_v7 = vld [vmem:[%s3646_s12 + $0x8] sm:$0xff]   ;;  %vm3692_vm5 = vmand %vm402_vm3, %vm403_vm1  ;;  %v3705_v16 = vld [vmem:[%s3646_s12 + $0x18] sm:$0xff]   ;;  %v807_v19 = vshrl.u32 %v3699_v13, 16  ;;  %v537_v22 = vshll.u32 %v3660_v1, 16  ;;  %s3413_s7 = smov 4   ;;  %v810_v26 = vshll.u32 %v3699_v13, 16 }
  0x82   : > { %v795_v6 = vrot.slane %v793_v3, 7  ;;  %v800_v10 = vshrl.u32 %v3677_v7, 16  ;;  %v803_v11 = vshll.u32 %v3677_v7, 16  ;;  %v354_v17 = vld [vmem:[#allocation2 + $0x8] sm:$0x1]  ;;  %v814_v27 = vshrl.u32 %v3705_v16, 16 }
  0x83   : > { %v405_v18 = vld [vmem:[#allocation2 + $0x8] sm:$0x80]  ;;  %v355_v20 = vsel %vm3680_vm4, 0, %v354_v17  ;;  %v357_v23 = vld [vmem:[#allocation2 + $0x10] sm:$0x1]  ;;  %v817_v28 = vshll.u32 %v3705_v16, 16 }
  0x84   : > { %1006 = vrot.lane.b32.xlu0 %v3665_v2, %s3412_s13  ;;  %v798_v9 = vor.u32 %v796_v5, %v795_v6  ;;  %v802_v15 = vrot.slane %v800_v10, 7  ;;  %v406_v21 = vsel %vm3692_vm5, 0, %v405_v18  ;;  %v3717_v25 = vld [vmem:[%s3638_s11 + $0x18] sm:$0xff]   ;;  %356 = vst [vmem:[#allocation2 + $0x8] sm:$0x1] %v355_v20  ;;  %v809_v30 = vrot.slane %v807_v19, 7 }
  0x85   : > { %1004 = vrot.lane.b32.xlu1 %v3671_v4, %s3412_s13  ;;  %407 = vst [vmem:[#allocation2 + $0x8] sm:$0x80] %v406_v21  ;;  %v408_v29 = vld [vmem:[#allocation2 + $0x10] sm:$0x80]  ;;  %v536_v31 = vrot.slane %v534_v14, 7  ;;  %v358_v32 = vsel %vm3680_vm4, 0, %v357_v23 }
  0x86   : > { %v805_v24 = vor.u32 %v803_v11, %v802_v15  ;;  %v409_v33 = vsel %vm3692_vm5, 0, %v408_v29  ;;  %v816_v34 = vrot.slane %v814_v27, 7  ;;  %359 = vst [vmem:[#allocation2 + $0x10] sm:$0x1] %v358_v32  ;;  %v541_v35 = vshrl.u32 %v3671_v4, 16  ;;  %v3734_v36 = vld [vmem:[%s3646_s12 + $0x20] sm:$0xff]  }
  0x87   : > { %410 = vst [vmem:[#allocation2 + $0x10] sm:$0x80] %v409_v33  ;;  %v3736_v37 = vor.u32 %v537_v22, %v536_v31  ;;  %v544_v38 = vshll.u32 %v3671_v4, 16  ;;  %v3740_v39 = vld [vmem:[%s3646_s12 + $0x28] sm:$0xff]   ;;  %v812_v40 = vor.u32 %v810_v26, %v809_v30  ;;  %v1132_v41 = vrot.slane %v537_v22, 1  ;;  %v3779_v6 = vld [vmem:[%s3638_s11 + $0x20] sm:$0xff]  }
  0x88   : > { %904 = vrot.lane.b32.xlu0 %v798_v9, %s3413_s7  ;;  %v543_v42 = vrot.slane %v541_v35, 7  ;;  %v819_v43 = vor.u32 %v817_v28, %v816_v34  ;;  %v821_v45 = vshrl.u32 %v3734_v36, 16  ;;  %v360_v46 = vld [vmem:[#allocation2 + $0x18] sm:$0x1]  ;;  %v828_v48 = vshrl.u32 %v3740_v39, 16  ;;  %s3414_s8 = smov 16  }
  0x89   : > { %1069 = vrot.lane.b32.xlu1 %v3677_v7, %s3411_s21  ;;  %v1134_v47 = vrot.slane %v544_v38, 1  ;;  %v361_v49 = vsel %vm3680_vm4, 0, %v360_v46  ;;  %v411_v50 = vld [vmem:[#allocation2 + $0x18] sm:$0x80]  ;;  %v548_v51 = vshrl.u32 %v3665_v2, 16  ;;  %v1133_v52 = vor.u32 %v1132_v41, %v534_v14  ;;  %s3415_s28 = smov 20  }
  0x8a   : > { %v3749_v44 = vor.u32 %v544_v38, %v543_v42  ;;  %362 = vst [vmem:[#allocation2 + $0x18] sm:$0x1] %v361_v49  ;;  %v412_v53 = vsel %vm3692_vm5, 0, %v411_v50  ;;  %v363_v54 = vld [vmem:[#allocation2 + $0x20] sm:$0x1]  ;;  %v555_v56 = vshrl.u32 %v3717_v25, 16 }
  0x8b   : > { %v414_v55 = vld [vmem:[#allocation2 + $0x20] sm:$0x80]  ;;  %413 = vst [vmem:[#allocation2 + $0x18] sm:$0x80] %v412_v53  ;;  %v550_v57 = vrot.slane %v548_v51, 7  ;;  %v551_v58 = vshll.u32 %v3665_v2, 16  ;;  %v1135_v14 = vor.u32 %v1134_v47, %v541_v35 }
  0x8c   : > { %906 = vrot.lane.b32.xlu0 %v805_v24, %s3413_s7  ;;  %v364_v59 = vsel %vm3680_vm4, 0, %v363_v54  ;;  %v415_v60 = vsel %vm3692_vm5, 0, %v414_v55  ;;  %v557_v61 = vrot.slane %v555_v56, 7  ;;  %v558_v62 = vshll.u32 %v3717_v25, 16  ;;  %v3791_v21 = vld [vmem:[%s3638_s11 + $0x28] sm:$0xff]   ;;  %v3815_v42 = vld [vmem:[%s3646_s12 + $0x30] sm:$0xff]  }
  0x8d   : > { %1008 = vrot.lane.b32.xlu1 %v3717_v25, %s3412_s13  ;;  %365 = vst [vmem:[#allocation2 + $0x20] sm:$0x1] %v364_v59  ;;  %416 = vst [vmem:[#allocation2 + $0x20] sm:$0x80] %v415_v60  ;;  %v823_v63 = vrot.slane %v821_v45, 7  ;;  %v824_v1 = vshll.u32 %v3734_v36, 16  ;;  %v3774_v4 = vor.u32 %v551_v58, %v550_v57 }
  0x8e   : > { %v3781_v9 = vor.u32 %v558_v62, %v557_v61  ;;  %v830_v15 = vrot.slane %v828_v48, 7  ;;  %v831_v17 = vshll.u32 %v3740_v39, 16  ;;  %v562_v18 = vshrl.u32 %v3779_v6, 16  ;;  %v366_v22 = vld [vmem:[#allocation2 + $0x28] sm:$0x1]  ;;  %v3823_v49 = vld [vmem:[%s3638_s11 + $0x30] sm:$0xff]  }
  0x8f   : > { %v826_v20 = vor.u32 %v824_v1, %v823_v63  ;;  %v417_v23 = vld [vmem:[#allocation2 + $0x28] sm:$0x80]  ;;  %v367_v24 = vsel %vm3680_vm4, 0, %v366_v22  ;;  %v565_v31 = vshll.u32 %v3779_v6, 16  ;;  %v369_v32 = vld [vmem:[#allocation2 + $0x30] sm:$0x1] }
  0x90   : > { %908 = vrot.lane.b32.xlu0 %v812_v40, %s3413_s7  ;;  %v418_v29 = vsel %vm3692_vm5, 0, %v417_v23  ;;  %v564_v30 = vrot.slane %v562_v18, 7  ;;  %v833_v33 = vor.u32 %v831_v17, %v830_v15  ;;  %368 = vst [vmem:[#allocation2 + $0x28] sm:$0x1] %v367_v24  ;;  %v370_v34 = vsel %vm3680_vm4, 0, %v369_v32  ;;  %v3831_v53 = vld [vmem:[%s3646_s12 + $0x38] sm:$0xff]  }
  0x91   : > { %910 = vrot.lane.b32.xlu1 %v819_v43, %s3413_s7  ;;  %419 = vst [vmem:[#allocation2 + $0x28] sm:$0x80] %v418_v29  ;;  %v420_v35 = vld [vmem:[#allocation2 + $0x30] sm:$0x80]  ;;  %371 = vst [vmem:[#allocation2 + $0x30] sm:$0x1] %v370_v34 }
  0x92   : > { %v3809_v38 = vor.u32 %v565_v31, %v564_v30  ;;  %v421_v40 = vsel %vm3692_vm5, 0, %v420_v35  ;;  %v569_v41 = vshrl.u32 %v3791_v21, 16  ;;  %v572_v46 = vshll.u32 %v3791_v21, 16  ;;  %v372_v54 = vld [vmem:[#allocation2 + $0x38] sm:$0x1]  ;;  %v3836_v57 = vld [vmem:[%s3638_s11 + $0x38] sm:$0xff]  }
  0x93   : > { %422 = vst [vmem:[#allocation2 + $0x30] sm:$0x80] %v421_v40  ;;  %v1136_v47 = vrot.slane %v551_v58, 1  ;;  %v423_v55 = vld [vmem:[#allocation2 + $0x38] sm:$0x80]  ;;  %v373_v58 = vsel %vm3680_vm4, 0, %v372_v54 }
  0x94   : > { %1071 = vrot.lane.b32.xlu0 %v3699_v13, %s3411_s21  ;;  %v571_v43 = vrot.slane %v569_v41, 7  ;;  %v424_v59 = vsel %vm3692_vm5, 0, %v423_v55  ;;  %v576_v60 = vshrl.u32 %v3823_v49, 16  ;;  %v375_v61 = vld [vmem:[#allocation2 + $0x40] sm:$0x1]  ;;  %v579_v23 = vshll.u32 %v3823_v49, 16 }
  0x95   : > { %1164 = vrot.lane.b32.xlu1 %v1133_v52, %s3414_s8  ;;  %v5187_v52 = vshrl.u32 %v3815_v42, 16  ;;  %v1137_v63 = vor.u32 %v1136_v47, %v548_v51  ;;  %374 = vst [vmem:[#allocation2 + $0x38] sm:$0x1] %v373_v58  ;;  %425 = vst [vmem:[#allocation2 + $0x38] sm:$0x80] %v424_v59  ;;  %v376_v15 = vsel %vm3680_vm4, 0, %v375_v61 }
  0x96   : > { %v3827_v50 = vor.u32 %v572_v46, %v571_v43  ;;  %v578_v22 = vrot.slane %v576_v60, 7  ;;  %377 = vst [vmem:[#allocation2 + $0x40] sm:$0x1] %v376_v15  ;;  %v583_v2 = vshrl.u32 %v3836_v57, 16  ;;  %v1263_v51 = vrot.slane %v796_v5, 1  ;;  %v3873_v34 = vld [vmem:[%s3638_s11 + $0x40] sm:$0xff]  }
  0x97   : > { %v586_v32 = vshll.u32 %v3836_v57, 16  ;;  %v837_v35 = vrot.slane %v5187_v52, 7  ;;  %v5192_v40 = vshll.u32 %v3815_v42, 16  ;;  %v5189_v47 = vshll.u32 %v3831_v53, 16  ;;  %v378_v54 = vld [vmem:[#allocation2 + $0x48] sm:$0x1] }
  0x98   : > { %1073 = vrot.lane.b32.xlu0 %v3705_v16, %s3411_s21  ;;  %v3862_v29 = vor.u32 %v579_v23, %v578_v22  ;;  %v585_v30 = vrot.slane %v583_v2, 7  ;;  %v590_v25 = vshrl.u32 %v3873_v34, 16  ;;  %v3891_v55 = vld [vmem:[%s3638_s11 + $0x48] sm:$0xff]   ;;  %v379_v58 = vsel %vm3680_vm4, 0, %v378_v54  ;;  %v429_v59 = vld [vmem:[#allocation2 + $0x48] sm:$0x80] }
  0x99   : > { %1166 = vrot.lane.b32.xlu1 %v1135_v14, %s3414_s8  ;;  %v1138_v14 = vrot.slane %v558_v62, 1  ;;  %v5186_v62 = vshrl.u32 %v3831_v53, 16  ;;  %v593_v61 = vshll.u32 %v3873_v34, 16  ;;  %380 = vst [vmem:[#allocation2 + $0x48] sm:$0x1] %v379_v58  ;;  %v430_v0 = vsel %vm3692_vm5, 0, %v429_v59 }
  0x9a   : > { %v3880_v43 = vor.u32 %v586_v32, %v585_v30  ;;  %v432_v15 = vld [vmem:[#allocation2 + $0x50] sm:$0x80]  ;;  %431 = vst [vmem:[#allocation2 + $0x48] sm:$0x80] %v430_v0  ;;  %v3919_v30 = vld [vmem:[%s3638_s11 + $0x50] sm:$0xff]   ;;  %v3936_v58 = vld [vmem:[%s3638_s11 + $0x58] sm:$0xff]  }
  0x9b   : > { %v1139_v5 = vor.u32 %v1138_v14, %v555_v56  ;;  %v844_v56 = vrot.slane %v5186_v62, 7  ;;  %v381_v14 = vld [vmem:[#allocation2 + $0x50] sm:$0x1]  ;;  %v433_v22 = vsel %vm3692_vm5, 0, %v432_v15  ;;  %v384_v59 = vld [vmem:[#allocation2 + $0x58] sm:$0x1] }
  0x9c   : > { %912 = vrot.lane.b32.xlu0 %v826_v20, %s3413_s7  ;;  %v426_v20 = vld [vmem:[#allocation2 + $0x40] sm:$0x80]  ;;  %434 = vst [vmem:[#allocation2 + $0x50] sm:$0x80] %v433_v22  ;;  %v3925_v54 = vld [vmem:[%s3646_s12 + $0x40] sm:$0xff]   ;;  %v385_v0 = vsel %vm3680_vm4, 0, %v384_v59 }
  0x9d   : > { %914 = vrot.lane.b32.xlu1 %v833_v33, %s3413_s7  ;;  %v427_v24 = vsel %vm3692_vm5, 0, %v426_v20  ;;  %v1265_v33 = vrot.slane %v803_v11, 1  ;;  %v1264_v11 = vor.u32 %v1263_v51, %v793_v3  ;;  %v592_v3 = vrot.slane %v590_v25, 7  ;;  %386 = vst [vmem:[#allocation2 + $0x58] sm:$0x1] %v385_v0  ;;  %s4649_s26 = scalar_lea.vmem [#allocation9], %s3634_s20 }
  0x9e   : > { %428 = vst [vmem:[#allocation2 + $0x40] sm:$0x80] %v427_v24  ;;  %v382_v20 = vsel %vm3680_vm4, 0, %v381_v14  ;;  %v840_v24 = vor.u32 %v5192_v40, %v837_v35  ;;  %v847_v51 = vor.u32 %v5189_v47, %v844_v56  ;;  %v5184_v35 = vshrl.u32 %v3919_v30, 16  ;;  %v438_v22 = vld [vmem:[#allocation2 + $0x60] sm:$0x80] }
  0x9f   : > { %v3909_v7 = vor.u32 %v593_v61, %v592_v3  ;;  %383 = vst [vmem:[#allocation2 + $0x50] sm:$0x1] %v382_v20  ;;  %v1140_v56 = vrot.slane %v565_v31, 1  ;;  %v5185_v15 = vshll.u32 %v3919_v30, 16  ;;  %v387_v20 = vld [vmem:[#allocation2 + $0x60] sm:$0x1] }
  0xa0   : > { %1010 = vrot.lane.b32.xlu0 %v3779_v6, %s3412_s13  ;;  %v606_v14 = vrot.slane %v5184_v35, 7  ;;  %v388_v31 = vsel %vm3680_vm4, 0, %v387_v20  ;;  %vm662_vm6 = vsmask.f32 7938  ;;  %v1142_v0 = vrot.slane %v572_v46, 1  ;;  %s2861_s5 = sshll.u32 %s3466_s19, 11 }
  0xa1   : > { %1012 = vrot.lane.b32.xlu1 %v3791_v21, %s3412_s13  ;;  %389 = vst [vmem:[#allocation2 + $0x60] sm:$0x1] %v388_v31  ;;  %v1141_v59 = vor.u32 %v1140_v56, %v562_v18  ;;  %v5183_v20 = vshll.u32 %v3936_v58, 16  ;;  %vm661_vm7 = vcmask 31744   ;;  %v1267_v6 = vrot.slane %v810_v26, 1  ;;  %v3973_v18 = vld [vmem:[%s3638_s11 + $0x60] sm:$0xff]   ;;  %s4908_s25 = scalar_lea.hbm %s5173_s3, %s2861_s5 }
  0xa2   : > { %v1269_v46 = vrot.slane %v817_v28, 1  ;;  %v852_v31 = vshll.u32 %v3925_v54, 16  ;;  %vm3992_vm8 = vmand %vm661_vm7, %vm662_vm6  ;;  %v5190_v62 = vshrl.u32 %v3973_v18, 16  ;;  %vm1489_vm9 = vcmask 1043456   ;;  %s2536_s10 = sshll.u32 %s4649_s26, 4  ;;  %s2518_s29 = scalar_lea.sflag [#allocation5], %s3631_s24  ;;  %s4916_s10 = int_to_ptr.vmem [resolvable:$true] %s2536_s10 }
  0xa3   : > { %v1268_v52 = vor.u32 %v1267_v6, %v807_v19  ;;  %v621_v6 = vshll.u32 %v3973_v18, 16  ;;  %vm346_vm10 = vcmask 195584   ;;  %vm952_vm11 = vcmask 64544   ;;  %s3298_s0 = scalar_lea.vmem %s4916_s10, 2048  ;;  %s3417_s20 = smov [#allocation9]  }
  0xa4   : > { %1075 = vrot.lane.b32.xlu0 %v3734_v36, %s3411_s21  ;;  %v620_v19 = vrot.slane %v5190_v62, 7  ;;  %v444_v62 = vld [vmem:[#allocation2 + $0x70] sm:$0x80]  ;;  %v1270_v40 = vor.u32 %v1269_v46, %v814_v27  ;;  %v399_v27 = vld [vmem:[#allocation2 + $0x80] sm:$0x1]  ;;  %vm4258_vm12 = vmand %vm952_vm11, %vm662_vm6  ;;  %vm1050_vm13 = vcmask 97344   ;;  %p3299_p3 = scmp.ne.s32.totalorder %s4916_s10, %s3298_s0 }
  0xa5   : > { %1168 = vrot.lane.b32.xlu1 %v1137_v63, %s3414_s8  ;;  %v1266_v63 = vor.u32 %v1265_v33, %v800_v10  ;;  %v5191_v10 = vshrl.u32 %v3891_v55, 16  ;;  %v5193_v33 = vshll.u32 %v3891_v55, 16  ;;  %v450_v46 = vld [vmem:[#allocation2 + $0x80] sm:$0x80]  ;;  %vm1115_vm14 = vcmask 130144   ;;  %s3302_s9 = sshll.u32 %s3417_s20, 4  ;;  %s3303_s9 = int_to_ptr.vmem [resolvable:$false] %s3302_s9 }
  0xa6   : > { %vm1212_vm15 = vcmask 162944   ;;  %vm1213_vm0 = vsmask.f32 7424  ;;  %vm1343_vm1 = vcmask 195744   ;;  %p3300_p7 = pnand %p3299_p3, %p3539_p12  ;;  %p3305_p1 = scmp.lt.s32.totalorder %s4916_s10, %s3303_s9 }
  0xa7   : > { %vm4379_vm2 = vmand %vm1212_vm15, %vm1213_vm0 }
  0xa8   : > { %1077 = vrot.lane.b32.xlu0 %v3740_v39, %s3411_s21  ;;  %v1148_v39 = vrot.slane %v593_v61, 1  ;;  %v5230_v61 = vshll.u32 %v3815_v42, 16  ;;  %vm4385_vm3 = vmand %vm1343_vm1, %vm1213_vm0  ;;  %p3301_p9 = pneg %p3300_p7 }
  0xa9   : > { %1170 = vrot.lane.b32.xlu1 %v1139_v5, %s3414_s8  ;;  %v599_v5 = vrot.slane %v5191_v10, 7 }
  0xac   : > { %1295 = vrot.lane.b32.xlu0 %v1264_v11, %s3415_s28  ;;  %v3929_v11 = vor.u32 %v5193_v33, %v599_v5  ;;  %v5182_v5 = vshrl.u32 %v3936_v58, 16  ;;  %v4040_v33 = vld [vmem:[%s3638_s11 + $0x70] sm:$0xff]  }
  0xad   : > { %1297 = vrot.lane.b32.xlu1 %v1266_v63, %s3415_s28  ;;  %v435_v63 = vld [vmem:[#allocation2 + $0x58] sm:$0x80] }
  0xae   : > { %v436_v3 = vsel %vm3692_vm5, 0, %v435_v63  ;;  %v3960_v63 = vld [vmem:[%s3646_s12 + $0x48] sm:$0xff]  }
  0xaf   : > { %437 = vst [vmem:[#allocation2 + $0x58] sm:$0x80] %v436_v3  ;;  %v5188_v3 = vshrl.u32 %v3925_v54, 16 }
  0xb0   : > { %916 = vrot.lane.b32.xlu0 %v840_v24, %s3413_s7  ;;  %v3950_v24 = vor.u32 %v5185_v15, %v606_v14  ;;  %v613_v14 = vrot.slane %v5182_v5, 7  ;;  %v3988_v5 = vld [vmem:[#allocation8] sm:$0xff]   ;;  %v390_v15 = vld [vmem:[#allocation2 + $0x68] sm:$0x1] }
  0xb1   : > { %918 = vrot.lane.b32.xlu1 %v847_v51, %s3413_s7  ;;  %v439_v51 = vsel %vm3692_vm5, 0, %v438_v22  ;;  %v5194_v22 = vshrl.u32 %v3960_v63, 16  ;;  %v851_v28 = vrot.slane %v5188_v3, 7  ;;  %v391_v21 = vsel %vm3680_vm4, 0, %v390_v15  ;;  %2952 = vmatprep.subr.bf16.mxu0 %v3988_v5 }
  0xb2   : > { %440 = vst [vmem:[#allocation2 + $0x60] sm:$0x80] %v439_v51  ;;  %v3977_v56 = vor.u32 %v5183_v20, %v613_v14  ;;  %v3986_v51 = vld [vmem:[%s3638_s11 + $0x68] sm:$0xff]   ;;  %v1143_v14 = vor.u32 %v1142_v0, %v569_v41  ;;  %v859_v20 = vshll.u32 %v3960_v63, 16  ;;  %v441_v41 = vld [vmem:[#allocation2 + $0x68] sm:$0x80]  ;;  %2953 = vmatpush3.bf16.msra.mxu0 %v3988_v5 }
  0xb3   : > { %v393_v0 = vld [vmem:[#allocation2 + $0x70] sm:$0x1]  ;;  %v5195_v3 = vshrl.u32 %v3986_v51, 16  ;;  %392 = vst [vmem:[#allocation2 + $0x68] sm:$0x1] %v391_v21  ;;  %v442_v13 = vsel %vm3692_vm5, 0, %v441_v41 }
  0xb4   : > { %1014 = vrot.lane.b32.xlu0 %v3823_v49, %s3412_s13  ;;  %v394_v15 = vsel %vm3680_vm4, 0, %v393_v0  ;;  %v858_v21 = vrot.slane %v5194_v22, 7  ;;  %443 = vst [vmem:[#allocation2 + $0x68] sm:$0x80] %v442_v13  ;;  %v628_v10 = vshll.u32 %v3986_v51, 16  ;;  %v4044_v22 = vor.u32 %v621_v6, %v620_v19 }
  0xb5   : > { %1016 = vrot.lane.b32.xlu1 %v3836_v57, %s3412_s13  ;;  %395 = vst [vmem:[#allocation2 + $0x70] sm:$0x1] %v394_v15  ;;  %v627_v0 = vrot.slane %v5195_v3, 7  ;;  %v445_v13 = vsel %vm3692_vm5, 0, %v444_v62  ;;  %v396_v15 = vld [vmem:[#allocation2 + $0x78] sm:$0x1] }
  0xb6   : > { %v4002_v35 = vld [vmem:[#allocation2 + $0x58] sm:$0xff]  ;;  %v4049_v3 = vld [vmem:[%s3638_s11 + $0x78] sm:$0xff]   ;;  %446 = vst [vmem:[#allocation2 + $0x70] sm:$0x80] %v445_v13  ;;  %v397_v16 = vsel %vm3680_vm4, 0, %v396_v15  ;;  %v5197_v19 = vshrl.u32 %v4040_v33, 16  ;;  %v854_v13 = vor.u32 %v852_v31, %v851_v28 }
  0xb7   : > { %v447_v41 = vld [vmem:[#allocation2 + $0x78] sm:$0x80]  ;;  %398 = vst [vmem:[#allocation2 + $0x78] sm:$0x1] %v397_v16  ;;  %v451_v15 = vsel %vm3692_vm5, 0, %v450_v46  ;;  %v5204_v16 = vshll.u32 %v4040_v33, 16 }
  0xb8   : > { %1079 = vrot.lane.b32.xlu0 %v3815_v42, %s3411_s21  ;;  %v448_v62 = vsel %vm3692_vm5, 0, %v447_v41  ;;  %v861_v41 = vor.u32 %v859_v20, %v858_v21  ;;  %452 = vst [vmem:[#allocation2 + $0x80] sm:$0x80] %v451_v15  ;;  %v5198_v12 = vshll.u32 %v4049_v3, 16  ;;  %s3304_s11 = scalar_lea.vmem %s3303_s9, 4096 }
  0xb9   : > { %1172 = vrot.lane.b32.xlu1 %v1141_v59, %s3414_s8  ;;  %v4015_v47 = vld [vmem:[#allocation2 + $0x60] sm:$0xff]  ;;  %449 = vst [vmem:[#allocation2 + $0x78] sm:$0x80] %v448_v62  ;;  %p3306_p5 = scmp.lt.s32.totalorder %s3304_s11, %s3298_s0 }
  0xba   : > { %v3205_v59 = vld [vmem:[#allocation8 + $0xc] sm:$0xff]   ;;  %v3207_v62 = vld [vmem:[#allocation8 + $0x14] ss:$0 sps:$4 sm:$0xff]  }
  0xbb   : > { %2916 = vmatprep.subr.bf16.mxu1 %v3205_v59  ;;  %v4077_v28 = vld [vmem:[#allocation2 + $0x68] sm:$0xff]  ;;  %p3307_p2 = por %p3306_p5, %p3305_p1 }
  0xbc   : > { %1081 = vrot.lane.b32.xlu0 %v3831_v53, %s3411_s21  ;;  %2917 = vmatpush3.bf16.msra.mxu1 %v3205_v59  ;;  %v5196_v59 = vshrl.u32 %v4049_v3, 16 }
  0xbd   : > { %1174 = vrot.lane.b32.xlu1 %v1143_v14, %s3414_s8  ;;  %v4053_v14 = vor.u32 %v628_v10, %v627_v0  ;;  %v400_v0 = vsel %vm3680_vm4, 0, %v399_v27  ;;  %v4083_v27 = vld [vmem:[#allocation8 + $0x8] ss:$0 sps:$4 sm:$0xff]   ;;  %v4097_v15 = vld [vmem:[#allocation2 + $0x70] sm:$0xff]  ;;  %3092 = vmatprep.subr.msk.bf16.mxu1 %vm1489_vm9, %v3207_v62  ;;  %vm2277_vm4 = vcmask 27648   ;;  %p3308_p6 = pnand %p3307_p2, %p3301_p9 }
  0xbe   : > { %401 = vst [vmem:[#allocation2 + $0x80] sm:$0x1] %v400_v0  ;;  %v641_v8 = vrot.slane %v5196_v59, 7  ;;  %v1144_v0 = vrot.slane %v579_v23, 1  ;;  %3093 = vmatprep.subr.msk.bf16.mxu0 %vm1489_vm9, %v4083_v27  ;;  %v1491_v23 = vsel %vm1489_vm9, %v3207_v62, 0  ;;  %v4135_v59 = vld [vmem:[%s3646_s12 + $0x58] sm:$0xff]  }
  0xbf   : > { %v664_v62 = vld [vmem:[#allocation2 + $0x8] sm:$0xff] }
  0xc0   : > { %1299 = vrot.lane.b32.xlu0 %v1268_v52, %s3415_s28  ;;  %v634_v52 = vrot.slane %v5197_v19, 7  ;;  %v4092_v46 = vor.u32 %v5198_v12, %v641_v8  ;;  %2919 = vmatpush3.bf16.msra.mxu1 %v1491_v23  ;;  %v3416_v8 = vmov 0   ;;  %v1145_v23 = vor.u32 %v1144_v0, %v576_v60 }
  0xc1   : > { %1301 = vrot.lane.b32.xlu1 %v1270_v40, %s3415_s28  ;;  %347 = vst.msk [vmem:[#allocation2] sm:$0xff] %vm346_vm10, %v3416_v8  ;;  %349 = vst.msk [vmem:[#allocation2 + $0x88] sm:$0xff] %vm346_vm10, %v3416_v8  ;;  %3024 = vmatprep.subr.bf16.mxu1 %v3988_v5  ;;  %v1146_v8 = vrot.slane %v586_v32, 1  ;;  %v1271_v19 = vrot.slane %v824_v1, 1  ;;  %v1273_v60 = vrot.slane %v831_v17, 1  ;;  %v5203_v32 = vshrl.u32 %v4135_v59, 16 }
  0xc2   : > { %v4081_v40 = vor.u32 %v5204_v16, %v634_v52  ;;  %v4111_v52 = vld [vmem:[#allocation2 + $0x78] sm:$0xff] }
  0xc3   : > { %v1147_v49 = vor.u32 %v1146_v8, %v583_v2  ;;  %v1272_v1 = vor.u32 %v1271_v19, %v821_v45  ;;  %v1274_v17 = vor.u32 %v1273_v60, %v828_v48  ;;  %v872_v2 = vrot.slane %v5203_v32, 7  ;;  %v4176_v48 = vld [vmem:[#allocation8 + $0x18] sm:$0xff]   ;;  %v4181_v19 = vld [vmem:[%s3646_s12 + $0x60] sm:$0xff]  }
  0xc4   : > { %920 = vrot.lane.b32.xlu0 %v854_v13, %s3413_s7  ;;  %v4119_v13 = vld [vmem:[%s3646_s12 + $0x50] sm:$0xff]   ;;  %v873_v8 = vshll.u32 %v4135_v59, 16  ;;  %v5229_v60 = vshll.u32 %v3891_v55, 16 }
  0xc5   : > { %922 = vrot.lane.b32.xlu1 %v861_v41, %s3413_s7  ;;  %v4108_v41 = vsel %vm1489_vm9, %v4083_v27, 0  ;;  %v4125_v21 = vld [vmem:[#allocation2 + $0x80] sm:$0xff]  ;;  %v863_v12 = vshrl.u32 %v4119_v13, 16  ;;  %v866_v57 = vshll.u32 %v4119_v13, 16 }
  0xc6   : > { %2955 = vmatpush3.bf16.msra.mxu0 %v4108_v41  ;;  %v875_v45 = vor.u32 %v873_v8, %v872_v2  ;;  %v5232_v2 = vshll.u32 %v3831_v53, 16 }
  0xc7   : > { %2988 = vmatprep.subr.bf16.mxu0 %v4176_v48 }
  0xc8   : > { %1018 = vrot.lane.b32.xlu0 %v3873_v34, %s3412_s13  ;;  %v1393_v0 = vld [vmem:[#allocation2] sm:$0xff]  ;;  %v5231_v34 = vshrl.u32 %v3891_v55, 16 }
  0xc9   : > { %1020 = vrot.lane.b32.xlu1 %v3891_v55, %s3412_s13  ;;  %2956 = vmatprep.mubr.msk.bf16.mxu0 %vm346_vm10, %v1393_v0  ;;  %v1150_v0 = vrot.slane %v5229_v60, 1  ;;  %v5234_v55 = vshrl.u32 %v3831_v53, 16  ;;  %v5235_v53 = vshll.u32 %v3919_v30, 16 }
  0xcc   : > { %1083 = vrot.lane.b32.xlu0 %v3925_v54, %s3411_s21 }
  0xcd   : > { %1176 = vrot.lane.b32.xlu1 %v1145_v23, %s3414_s8  ;;  %v865_v23 = vrot.slane %v863_v12, 7 }
  0xcf   : > { %v868_v36 = vor.u32 %v866_v57, %v865_v23  ;;  %v1275_v23 = vrot.slane %v5230_v61, 1 }
  0xd0   : > { %1085 = vrot.lane.b32.xlu0 %v3960_v63, %s3411_s21 }
  0xd1   : > { %1178 = vrot.lane.b32.xlu1 %v1147_v49, %s3414_s8  ;;  %v1149_v49 = vor.u32 %v1148_v39, %v590_v25  ;;  %v1151_v25 = vor.u32 %v1150_v0, %v5231_v34  ;;  %v5233_v39 = vshrl.u32 %v3815_v42, 16 }
  0xd3   : > { %v1276_v60 = vor.u32 %v1275_v23, %v5233_v39  ;;  %v5236_v39 = vshrl.u32 %v3919_v30, 16 }
  0xd4   : > { %1303 = vrot.lane.b32.xlu0 %v1272_v1, %s3415_s28  ;;  %v4190_v1 = vld [vmem:[%s3646_s12 + $0x68] sm:$0xff]  }
  0xd5   : > { %1305 = vrot.lane.b32.xlu1 %v1274_v17, %s3415_s28  ;;  %v5200_v17 = vshrl.u32 %v4181_v19, 16 }
  0xd7   : > { %v879_v61 = vrot.slane %v5200_v17, 7 }
  0xd8   : > { %924 = vrot.lane.b32.xlu0 %v868_v36, %s3413_s7  ;;  %v1277_v36 = vrot.slane %v5232_v2, 1  ;;  %v5201_v2 = vshll.u32 %v4190_v1, 16 }
  0xd9   : > { %926 = vrot.lane.b32.xlu1 %v875_v45, %s3413_s7  ;;  %v5199_v45 = vshrl.u32 %v4190_v1, 16 }
  0xda   : > { %v1278_v0 = vor.u32 %v1277_v36, %v5234_v55  ;;  %v4230_v36 = vld [vmem:[%s3646_s12 + $0x70] sm:$0xff]  }
  0xdb   : > { %v886_v34 = vrot.slane %v5199_v45, 7 }
  0xdc   : > { %1022 = vrot.lane.b32.xlu0 %v3919_v30, %s3412_s13  ;;  %v5238_v30 = vshrl.u32 %v3936_v58, 16 }
  0xdd   : > { %1024 = vrot.lane.b32.xlu1 %v3936_v58, %s3412_s13  ;;  %v889_v23 = vor.u32 %v5201_v2, %v886_v34  ;;  %v667_v2 = vld [vmem:[#allocation2 + $0x10] sm:$0xff] }
  0xe0   : > { %1087 = vrot.lane.b32.xlu0 %v4119_v13, %s3411_s21 }
  0xe1   : > { %1180 = vrot.lane.b32.xlu1 %v1149_v49, %s3414_s8  ;;  %v5202_v49 = vshll.u32 %v4181_v19, 16 }
  0xe3   : > { %v882_v42 = vor.u32 %v5202_v49, %v879_v61  ;;  %v5237_v61 = vshll.u32 %v3936_v58, 16  ;;  %v5241_v58 = vshrl.u32 %v3925_v54, 16 }
  0xe4   : > { %1089 = vrot.lane.b32.xlu0 %v4135_v59, %s3411_s21 }
  0xe5   : > { %1182 = vrot.lane.b32.xlu1 %v1151_v25, %s3414_s8  ;;  %v1152_v25 = vrot.slane %v5235_v53, 1  ;;  %v1154_v55 = vrot.slane %v5237_v61, 1  ;;  %v891_v53 = vshrl.u32 %v4230_v36, 16 }
  0xe8   : > { %1307 = vrot.lane.b32.xlu0 %v1276_v60, %s3415_s28  ;;  %v1153_v60 = vor.u32 %v1152_v25, %v5236_v39  ;;  %v1155_v25 = vor.u32 %v1154_v55, %v5238_v30  ;;  %v1281_v39 = vrot.slane %v859_v20, 1  ;;  %v893_v20 = vrot.slane %v891_v53, 7 }
  0xe9   : > { %1309 = vrot.lane.b32.xlu1 %v1278_v0, %s3415_s28  ;;  %v4239_v0 = vld [vmem:[%s3646_s12 + $0x78] sm:$0xff]   ;;  %v894_v30 = vshll.u32 %v4230_v36, 16 }
  0xea   : > { %v898_v61 = vshrl.u32 %v4239_v0, 16  ;;  %v901_v32 = vshll.u32 %v4239_v0, 16 }
  0xec   : > { %928 = vrot.lane.b32.xlu0 %v882_v42, %s3413_s7  ;;  %v900_v49 = vrot.slane %v898_v61, 7 }
  0xed   : > { %930 = vrot.lane.b32.xlu1 %v889_v23, %s3413_s7  ;;  %v1279_v23 = vrot.slane %v852_v31, 1  ;;  %v665_v31 = vsel %vm3992_vm8, %v3736_v37, %v664_v62  ;;  %v5242_v37 = vshrl.u32 %v3960_v63, 16  ;;  %v896_v63 = vor.u32 %v894_v30, %v893_v20 }
  0xef   : > { %v1280_v55 = vor.u32 %v1279_v23, %v5241_v58  ;;  %v1282_v62 = vor.u32 %v1281_v39, %v5242_v37  ;;  %v668_v58 = vsel %vm3992_vm8, %v3749_v44, %v667_v2  ;;  %v673_v39 = vld [vmem:[#allocation2 + $0x20] sm:$0xff] }
  0xf0   : > { %1026 = vrot.lane.b32.xlu0 %v3973_v18, %s3412_s13 }
  0xf1   : > { %1028 = vrot.lane.b32.xlu1 %v3986_v51, %s3412_s13 }
  0xf2   : > { %v1068_v34 = vpop.permute.xlu0 %1067 }
  0xf3   : > { %v1003_v42 = vpop.permute.xlu1 %1002 }
  0xf4   : > { %1091 = vrot.lane.b32.xlu0 %v4181_v19, %s3411_s21 }
  0xf5   : > { %1184 = vrot.lane.b32.xlu1 %v1153_v60, %s3414_s8 }
  0xf6   : > { %v1007_v45 = vpop.permute.xlu0 %1006 }
  0xf7   : > { %v1005_v17 = vpop.permute.xlu1 %1004 }
  0xf8   : > { %1093 = vrot.lane.b32.xlu0 %v4190_v1, %s3411_s21 }
  0xf9   : > { %1186 = vrot.lane.b32.xlu1 %v1155_v25, %s3414_s8  ;;  %v670_v25 = vld [vmem:[#allocation2 + $0x18] sm:$0xff] }
  0xfa   : > { %v905_v16 = vpop.permute.xlu0 %904 }
  0xfb   : > { %v955_v54 = vsel %vm4258_vm12, %v905_v16, %v665_v31  ;;  %v1070_v23 = vpop.permute.xlu1 %1069  ;;  %v903_v16 = vor.u32 %v901_v32, %v900_v49  ;;  %v1156_v49 = vrot.slane %v621_v6, 1 }
  0xfc   : > { %956 = vst [vmem:[#allocation2 + $0x8] sm:$0xff] %v955_v54  ;;  %1311 = vrot.lane.b32.xlu0 %v1280_v55, %s3415_s28  ;;  %v671_v55 = vsel %vm3992_vm8, %v3774_v4, %v670_v25 }
  0xfd   : > { %1051 = vst.msk [vmem:[#allocation2 + $0x8] sm:$0xff] %vm1050_vm13, %v1003_v42  ;;  %1313 = vrot.lane.b32.xlu1 %v1282_v62, %s3415_s28  ;;  %v674_v42 = vsel %vm3992_vm8, %v3781_v9, %v673_v39  ;;  %v5243_v9 = vshrl.u32 %v3973_v18, 16  ;;  %v5244_v18 = vshrl.u32 %v3986_v51, 16  ;;  %v5245_v51 = vshll.u32 %v4040_v33, 16 }
  0xfe   : > { %v907_v31 = vpop.permute.xlu0 %906  ;;  %1116 = vst.msk [vmem:[#allocation2 + $0x8] sm:$0xff] %vm1115_vm14, %v1068_v34 }
  0xff   : > { %v958_v44 = vsel %vm4258_vm12, %v907_v31, %v668_v58  ;;  %v1009_v2 = vpop.permute.xlu1 %1008  ;;  %v1157_v6 = vor.u32 %v1156_v49, %v5243_v9  ;;  %v1160_v31 = vrot.slane %v5245_v51, 1  ;;  %v5251_v9 = vshll.u32 %v4190_v1, 16 }
 0x100   : > { %959 = vst [vmem:[#allocation2 + $0x10] sm:$0xff] %v958_v44  ;;  %932 = vrot.lane.b32.xlu0 %v896_v63, %s3413_s7  ;;  %v679_v63 = vld [vmem:[#allocation2 + $0x30] sm:$0xff]  ;;  %v5246_v44 = vshrl.u32 %v4135_v59, 16  ;;  %v5249_v59 = vshll.u32 %v4181_v19, 16 }
 0x101   : > { %1052 = vst.msk [vmem:[#allocation2 + $0x10] sm:$0xff] %vm1050_vm13, %v1005_v17  ;;  %934 = vrot.lane.b32.xlu1 %v903_v16, %s3413_s7  ;;  %v1158_v17 = vrot.slane %v628_v10, 1  ;;  %v1285_v10 = vrot.slane %v873_v8, 1  ;;  %v680_v8 = vsel %vm3992_vm8, %v3827_v50, %v679_v63  ;;  %v5248_v50 = vshrl.u32 %v4040_v33, 16 }
 0x102   : > { %v909_v34 = vpop.permute.xlu0 %908  ;;  %1117 = vst.msk [vmem:[#allocation2 + $0x10] sm:$0xff] %vm1115_vm14, %v1070_v23  ;;  %v676_v23 = vld [vmem:[#allocation2 + $0x28] sm:$0xff] }
 0x103   : > { %v961_v4 = vsel %vm4258_vm12, %v909_v34, %v671_v55  ;;  %v911_v20 = vpop.permute.xlu1 %910  ;;  %v1159_v58 = vor.u32 %v1158_v17, %v5244_v18  ;;  %v677_v39 = vsel %vm3992_vm8, %v3809_v38, %v676_v23  ;;  %v5247_v38 = vshll.u32 %v4049_v3, 16 }
 0x104   : > { %962 = vst [vmem:[#allocation2 + $0x18] sm:$0xff] %v961_v4  ;;  %v964_v37 = vsel %vm4258_vm12, %v911_v20, %v674_v42  ;;  %1030 = vrot.lane.b32.xlu0 %v4040_v33, %s3412_s13  ;;  %v1161_v34 = vor.u32 %v1160_v31, %v5248_v50  ;;  %v1287_v4 = vrot.slane %v5249_v59, 1  ;;  %v5250_v20 = vshrl.u32 %v4049_v3, 16 }
 0x105   : > { %1053 = vst.msk [vmem:[#allocation2 + $0x18] sm:$0xff] %vm1050_vm13, %v1007_v45  ;;  %965 = vst [vmem:[#allocation2 + $0x20] sm:$0xff] %v964_v37  ;;  %1032 = vrot.lane.b32.xlu1 %v4049_v3, %s3412_s13  ;;  %v1283_v45 = vrot.slane %v866_v57, 1  ;;  %v1162_v55 = vrot.slane %v5247_v38, 1  ;;  %v5252_v33 = vshrl.u32 %v4181_v19, 16  ;;  %v1291_v23 = vrot.slane %v894_v30, 1 }
 0x106   : > { %1054 = vst.msk [vmem:[#allocation2 + $0x20] sm:$0xff] %vm1050_vm13, %v1009_v2  ;;  %v1072_v62 = vpop.permute.xlu0 %1071  ;;  %v1286_v2 = vor.u32 %v1285_v10, %v5246_v44  ;;  %v5253_v3 = vshrl.u32 %v4190_v1, 16 }
 0x107   : > { %1118 = vst.msk [vmem:[#allocation2 + $0x18] sm:$0xff] %vm1115_vm14, %v1072_v62  ;;  %v4315_v54 = vpop.permute.xlu1 %1164  ;;  %v1284_v57 = vor.u32 %v1283_v45, %v863_v12  ;;  %v1163_v37 = vor.u32 %v1162_v55, %v5250_v20  ;;  %v1288_v45 = vor.u32 %v1287_v4, %v5252_v33  ;;  %v1292_v19 = vor.u32 %v1291_v23, %v891_v53  ;;  %v682_v53 = vld [vmem:[#allocation2 + $0x38] sm:$0xff]  ;;  %v691_v4 = vld [vmem:[#allocation2 + $0x50] sm:$0xff] }
 0x108   : > { %1095 = vrot.lane.b32.xlu0 %v4230_v36, %s3411_s21  ;;  %v683_v38 = vsel %vm3992_vm8, %v3862_v29, %v682_v53 }
 0x109   : > { %1188 = vrot.lane.b32.xlu1 %v1157_v6, %s3414_s8  ;;  %v1289_v6 = vrot.slane %v5251_v9, 1 }
 0x10a   : > { %v1074_v25 = vpop.permute.xlu0 %1073 }
 0x10b   : > { %1119 = vst.msk [vmem:[#allocation2 + $0x20] sm:$0xff] %vm1115_vm14, %v1074_v25  ;;  %v1167_v16 = vpop.permute.xlu1 %1166  ;;  %v1290_v18 = vor.u32 %v1289_v6, %v5253_v3  ;;  %v1215_v25 = vld [vmem:[#allocation2 + $0x8] sm:$0xff] }
 0x10c   : > { %1097 = vrot.lane.b32.xlu0 %v4239_v0, %s3411_s21  ;;  %v685_v0 = vld [vmem:[#allocation2 + $0x40] sm:$0xff] }
 0x10d   : > { %1190 = vrot.lane.b32.xlu1 %v1159_v58, %s3414_s8  ;;  %v1293_v58 = vrot.slane %v901_v32, 1  ;;  %v1891_v32 = vld [vmem:[#allocation2 + $0x88] sm:$0xff] }
 0x10e   : > { %v913_v42 = vpop.permute.xlu0 %912  ;;  %v1221_v59 = vld [vmem:[#allocation2 + $0x18] sm:$0xff] }
 0x10f   : > { %v967_v13 = vsel %vm4258_vm12, %v913_v42, %v677_v39  ;;  %v915_v12 = vpop.permute.xlu1 %914  ;;  %v1294_v1 = vor.u32 %v1293_v58, %v898_v61  ;;  %v1216_v61 = vsel %vm4379_vm2, %v4315_v54, %v1215_v25  ;;  %v686_v54 = vsel %vm3992_vm8, %v3880_v43, %v685_v0 }
 0x110   : > { %968 = vst [vmem:[#allocation2 + $0x28] sm:$0xff] %v967_v13  ;;  %v970_v49 = vsel %vm4258_vm12, %v915_v12, %v680_v8  ;;  %1315 = vrot.lane.b32.xlu0 %v1284_v57, %s3415_s28  ;;  %v1218_v57 = vld [vmem:[#allocation2 + $0x10] sm:$0xff] }
 0x111   : > { %971 = vst [vmem:[#allocation2 + $0x30] sm:$0xff] %v970_v49  ;;  %1317 = vrot.lane.b32.xlu1 %v1286_v2, %s3415_s28  ;;  %v1219_v31 = vsel %vm4379_vm2, %v1167_v16, %v1218_v57  ;;  %v3209_v2 = vld [vmem:[#allocation8 + $0x20] ss:$0 sps:$4 sm:$0xff]  }
 0x112   : > { %v1011_v17 = vpop.permute.xlu0 %1010  ;;  %v1954_v43 = vsel %vm1489_vm9, %v3209_v2, 0  ;;  %v1224_v20 = vld [vmem:[#allocation2 + $0x20] sm:$0xff] }
 0x113   : > { %1055 = vst.msk [vmem:[#allocation2 + $0x28] sm:$0xff] %vm1050_vm13, %v1011_v17  ;;  %v1013_v62 = vpop.permute.xlu1 %1012 }
 0x114   : > { %1056 = vst.msk [vmem:[#allocation2 + $0x30] sm:$0xff] %vm1050_vm13, %v1013_v62  ;;  %1192 = vrot.lane.b32.xlu0 %v1161_v34, %s3414_s8  ;;  %v688_v34 = vld [vmem:[#allocation2 + $0x48] sm:$0xff] }
 0x115   : > { %1194 = vrot.lane.b32.xlu1 %v1163_v37, %s3414_s8  ;;  %v689_v62 = vsel %vm3992_vm8, %v3909_v7, %v688_v34  ;;  %v5260_v34 = vsel %vm3992_vm8, %v4044_v22, %v4077_v28 }
 0x116   : > { %v1076_v10 = vpop.permute.xlu0 %1075 }
 0x117   : > { %1120 = vst.msk [vmem:[#allocation2 + $0x28] sm:$0xff] %vm1115_vm14, %v1076_v10  ;;  %v4371_v63 = vpop.permute.xlu1 %1168 }
 0x118   : > { %1319 = vrot.lane.b32.xlu0 %v1288_v45, %s3415_s28  ;;  %v692_v45 = vsel %vm3992_vm8, %v3929_v11, %v691_v4 }
 0x119   : > { %1321 = vrot.lane.b32.xlu1 %v1290_v18, %s3415_s28 }
 0x11a   : > { %v1078_v30 = vpop.permute.xlu0 %1077 }
 0x11b   : > { %1121 = vst.msk [vmem:[#allocation2 + $0x30] sm:$0xff] %vm1115_vm14, %v1078_v30  ;;  %v1171_v39 = vpop.permute.xlu1 %1170 }
 0x11c   : > { %1323 = vrot.lane.b32.xlu0 %v1292_v19, %s3415_s28  ;;  %v1225_v9 = vsel %vm4379_vm2, %v1171_v39, %v1224_v20 }
 0x11d   : > { %1325 = vrot.lane.b32.xlu1 %v1294_v1, %s3415_s28 }
 0x11e   : > { %v1296_v51 = vpop.permute.xlu0 %1295  ;;  %v1227_v30 = vld [vmem:[#allocation2 + $0x28] sm:$0xff] }
 0x11f   : > { %v1346_v8 = vsel %vm4385_vm3, %v1296_v51, %v1216_v61  ;;  %v1298_v44 = vpop.permute.xlu1 %1297 }
 0x120   : > { %1347 = vst [vmem:[#allocation2 + $0x8] sm:$0xff] %v1346_v8  ;;  %v4402_v55 = vsel %vm4385_vm3, %v1298_v44, %v1219_v31  ;;  %2920 = vmatprep.mubr.msk.bf16.mxu1 %vm346_vm10, %v1346_v8  ;;  %2957 = vmatmul.mubr.msk.bf16.vlgmr.msra.gmra.mrb[0].mxu0 %vm346_vm10, %v1346_v8  ;;  %v5258_v8 = vsel %vm3992_vm8, %v3950_v24, %v4002_v35 }
 0x121   : > { %1350 = vst [vmem:[#allocation2 + $0x10] sm:$0xff] %v4402_v55  ;;  %2921 = vmatmul.mubr.msk.bf16.vlgmr.msra.gmra.mrb[0].mxu1 %vm346_vm10, %v4402_v55  ;;  %2960 = vmatprep.mubr.msk.bf16.mxu0 %vm346_vm10, %v4402_v55 }
 0x122   : > { %v917_v29 = vpop.permute.xlu0 %916  ;;  %3026 = vmatpush3.bf16.msra.mxu1 %v3988_v5  ;;  %2989 = vmatpush3.bf16.msra.mxu0 %v4176_v48  ;;  %v1230_v39 = vld [vmem:[#allocation2 + $0x30] sm:$0xff] }
 0x123   : > { %v973_v16 = vsel %vm4258_vm12, %v917_v29, %v683_v38  ;;  %v919_v42 = vpop.permute.xlu1 %918  ;;  %3095 = vmatprep.subr.msk.bf16.mxu0 %vm1489_vm9, %v3209_v2  ;;  %3094 = vmatprep.subr.msk.bf16.mxu1 %vm1489_vm9, %v4083_v27  ;;  %v5259_v38 = vsel %vm3992_vm8, %v3977_v56, %v4015_v47 }
 0x124   : > { %974 = vst [vmem:[#allocation2 + $0x38] sm:$0xff] %v973_v16  ;;  %v976_v13 = vsel %vm4258_vm12, %v919_v42, %v686_v54 }
 0x125   : > { %977 = vst [vmem:[#allocation2 + $0x40] sm:$0xff] %v976_v13 }
 0x126   : > { %v1015_v12 = vpop.permute.xlu0 %1014  ;;  %2991 = vmatpush3.bf16.msra.mxu0 %v1954_v43  ;;  %3027 = vmatpush3.bf16.msra.mxu1 %v4108_v41  ;;  %v1222_v41 = vsel %vm4379_vm2, %v4371_v63, %v1221_v59 }
 0x127   : > { %1057 = vst.msk [vmem:[#allocation2 + $0x38] sm:$0xff] %vm1050_vm13, %v1015_v12  ;;  %v1017_v5 = vpop.permute.xlu1 %1016 }
 0x128   : > { %1058 = vst.msk [vmem:[#allocation2 + $0x40] sm:$0xff] %vm1050_vm13, %v1017_v5 }
 0x12a   : > { %v1080_v48 = vpop.permute.xlu0 %1079 }
 0x12b   : > { %1122 = vst.msk [vmem:[#allocation2 + $0x38] sm:$0xff] %vm1115_vm14, %v1080_v48  ;;  %v1173_v49 = vpop.permute.xlu1 %1172 }
 0x12c   : > { %v1228_v25 = vsel %vm4379_vm2, %v1173_v49, %v1227_v30 }
 0x12e   : > { %v1082_v50 = vpop.permute.xlu0 %1081 }
 0x12f   : > { %1123 = vst.msk [vmem:[#allocation2 + $0x40] sm:$0xff] %vm1115_vm14, %v1082_v50  ;;  %v1175_v27 = vpop.permute.xlu1 %1174 }
 0x130   : > { %v1231_v53 = vsel %vm4379_vm2, %v1175_v27, %v1230_v39 }
 0x132   : > { %v1300_v37 = vpop.permute.xlu0 %1299  ;;  %v1233_v13 = vld [vmem:[#allocation2 + $0x38] sm:$0xff] }
 0x133   : > { %v4436_v6 = vsel %vm4385_vm3, %v1300_v37, %v1222_v41  ;;  %v1302_v17 = vpop.permute.xlu1 %1301  ;;  %v5261_v41 = vsel %vm3992_vm8, %v4053_v14, %v4097_v15 }
 0x134   : > { %1353 = vst [vmem:[#allocation2 + $0x18] sm:$0xff] %v4436_v6  ;;  %v4444_v33 = vsel %vm4385_vm3, %v1302_v17, %v1225_v9  ;;  %2924 = vmatprep.mubr.msk.bf16.mxu1 %vm346_vm10, %v4436_v6  ;;  %2961 = vmatmul.mubr.msk.bf16.gmra.mrb[4].mxu0 %vm346_vm10, %v4436_v6 }
 0x135   : > { %1356 = vst [vmem:[#allocation2 + $0x20] sm:$0xff] %v4444_v33  ;;  %2925 = vmatmul.mubr.msk.bf16.gmra.mrb[4].mxu1 %vm346_vm10, %v4444_v33  ;;  %2964 = vmatprep.mubr.msk.bf16.mxu0 %vm346_vm10, %v4444_v33 }
 0x136   : > { %v921_v7 = vpop.permute.xlu0 %920  ;;  %v1236_v56 = vld [vmem:[#allocation2 + $0x40] sm:$0xff] }
 0x137   : > { %v979_v23 = vsel %vm4258_vm12, %v921_v7, %v689_v62  ;;  %v923_v3 = vpop.permute.xlu1 %922 }
 0x138   : > { %980 = vst [vmem:[#allocation2 + $0x48] sm:$0xff] %v979_v23  ;;  %v982_v18 = vsel %vm4258_vm12, %v923_v3, %v692_v45 }
 0x139   : > { %983 = vst [vmem:[#allocation2 + $0x50] sm:$0xff] %v982_v18  ;;  %v5262_v18 = vsel %vm3992_vm8, %v4081_v40, %v4111_v52 }
 0x13a   : > { %v1019_v58 = vpop.permute.xlu0 %1018 }
 0x13b   : > { %1059 = vst.msk [vmem:[#allocation2 + $0x48] sm:$0xff] %vm1050_vm13, %v1019_v58  ;;  %v1021_v11 = vpop.permute.xlu1 %1020 }
 0x13c   : > { %1060 = vst.msk [vmem:[#allocation2 + $0x50] sm:$0xff] %vm1050_vm13, %v1021_v11 }
 0x13e   : > { %v1084_v10 = vpop.permute.xlu0 %1083 }
 0x13f   : > { %1124 = vst.msk [vmem:[#allocation2 + $0x48] sm:$0xff] %vm1115_vm14, %v1084_v10  ;;  %v1177_v63 = vpop.permute.xlu1 %1176  ;;  %v5263_v10 = vsel %vm3992_vm8, %v4092_v46, %v4125_v21 }
 0x140   : > { %v1234_v47 = vsel %vm4379_vm2, %v1177_v63, %v1233_v13 }
 0x142   : > { %v1086_v19 = vpop.permute.xlu0 %1085 }
 0x143   : > { %1125 = vst.msk [vmem:[#allocation2 + $0x50] sm:$0xff] %vm1115_vm14, %v1086_v19  ;;  %v1179_v1 = vpop.permute.xlu1 %1178 }
 0x144   : > { %v1237_v5 = vsel %vm4379_vm2, %v1179_v1, %v1236_v56 }
 0x146   : > { %v1304_v57 = vpop.permute.xlu0 %1303  ;;  %v1239_v9 = vld [vmem:[#allocation2 + $0x48] sm:$0xff] }
 0x147   : > { %v1358_v0 = vsel %vm4385_vm3, %v1304_v57, %v1228_v25  ;;  %v1306_v61 = vpop.permute.xlu1 %1305 }
 0x148   : > { %1359 = vst [vmem:[#allocation2 + $0x28] sm:$0xff] %v1358_v0  ;;  %v1361_v51 = vsel %vm4385_vm3, %v1306_v61, %v1231_v53  ;;  %2928 = vmatprep.mubr.msk.bf16.mxu1 %vm346_vm10, %v1358_v0  ;;  %2965 = vmatmul.mubr.msk.bf16.gmra.mrb[8].mxu0 %vm346_vm10, %v1358_v0 }
 0x149   : > { %1362 = vst [vmem:[#allocation2 + $0x30] sm:$0xff] %v1361_v51  ;;  %2929 = vmatmul.mubr.msk.bf16.gmra.mrb[8].mxu1 %vm346_vm10, %v1361_v51  ;;  %2968 = vmatprep.mubr.msk.bf16.mxu0 %vm346_vm10, %v1361_v51 }
 0x14a   : > { %v925_v31 = vpop.permute.xlu0 %924 }
 0x14b   : > { %v985_v44 = vsel %vm4258_vm12, %v925_v31, %v5258_v8  ;;  %v927_v2 = vpop.permute.xlu1 %926 }
 0x14c   : > { %986 = vst [vmem:[#allocation2 + $0x58] sm:$0xff] %v985_v44  ;;  %v988_v54 = vsel %vm4258_vm12, %v927_v2, %v5259_v38 }
 0x14d   : > { %989 = vst [vmem:[#allocation2 + $0x60] sm:$0xff] %v988_v54 }
 0x14e   : > { %v1023_v29 = vpop.permute.xlu0 %1022 }
 0x14f   : > { %1061 = vst.msk [vmem:[#allocation2 + $0x58] sm:$0xff] %vm1050_vm13, %v1023_v29  ;;  %v1025_v16 = vpop.permute.xlu1 %1024 }
 0x150   : > { %1062 = vst.msk [vmem:[#allocation2 + $0x60] sm:$0xff] %vm1050_vm13, %v1025_v16 }
 0x152   : > { %v1088_v35 = vpop.permute.xlu0 %1087 }
 0x153   : > { %1126 = vst.msk [vmem:[#allocation2 + $0x58] sm:$0xff] %vm1115_vm14, %v1088_v35  ;;  %v1181_v24 = vpop.permute.xlu1 %1180 }
 0x154   : > { %v1240_v17 = vsel %vm4379_vm2, %v1181_v24, %v1239_v9 }
 0x156   : > { %v1090_v42 = vpop.permute.xlu0 %1089 }
 0x157   : > { %1127 = vst.msk [vmem:[#allocation2 + $0x60] sm:$0xff] %vm1115_vm14, %v1090_v42  ;;  %v1183_v43 = vpop.permute.xlu1 %1182 }
 0x15a   : > { %v1308_v12 = vpop.permute.xlu0 %1307  ;;  %v1245_v60 = vld [vmem:[#allocation2 + $0x58] sm:$0xff] }
 0x15b   : > { %v1364_v48 = vsel %vm4385_vm3, %v1308_v12, %v1234_v47  ;;  %v1310_v49 = vpop.permute.xlu1 %1309 }
 0x15c   : > { %1365 = vst [vmem:[#allocation2 + $0x38] sm:$0xff] %v1364_v48  ;;  %v4504_v50 = vsel %vm4385_vm3, %v1310_v49, %v1237_v5  ;;  %2932 = vmatprep.mubr.msk.bf16.mxu1 %vm346_vm10, %v1364_v48  ;;  %2969 = vmatmul.mubr.msk.bf16.gmra.mrb[12].mxu0 %vm346_vm10, %v1364_v48 }
 0x15d   : > { %1368 = vst [vmem:[#allocation2 + $0x40] sm:$0xff] %v4504_v50  ;;  %2933 = vmatmul.mubr.msk.bf16.gmra.mrb[12].mxu1 %vm346_vm10, %v4504_v50  ;;  %2992 = vmatprep.mubr.msk.bf16.mxu0 %vm346_vm10, %v4402_v55 }
 0x15e   : > { %v929_v27 = vpop.permute.xlu0 %928  ;;  %v1248_v30 = vld [vmem:[#allocation2 + $0x60] sm:$0xff] }
 0x15f   : > { %v991_v59 = vsel %vm4258_vm12, %v929_v27, %v5260_v34  ;;  %v931_v4 = vpop.permute.xlu1 %930 }
 0x160   : > { %992 = vst [vmem:[#allocation2 + $0x68] sm:$0xff] %v991_v59  ;;  %v994_v20 = vsel %vm4258_vm12, %v931_v4, %v5261_v41 }
 0x161   : > { %995 = vst [vmem:[#allocation2 + $0x70] sm:$0xff] %v994_v20 }
 0x162   : > { %v1027_v55 = vpop.permute.xlu0 %1026 }
 0x163   : > { %1063 = vst.msk [vmem:[#allocation2 + $0x68] sm:$0xff] %vm1050_vm13, %v1027_v55  ;;  %v1029_v37 = vpop.permute.xlu1 %1028 }
 0x164   : > { %1064 = vst.msk [vmem:[#allocation2 + $0x70] sm:$0xff] %vm1050_vm13, %v1029_v37  ;;  %2993 = vmatmul.mubr.msk.bf16.vlgmr.msra.gmra.mrb[0].mxu0 %vm346_vm10, %v4436_v6  ;;  %v1242_v6 = vld [vmem:[#allocation2 + $0x50] sm:$0xff] }
 0x165   : > { %2996 = vmatprep.mubr.msk.bf16.mxu0 %vm346_vm10, %v4444_v33  ;;  %v1243_v33 = vsel %vm4379_vm2, %v1183_v43, %v1242_v6 }
 0x166   : > { %v1092_v22 = vpop.permute.xlu0 %1091 }
 0x167   : > { %1128 = vst.msk [vmem:[#allocation2 + $0x68] sm:$0xff] %vm1115_vm14, %v1092_v22  ;;  %v1185_v14 = vpop.permute.xlu1 %1184 }
 0x168   : > { %v1246_v1 = vsel %vm4379_vm2, %v1185_v14, %v1245_v60 }
 0x16a   : > { %v1094_v28 = vpop.permute.xlu0 %1093 }
 0x16b   : > { %1129 = vst.msk [vmem:[#allocation2 + $0x70] sm:$0xff] %vm1115_vm14, %v1094_v28  ;;  %v1187_v15 = vpop.permute.xlu1 %1186 }
 0x16c   : > { %2997 = vmatmul.mubr.msk.bf16.gmra.mrb[4].mxu0 %vm346_vm10, %v1358_v0  ;;  %v1249_v39 = vsel %vm4379_vm2, %v1187_v15, %v1248_v30 }
 0x16d   : > { %3000 = vmatprep.mubr.msk.bf16.mxu0 %vm346_vm10, %v1361_v51 }
 0x16e   : > { %v1312_v62 = vpop.permute.xlu0 %1311  ;;  %v1251_v31 = vld [vmem:[#allocation2 + $0x68] sm:$0xff] }
 0x16f   : > { %v4543_v45 = vsel %vm4385_vm3, %v1312_v62, %v1240_v17  ;;  %v1314_v7 = vpop.permute.xlu1 %1313 }
 0x170   : > { %1371 = vst [vmem:[#allocation2 + $0x48] sm:$0xff] %v4543_v45  ;;  %v4548_v23 = vsel %vm4385_vm3, %v1314_v7, %v1243_v33  ;;  %2936 = vmatprep.mubr.msk.bf16.mxu1 %vm346_vm10, %v4543_v45 }
 0x171   : > { %1374 = vst [vmem:[#allocation2 + $0x50] sm:$0xff] %v4548_v23  ;;  %2937 = vmatmul.mubr.msk.bf16.gmra.mrb[16].mxu1 %vm346_vm10, %v4548_v23 }
 0x172   : > { %v933_v3 = vpop.permute.xlu0 %932  ;;  %v1254_v44 = vld [vmem:[#allocation2 + $0x70] sm:$0xff] }
 0x173   : > { %v997_v58 = vsel %vm4258_vm12, %v933_v3, %v5262_v18  ;;  %v935_v11 = vpop.permute.xlu1 %934 }
 0x174   : > { %998 = vst [vmem:[#allocation2 + $0x78] sm:$0xff] %v997_v58  ;;  %v1000_v63 = vsel %vm4258_vm12, %v935_v11, %v5263_v10  ;;  %3001 = vmatmul.mubr.msk.bf16.gmra.mrb[8].mxu0 %vm346_vm10, %v1364_v48 }
 0x175   : > { %1001 = vst [vmem:[#allocation2 + $0x80] sm:$0xff] %v1000_v63  ;;  %3004 = vmatprep.mubr.msk.bf16.mxu0 %vm346_vm10, %v4504_v50 }
 0x176   : > { %v1031_v40 = vpop.permute.xlu0 %1030 }
 0x177   : > { %1065 = vst.msk [vmem:[#allocation2 + $0x78] sm:$0xff] %vm1050_vm13, %v1031_v40  ;;  %v1033_v52 = vpop.permute.xlu1 %1032 }
 0x178   : > { %1066 = vst.msk [vmem:[#allocation2 + $0x80] sm:$0xff] %vm1050_vm13, %v1033_v52 }
 0x17a   : > { %v1096_v19 = vpop.permute.xlu0 %1095 }
 0x17b   : > { %1130 = vst.msk [vmem:[#allocation2 + $0x78] sm:$0xff] %vm1115_vm14, %v1096_v19  ;;  %v1189_v26 = vpop.permute.xlu1 %1188 }
 0x17c   : > { %3005 = vmatmul.mubr.msk.bf16.gmra.mrb[12].mxu0 %vm346_vm10, %v4543_v45  ;;  %v1252_v8 = vsel %vm4379_vm2, %v1189_v26, %v1251_v31 }
 0x17d   : > { %3008 = vmatprep.mubr.msk.bf16.mxu0 %vm346_vm10, %v4548_v23 }
 0x17e   : > { %v1098_v21 = vpop.permute.xlu0 %1097 }
 0x17f   : > { %1131 = vst.msk [vmem:[#allocation2 + $0x80] sm:$0xff] %vm1115_vm14, %v1098_v21  ;;  %v1191_v46 = vpop.permute.xlu1 %1190 }
 0x180   : > { %v1255_v38 = vsel %vm4379_vm2, %v1191_v46, %v1254_v44 }
 0x182   : > { %v1316_v25 = vpop.permute.xlu0 %1315  ;;  %v1257_v24 = vld [vmem:[#allocation2 + $0x78] sm:$0xff] }
 0x183   : > { %v1376_v57 = vsel %vm4385_vm3, %v1316_v25, %v1246_v1  ;;  %v1318_v53 = vpop.permute.xlu1 %1317 }
 0x184   : > { %1377 = vst [vmem:[#allocation2 + $0x58] sm:$0xff] %v1376_v57  ;;  %v1379_v0 = vsel %vm4385_vm3, %v1318_v53, %v1249_v39  ;;  %2940 = vmatprep.mubr.msk.bf16.mxu1 %vm346_vm10, %v1376_v57  ;;  %3009 = vmatmul.mubr.msk.bf16.gmra.mrb[16].mxu0 %vm346_vm10, %v1376_v57 }
 0x185   : > { %1380 = vst [vmem:[#allocation2 + $0x60] sm:$0xff] %v1379_v0  ;;  %2941 = vmatmul.mubr.msk.bf16.gmra.mrb[20].mxu1 %vm346_vm10, %v1379_v0  ;;  %3012 = vmatprep.mubr.msk.bf16.mxu0 %vm346_vm10, %v1379_v0 }
 0x186   : > { %v1193_v61 = vpop.permute.xlu0 %1192  ;;  %v1260_v16 = vld [vmem:[#allocation2 + $0x80] sm:$0xff] }
 0x187   : > { %v1195_v51 = vpop.permute.xlu1 %1194  ;;  %v1258_v42 = vsel %vm4379_vm2, %v1193_v61, %v1257_v24 }
 0x188   : > { %v1261_v13 = vsel %vm4379_vm2, %v1195_v51, %v1260_v16 }
 0x18a   : > { %v1320_v2 = vpop.permute.xlu0 %1319 }
 0x18b   : > { %v1382_v54 = vsel %vm4385_vm3, %v1320_v2, %v1252_v8  ;;  %v1322_v29 = vpop.permute.xlu1 %1321 }
 0x18c   : > { %1383 = vst [vmem:[#allocation2 + $0x68] sm:$0xff] %v1382_v54  ;;  %v1385_v35 = vsel %vm4385_vm3, %v1322_v29, %v1255_v38  ;;  %2944 = vmatprep.mubr.msk.bf16.mxu1 %vm346_vm10, %v1382_v54  ;;  %3013 = vmatmul.mubr.msk.bf16.gmra.mrb[20].mxu0 %vm346_vm10, %v1382_v54 }
 0x18d   : > { %1386 = vst [vmem:[#allocation2 + $0x70] sm:$0xff] %v1385_v35  ;;  %2945 = vmatmul.mubr.msk.bf16.gmra.mrb[24].mxu1 %vm346_vm10, %v1385_v35  ;;  %3016 = vmatprep.mubr.msk.bf16.mxu0 %vm346_vm10, %v1385_v35 }
 0x18e   : > { %v1324_v43 = vpop.permute.xlu0 %1323 }
 0x18f   : > { %v1388_v47 = vsel %vm4385_vm3, %v1324_v43, %v1258_v42  ;;  %v1326_v56 = vpop.permute.xlu1 %1325 }
 0x190   : > { %1389 = vst [vmem:[#allocation2 + $0x78] sm:$0xff] %v1388_v47  ;;  %v1391_v12 = vsel %vm4385_vm3, %v1326_v56, %v1261_v13  ;;  %2948 = vmatprep.mubr.msk.bf16.mxu1 %vm346_vm10, %v1388_v47 }
 0x191   : > { %1392 = vst [vmem:[#allocation2 + $0x80] sm:$0xff] %v1391_v12 }
 0x194   : > { %3017 = vmatmul.mubr.msk.bf16.gmra.mrb[24].mxu0 %vm346_vm10, %v1388_v47 }
 0x195   : > { %2949 = vmatmul.mubr.msk.bf16.gmra.mrb[28].mxu1 %vm346_vm10, %v1391_v12  ;;  %3020 = vmatprep.mubr.msk.bf16.mxu0 %vm346_vm10, %v1391_v12 }
 0x196   : > { %2972 = vmatprep.mubr.msk.bf16.mxu1 %vm346_vm10, %v4504_v50 }
 0x19c   : > { %3021 = vmatmul.mubr.msk.bf16.gmra.mrb[28].mxu0 %vm346_vm10, %v1891_v32 }
 0x19d   : > { %2973 = vmatmul.mubr.msk.bf16.vlgmr.msra.gmra.mrb[16].mxu1 %vm346_vm10, %v4543_v45 }
 0x19e   : > { %2976 = vmatprep.mubr.msk.bf16.mxu1 %vm346_vm10, %v4548_v23 }
 0x1a5   : > { %2977 = vmatmul.mubr.msk.bf16.gmra.mrb[20].mxu1 %vm346_vm10, %v1376_v57 }
 0x1a6   : > { %2980 = vmatprep.mubr.msk.bf16.mxu1 %vm346_vm10, %v1379_v0 }
 0x1ad   : > { %2981 = vmatmul.mubr.msk.bf16.gmra.mrb[24].mxu1 %vm346_vm10, %v1382_v54 }
 0x1ae   : > { %2984 = vmatprep.mubr.msk.bf16.mxu1 %vm346_vm10, %v1385_v35 }
 0x1b5   : > { %2985 = vmatmul.mubr.msk.bf16.gmra.mrb[28].mxu1 %vm346_vm10, %v1388_v47 }
 0x1f4   : > { %v2922_v36 = vpop.f32.mrb[0].mxu1 }
 0x1f5   : > { %v1527_v5 = vpop.f32.mrb[1].mxu1 }
 0x1f6   : > { %v2923_v48 = vpop.f32.mrb[2].mxu1 }
 0x1f7   : > { %v1530_v49 = vpop.f32.mrb[3].mxu1 }
 0x208   : > { %v2926_v50 = vpop.f32.mrb[4].mxu1 }
 0x209   : > { %v1543_v27 = vpop.f32.mrb[5].mxu1 }
 0x20a   : > { %v2927_v34 = vpop.f32.mrb[6].mxu1 }
 0x20b   : > { %v1546_v59 = vpop.f32.mrb[7].mxu1 }
 0x21c   : > { %v2930_v4 = vpop.f32.mrb[8].mxu1 }
 0x21d   : > { %v1559_v41 = vpop.f32.mrb[9].mxu1 }
 0x21e   : > { %v2931_v20 = vpop.f32.mrb[10].mxu1 }
 0x21f   : > { %v1562_v55 = vpop.f32.mrb[11].mxu1 }
 0x230   : > { %v4628_v37 = vpop.f32.mrb[12].mxu1 }
 0x231   : > { %v4630_v22 = vpop.f32.mrb[13].mxu1 }
 0x232   : > { %v4632_v14 = vpop.f32.mrb[14].mxu1 }
 0x233   : > { %v4634_v28 = vpop.f32.mrb[15].mxu1 }
 0x237   : > { %v2994_v15 = vpop.f32.mrb[0].mxu0 }
 0x238   : > { %v4636_v9 = vadd.f32 %v2994_v15, %v2922_v36  ;;  %v1990_v17 = vpop.f32.mrb[1].mxu0 }
 0x239   : > { %v4638_v6 = vadd.f32 %v1990_v17, %v1527_v5  ;;  %v2995_v62 = vpop.f32.mrb[2].mxu0 }
 0x23a   : > { %v2831_v33 = vpack.c.bf16 %v4636_v9, %v4636_v9  ;;  %v4642_v45 = vadd.f32 %v2995_v62, %v2923_v48  ;;  %v1993_v7 = vpop.f32.mrb[3].mxu0  ;;  %v2314_v40 = vsel %vm661_vm7, %v4636_v9, 0.0 }
 0x23b   : > { %v2829_v23 = vpack.c.bf16 %v4638_v6, %v4638_v6  ;;  %v4646_v3 = vadd.f32 %v1993_v7, %v1530_v49  ;;  %v2311_v58 = vsel %vm661_vm7, %v4638_v6, 0.0 }
 0x23c   : > { %2280 = vst.msk [vmem:[%s4649_s26 + $0x8] sm:$0xf] %vm2277_vm4, %v2831_v33  ;;  %v2832_v18 = vpack.c.bf16 %v4642_v45, %v4642_v45  ;;  %v2316_v1 = vsel %vm661_vm7, %v4642_v45, 0.0 }
 0x23d   : > { %2278 = vst.msk [vmem:[%s4649_s26] sm:$0xf] %vm2277_vm4, %v2829_v23  ;;  %v2830_v11 = vpack.c.bf16 %v4646_v3, %v4646_v3  ;;  %v2312_v10 = vsel %vm661_vm7, %v4646_v3, 0.0 }
 0x23e   : > { %2281 = vst.msk [vmem:[%s4649_s26 + $0xc] sm:$0xf] %vm2277_vm4, %v2832_v18  ;;  %v2313_v63 = vadd.f32 %v2312_v10, %v2311_v58 }
 0x23f   : > { %2279 = vst.msk [vmem:[%s4649_s26 + $0x4] sm:$0xf] %vm2277_vm4, %v2830_v11  ;;  %v2998_v52 = vpop.f32.mrb[4].mxu0 }
 0x240   : > { %v2315_v19 = vadd.f32 %v2314_v40, %v2313_v63  ;;  %v4669_v26 = vadd.f32 %v2998_v52, %v2926_v50  ;;  %v2006_v21 = vpop.f32.mrb[5].mxu0 }
 0x241   : > { %v4671_v46 = vadd.f32 %v2006_v21, %v1543_v27  ;;  %v2999_v60 = vpop.f32.mrb[6].mxu0 }
 0x242   : > { %v2835_v30 = vpack.c.bf16 %v4669_v26, %v4669_v26  ;;  %v4677_v25 = vadd.f32 %v2999_v60, %v2927_v34  ;;  %v2009_v39 = vpop.f32.mrb[7].mxu0  ;;  %v2317_v53 = vadd.f32 %v2316_v1, %v2315_v19  ;;  %v2322_v32 = vsel %vm661_vm7, %v4669_v26, 0.0 }
 0x243   : > { %v2833_v57 = vpack.c.bf16 %v4671_v46, %v4671_v46  ;;  %v4681_v0 = vadd.f32 %v2009_v39, %v1546_v59  ;;  %v2318_v61 = vsel %vm661_vm7, %v4671_v46, 0.0 }
 0x244   : > { %2284 = vst.msk [vmem:[%s4649_s26 + $0x18] sm:$0xf] %vm2277_vm4, %v2835_v30  ;;  %v2836_v51 = vpack.c.bf16 %v4677_v25, %v4677_v25  ;;  %v2319_v8 = vadd.f32 %v2318_v61, %v2317_v53  ;;  %v2324_v34 = vsel %vm661_vm7, %v4677_v25, 0.0 }
 0x245   : > { %2282 = vst.msk [vmem:[%s4649_s26 + $0x10] sm:$0xf] %vm2277_vm4, %v2833_v57  ;;  %v2834_v31 = vpack.c.bf16 %v4681_v0, %v4681_v0  ;;  %v2320_v2 = vsel %vm661_vm7, %v4681_v0, 0.0 }
 0x246   : > { %2285 = vst.msk [vmem:[%s4649_s26 + $0x1c] sm:$0xf] %vm2277_vm4, %v2836_v51  ;;  %v2321_v43 = vadd.f32 %v2320_v2, %v2319_v8 }
 0x247   : > { %2283 = vst.msk [vmem:[%s4649_s26 + $0x14] sm:$0xf] %vm2277_vm4, %v2834_v31  ;;  %v3002_v44 = vpop.f32.mrb[8].mxu0 }
 0x248   : > { %v4699_v38 = vadd.f32 %v3002_v44, %v2930_v4  ;;  %v2022_v54 = vpop.f32.mrb[9].mxu0  ;;  %v2323_v36 = vadd.f32 %v2322_v32, %v2321_v43 }
 0x249   : > { %v4701_v29 = vadd.f32 %v2022_v54, %v1559_v41  ;;  %v3003_v16 = vpop.f32.mrb[10].mxu0 }
 0x24a   : > { %v2839_v35 = vpack.c.bf16 %v4699_v38, %v4699_v38  ;;  %v4705_v24 = vadd.f32 %v3003_v16, %v2931_v20  ;;  %v2025_v42 = vpop.f32.mrb[11].mxu0  ;;  %v2325_v20 = vadd.f32 %v2324_v34, %v2323_v36  ;;  %v2330_v58 = vsel %vm661_vm7, %v4699_v38, 0.0 }
 0x24b   : > { %v2837_v13 = vpack.c.bf16 %v4701_v29, %v4701_v29  ;;  %v4709_v47 = vadd.f32 %v2025_v42, %v1562_v55 }
 0x24c   : > { %2288 = vst.msk [vmem:[%s4649_s26 + $0x28] sm:$0xf] %vm2277_vm4, %v2839_v35  ;;  %v2840_v56 = vpack.c.bf16 %v4705_v24, %v4705_v24  ;;  %v2332_v52 = vsel %vm661_vm7, %v4705_v24, 0.0 }
 0x24d   : > { %2286 = vst.msk [vmem:[%s4649_s26 + $0x20] sm:$0xf] %vm2277_vm4, %v2837_v13  ;;  %v2838_v12 = vpack.c.bf16 %v4709_v47, %v4709_v47  ;;  %v2328_v62 = vsel %vm661_vm7, %v4709_v47, 0.0 }
 0x24e   : > { %2289 = vst.msk [vmem:[%s4649_s26 + $0x2c] sm:$0xf] %vm2277_vm4, %v2840_v56 }
 0x24f   : > { %2287 = vst.msk [vmem:[%s4649_s26 + $0x24] sm:$0xf] %vm2277_vm4, %v2838_v12  ;;  %v3006_v5 = vpop.f32.mrb[12].mxu0 }
 0x250   : > { %v4726_v48 = vadd.f32 %v3006_v5, %v4628_v37  ;;  %v2038_v49 = vpop.f32.mrb[13].mxu0 }
 0x251   : > { %v4729_v50 = vadd.f32 %v2038_v49, %v4630_v22  ;;  %v3007_v27 = vpop.f32.mrb[14].mxu0  ;;  %v2326_v22 = vsel %vm661_vm7, %v4701_v29, 0.0 }
 0x252   : > { %v2843_v59 = vpack.c.bf16 %v4726_v48, %v4726_v48  ;;  %v4736_v4 = vadd.f32 %v3007_v27, %v4632_v14  ;;  %v2041_v41 = vpop.f32.mrb[15].mxu0  ;;  %v2327_v17 = vadd.f32 %v2326_v22, %v2325_v20  ;;  %v2338_v31 = vsel %vm661_vm7, %v4726_v48, 0.0 }
 0x253   : > { %v2841_v55 = vpack.c.bf16 %v4729_v50, %v4729_v50  ;;  %v4741_v37 = vadd.f32 %v2041_v41, %v4634_v28  ;;  %v2334_v60 = vsel %vm661_vm7, %v4729_v50, 0.0 }
 0x254   : > { %2292 = vst.msk [vmem:[%s4649_s26 + $0x38] sm:$0xf] %vm2277_vm4, %v2843_v59  ;;  %v2844_v15 = vpack.c.bf16 %v4736_v4, %v4736_v4  ;;  %v2329_v18 = vadd.f32 %v2328_v62, %v2327_v17  ;;  %v2340_v43 = vsel %vm661_vm7, %v4736_v4, 0.0 }
 0x255   : > { %2290 = vst.msk [vmem:[%s4649_s26 + $0x30] sm:$0xf] %vm2277_vm4, %v2841_v55  ;;  %v2842_v14 = vpack.c.bf16 %v4741_v37, %v4741_v37  ;;  %v2336_v39 = vsel %vm661_vm7, %v4741_v37, 0.0 }
 0x256   : > { %2293 = vst.msk [vmem:[%s4649_s26 + $0x3c] sm:$0xf] %vm2277_vm4, %v2844_v15  ;;  %v2331_v11 = vadd.f32 %v2330_v58, %v2329_v18 }
 0x257   : > { %2291 = vst.msk [vmem:[%s4649_s26 + $0x34] sm:$0xf] %vm2277_vm4, %v2842_v14  ;;  %v3010_v28 = vpop.f32.mrb[16].mxu0 }
 0x258   : > { %v2054_v33 = vpop.f32.mrb[17].mxu0  ;;  %v2333_v21 = vadd.f32 %v2332_v52, %v2331_v11 }
 0x259   : > { %v3011_v7 = vpop.f32.mrb[18].mxu0 }
 0x25a   : > { %v2057_v23 = vpop.f32.mrb[19].mxu0  ;;  %v2335_v1 = vadd.f32 %v2334_v60, %v2333_v21 }
 0x25c   : > { %v2337_v51 = vadd.f32 %v2336_v39, %v2335_v1 }
 0x25e   : > { %v2339_v8 = vadd.f32 %v2338_v31, %v2337_v51 }
 0x25f   : > { %v3014_v10 = vpop.f32.mrb[20].mxu0 }
 0x260   : > { %v2070_v63 = vpop.f32.mrb[21].mxu0  ;;  %v2341_v36 = vadd.f32 %v2340_v43, %v2339_v8 }
 0x261   : > { %v3015_v40 = vpop.f32.mrb[22].mxu0 }
 0x262   : > { %v2073_v19 = vpop.f32.mrb[23].mxu0 }
 0x267   : > { %v3018_v30 = vpop.f32.mrb[24].mxu0 }
 0x268   : > { %v2086_v57 = vpop.f32.mrb[25].mxu0 }
 0x269   : > { %v4767_v53 = vpop.f32.mrb[26].mxu0 }
 0x26a   : > { %v4769_v61 = vpop.f32.mrb[27].mxu0 }
 0x26f   : > { %v4773_v44 = vpop.f32.mrb[28].mxu0 }
 0x270   : > { %v2974_v2 = vpop.f32.mrb[16].mxu1  ;;  %v4775_v54 = vpop.f32.mrb[29].mxu0 }
 0x271   : > { %v4777_v16 = vadd.f32 %v3010_v28, %v2974_v2  ;;  %v1812_v35 = vpop.f32.mrb[17].mxu1  ;;  %v4779_v42 = vpop.f32.mrb[30].mxu0 }
 0x272   : > { %v4783_v13 = vadd.f32 %v2054_v33, %v1812_v35  ;;  %v2975_v56 = vpop.f32.mrb[18].mxu1  ;;  %v4785_v12 = vpop.f32.mrb[31].mxu0 }
 0x273   : > { %v2847_v32 = vpack.c.bf16 %v4777_v16, %v4777_v16  ;;  %v4789_v5 = vadd.f32 %v3011_v7, %v2975_v56  ;;  %v1815_v49 = vpop.f32.mrb[19].mxu1  ;;  %v2346_v14 = vsel %vm661_vm7, %v4777_v16, 0.0 }
 0x274   : > { %v2845_v27 = vpack.c.bf16 %v4783_v13, %v4783_v13  ;;  %v2342_v34 = vsel %vm661_vm7, %v4783_v13, 0.0  ;;  %v4795_v59 = vadd.f32 %v2057_v23, %v1815_v49 }
 0x275   : > { %2296 = vst.msk [vmem:[%s4649_s26 + $0x48] sm:$0xf] %vm2277_vm4, %v2847_v32  ;;  %v2343_v41 = vadd.f32 %v2342_v34, %v2341_v36  ;;  %v2848_v20 = vpack.c.bf16 %v4789_v5, %v4789_v5  ;;  %v2348_v7 = vsel %vm661_vm7, %v4789_v5, 0.0 }
 0x276   : > { %2294 = vst.msk [vmem:[%s4649_s26 + $0x40] sm:$0xf] %vm2277_vm4, %v2845_v27  ;;  %v2846_v55 = vpack.c.bf16 %v4795_v59, %v4795_v59  ;;  %v2344_v22 = vsel %vm661_vm7, %v4795_v59, 0.0 }
 0x277   : > { %2297 = vst.msk [vmem:[%s4649_s26 + $0x4c] sm:$0xf] %vm2277_vm4, %v2848_v20  ;;  %v2345_v15 = vadd.f32 %v2344_v22, %v2343_v41 }
 0x278   : > { %2295 = vst.msk [vmem:[%s4649_s26 + $0x44] sm:$0xf] %vm2277_vm4, %v2846_v55  ;;  %v2978_v17 = vpop.f32.mrb[20].mxu1 }
 0x279   : > { %v2347_v28 = vadd.f32 %v2346_v14, %v2345_v15  ;;  %v4813_v62 = vadd.f32 %v3014_v10, %v2978_v17  ;;  %v1828_v33 = vpop.f32.mrb[21].mxu1 }
 0x27a   : > { %v4817_v23 = vadd.f32 %v2070_v63, %v1828_v33  ;;  %v2979_v18 = vpop.f32.mrb[22].mxu1 }
 0x27b   : > { %v2851_v58 = vpack.c.bf16 %v4813_v62, %v4813_v62  ;;  %v2349_v11 = vadd.f32 %v2348_v7, %v2347_v28  ;;  %v4821_v52 = vadd.f32 %v3015_v40, %v2979_v18  ;;  %v1831_v21 = vpop.f32.mrb[23].mxu1 }
 0x27c   : > { %v2849_v10 = vpack.c.bf16 %v4817_v23, %v4817_v23  ;;  %v2350_v60 = vsel %vm661_vm7, %v4817_v23, 0.0  ;;  %v4827_v1 = vadd.f32 %v2073_v19, %v1831_v21  ;;  %v2354_v19 = vsel %vm661_vm7, %v4813_v62, 0.0 }
 0x27d   : > { %2300 = vst.msk [vmem:[%s4649_s26 + $0x58] sm:$0xf] %vm2277_vm4, %v2851_v58  ;;  %v2351_v63 = vadd.f32 %v2350_v60, %v2349_v11  ;;  %v2852_v39 = vpack.c.bf16 %v4821_v52, %v4821_v52  ;;  %v2356_v56 = vsel %vm661_vm7, %v4821_v52, 0.0 }
 0x27e   : > { %2298 = vst.msk [vmem:[%s4649_s26 + $0x50] sm:$0xf] %vm2277_vm4, %v2849_v10  ;;  %v2850_v40 = vpack.c.bf16 %v4827_v1, %v4827_v1  ;;  %v2352_v51 = vsel %vm661_vm7, %v4827_v1, 0.0 }
 0x27f   : > { %2301 = vst.msk [vmem:[%s4649_s26 + $0x5c] sm:$0xf] %vm2277_vm4, %v2852_v39  ;;  %v2353_v31 = vadd.f32 %v2352_v51, %v2351_v63 }
 0x280   : > { %2299 = vst.msk [vmem:[%s4649_s26 + $0x54] sm:$0xf] %vm2277_vm4, %v2850_v40  ;;  %v2982_v8 = vpop.f32.mrb[24].mxu1 }
 0x281   : > { %v2355_v2 = vadd.f32 %v2354_v19, %v2353_v31  ;;  %v4845_v35 = vadd.f32 %v3018_v30, %v2982_v8  ;;  %v1844_v43 = vpop.f32.mrb[25].mxu1 }
 0x282   : > { %v4849_v32 = vadd.f32 %v2086_v57, %v1844_v43  ;;  %v2983_v36 = vpop.f32.mrb[26].mxu1 }
 0x283   : > { %v2855_v49 = vpack.c.bf16 %v4845_v35, %v4845_v35  ;;  %v2357_v27 = vadd.f32 %v2356_v56, %v2355_v2  ;;  %v4854_v34 = vadd.f32 %v4767_v53, %v2983_v36  ;;  %v1847_v41 = vpop.f32.mrb[27].mxu1  ;;  %v2362_v14 = vsel %vm661_vm7, %v4845_v35, 0.0 }
 0x284   : > { %v2853_v30 = vpack.c.bf16 %v4849_v32, %v4849_v32  ;;  %v2358_v20 = vsel %vm661_vm7, %v4849_v32, 0.0  ;;  %v4861_v55 = vadd.f32 %v4769_v61, %v1847_v41 }
 0x285   : > { %2304 = vst.msk [vmem:[%s4649_s26 + $0x68] sm:$0xf] %vm2277_vm4, %v2855_v49  ;;  %v2359_v57 = vadd.f32 %v2358_v20, %v2357_v27  ;;  %v2856_v22 = vpack.c.bf16 %v4854_v34, %v4854_v34  ;;  %v2364_v18 = vsel %vm661_vm7, %v4854_v34, 0.0 }
 0x286   : > { %2302 = vst.msk [vmem:[%s4649_s26 + $0x60] sm:$0xf] %vm2277_vm4, %v2853_v30  ;;  %v2854_v53 = vpack.c.bf16 %v4861_v55, %v4861_v55  ;;  %v2360_v15 = vsel %vm661_vm7, %v4861_v55, 0.0 }
 0x287   : > { %2305 = vst.msk [vmem:[%s4649_s26 + $0x6c] sm:$0xf] %vm2277_vm4, %v2856_v22  ;;  %v2361_v61 = vadd.f32 %v2360_v15, %v2359_v57 }
 0x288   : > { %2303 = vst.msk [vmem:[%s4649_s26 + $0x64] sm:$0xf] %vm2277_vm4, %v2854_v53  ;;  %v2986_v17 = vpop.f32.mrb[28].mxu1 }
 0x289   : > { %v2363_v28 = vadd.f32 %v2362_v14, %v2361_v61  ;;  %v4880_v33 = vadd.f32 %v4773_v44, %v2986_v17  ;;  %v1860_v7 = vpop.f32.mrb[29].mxu1 }
 0x28a   : > { %v4885_v58 = vadd.f32 %v4775_v54, %v1860_v7  ;;  %v2987_v11 = vpop.f32.mrb[30].mxu1 }
 0x28b   : > { %v2859_v21 = vpack.c.bf16 %v4880_v33, %v4880_v33  ;;  %v2365_v10 = vadd.f32 %v2364_v18, %v2363_v28  ;;  %v4891_v60 = vadd.f32 %v4779_v42, %v2987_v11  ;;  %v1863_v44 = vpop.f32.mrb[31].mxu1  ;;  %v2370_v19 = vsel %vm661_vm7, %v4880_v33, 0.0 }
 0x28c   : > { %v2857_v63 = vpack.c.bf16 %v4885_v58, %v4885_v58  ;;  %v2366_v54 = vsel %vm661_vm7, %v4885_v58, 0.0  ;;  %v4899_v39 = vadd.f32 %v4785_v12, %v1863_v44 }
 0x28d   : > { %2308 = vst.msk [vmem:[%s4649_s26 + $0x78] sm:$0xf] %vm2277_vm4, %v2859_v21  ;;  %v2367_v40 = vadd.f32 %v2366_v54, %v2365_v10  ;;  %v2860_v42 = vpack.c.bf16 %v4891_v60, %v4891_v60 }
 0x28e   : > { %2306 = vst.msk [vmem:[%s4649_s26 + $0x70] sm:$0xf] %vm2277_vm4, %v2857_v63  ;;  %v2858_v51 = vpack.c.bf16 %v4899_v39, %v4899_v39  ;;  %v2368_v12 = vsel %vm661_vm7, %v4899_v39, 0.0 }
 0x28f   : > { %2309 = vst.msk [vmem:[%s4649_s26 + $0x7c] sm:$0xf] %vm2277_vm4, %v2860_v42  ;;  %v2369_v31 = vadd.f32 %v2368_v12, %v2367_v40 }
 0x290   : > { %2307 = vst.msk [vmem:[%s4649_s26 + $0x74] sm:$0xf] %vm2277_vm4, %v2858_v51 }
 0x291   : > { %v2371_v8 = vadd.f32 %v2370_v19, %v2369_v31 }
 0x292   : > { %3311 = shalt.err (!%p3308_p6)
}
 0x293   : > { %s3312_s23 = scalar_lea.hbm %s4908_s25, 2048  ;;  %s3316_s21 = scalar_lea.hbm %s5173_s3, 4096 }
 0x294   : > { %p3313_p8 = scmp.ne.s32.totalorder %s4908_s25, %s3312_s23  ;;  %p3317_p4 = scmp.lt.u32.totalorder %s4908_s25, %s5173_s3 }
 0x295   : > { %p3318_p11 = scmp.lt.u32.totalorder %s3316_s21, %s3312_s23  ;;  %p3320_p3 = scmp.lt.u32.totalorder %s3312_s23, %s4908_s25 }
 0x296   : > { %p3314_p10 = pnand %p3313_p8, %p3539_p12 }
 0x297   : > { %p3319_p13 = por %p3318_p11, %p3317_p4 }
 0x298   : > { %p3315_p0 = pneg %p3314_p10 }
 0x299   : > { %p3321_p7 = por %p3320_p3, %p3319_p13 }
 0x29b   : > { %p3322_p9 = pnand %p3321_p7, %p3315_p0 }
 0x29d   : > { %3325 = shalt.err (!%p3322_p9)
}
 0x29e   : > { %s3418_s28 = smov 64   ;;  %v2372_v2 = vsel %vm661_vm7, %v4891_v60, 0.0  ;;  %s2701_s26 = sshll.u32 %s3631_s24, 1  ;;  %vm2413_vm5 = vcmask 24576  }
 0x29f   : > { %3104 = dma.vmem_to_hbm [thread:$0]  (%p3539_p12), %s4916_s10, 2048, %s4908_s25, %s2518_s29, %s3418_s28, %s3418_s28, %s3413_s7   ;;  %v2373_v43 = vadd.f32 %v2372_v2, %v2371_v8 }
 0x2a0   : > { %s4954_s5 = scalar_lea.vmem [#allocation10], %s2701_s26  ;;  %s2824_s7 = sshll.u32 %s3466_s19, 5 }
 0x2a1   : > { %v2374_v56 = vrot.slane %v2373_v43, 4  ;;  %s2552_s10 = sshll.u32 %s4954_s5, 4  ;;  %s5124_s25 = scalar_lea.hbm %s5174_s4, %s2824_s7  ;;  %s5126_s10 = int_to_ptr.vmem [resolvable:$true] %s2552_s10 }
 0x2a2   : > { %s2523_s29 = scalar_lea.sflag [#allocation11], %s3631_s24  ;;  %s3326_s0 = scalar_lea.vmem %s5126_s10, 32 }
 0x2a3   : > { %v2375_v36 = vadd.f32 %v2374_v56, %v2373_v43  ;;  %p3327_p1 = scmp.ne.s32.totalorder %s5126_s10, %s3326_s0  ;;  %s3419_s19 = smov [#allocation10]  }
 0x2a4   : > { %s3330_s20 = sshll.u32 %s3419_s19, 4  ;;  %s3331_s20 = int_to_ptr.vmem [resolvable:$false] %s3330_s20 }
 0x2a5   : > { %v2376_v49 = vrot.slane %v2375_v36, 2  ;;  %p3328_p5 = pnand %p3327_p1, %p3539_p12  ;;  %s3332_s9 = scalar_lea.vmem %s3331_s20, 64 }
 0x2a6   : > { %p3333_p6 = scmp.lt.s32.totalorder %s5126_s10, %s3331_s20  ;;  %p3334_p8 = scmp.lt.s32.totalorder %s3332_s9, %s3326_s0 }
 0x2a7   : > { %v2377_v27 = vadd.f32 %v2376_v49, %v2375_v36  ;;  %p3329_p2 = pneg %p3328_p5 }
 0x2a8   : > { %p3335_p10 = por %p3334_p8, %p3333_p6 }
 0x2a9   : > { %v2378_v41 = vrot.slane %v2377_v27, 1 }
 0x2aa   : > { %p3336_p0 = pnand %p3335_p10, %p3329_p2 }
 0x2ab   : > { %v2379_v30 = vadd.f32 %v2378_v41, %v2377_v27 }
 0x2ad   : > { %v4952_v20 = vmul.f32 0.00390625, %v2379_v30 }
 0x2af   : > { %2414 = vst.msk [vmem:[%s4954_s5] sm:$0x1] %vm2413_vm5, %v4952_v20  ;;  %v4961_v57 = vsub.f32 %v4783_v13, %v4952_v20  ;;  %v4965_v22 = vsub.f32 %v4795_v59, %v4952_v20  ;;  %v4969_v53 = vsub.f32 %v4777_v16, %v4952_v20  ;;  %v4973_v15 = vsub.f32 %v4789_v5, %v4952_v20 }
 0x2b0   : > { %v4977_v61 = vsub.f32 %v4817_v23, %v4952_v20  ;;  %v4981_v13 = vsub.f32 %v4827_v1, %v4952_v20  ;;  %v4985_v59 = vsub.f32 %v4813_v62, %v4952_v20  ;;  %v4989_v16 = vsub.f32 %v4821_v52, %v4952_v20 }
 0x2b1   : > { %v4993_v5 = vsub.f32 %v4849_v32, %v4952_v20  ;;  %v4997_v23 = vsub.f32 %v4861_v55, %v4952_v20  ;;  %v5001_v1 = vsub.f32 %v4845_v35, %v4952_v20  ;;  %v5005_v62 = vsub.f32 %v4854_v34, %v4952_v20 }
 0x2b2   : > { %v5009_v52 = vsub.f32 %v4885_v58, %v4952_v20  ;;  %v5013_v32 = vsub.f32 %v4899_v39, %v4952_v20  ;;  %v5017_v55 = vsub.f32 %v4880_v33, %v4952_v20  ;;  %v5021_v35 = vsub.f32 %v4891_v60, %v4952_v20 }
 0x2b3   : > { %v2381_v34 = vsub.f32 %v4638_v6, %v4952_v20  ;;  %v2382_v14 = vsub.f32 %v4646_v3, %v4952_v20  ;;  %v2383_v17 = vsub.f32 %v4636_v9, %v4952_v20  ;;  %v2384_v28 = vsub.f32 %v4642_v45, %v4952_v20 }
 0x2b4   : > { %v2385_v33 = vsub.f32 %v4671_v46, %v4952_v20  ;;  %v2386_v11 = vsub.f32 %v4681_v0, %v4952_v20  ;;  %v2387_v9 = vsub.f32 %v4669_v26, %v4952_v20  ;;  %v2388_v46 = vsub.f32 %v4677_v25, %v4952_v20 }
 0x2b5   : > { %v2415_v7 = vmul.f32 %v2381_v34, %v2381_v34  ;;  %v2416_v18 = vmul.f32 %v2382_v14, %v2382_v14  ;;  %v2417_v58 = vmul.f32 %v2383_v17, %v2383_v17  ;;  %v2418_v21 = vmul.f32 %v2384_v28, %v2384_v28 }
 0x2b6   : > { %v2419_v60 = vmul.f32 %v2385_v33, %v2385_v33  ;;  %v2420_v63 = vmul.f32 %v2386_v11, %v2386_v11  ;;  %v2389_v39 = vsub.f32 %v4701_v29, %v4952_v20  ;;  %v2421_v40 = vmul.f32 %v2387_v9, %v2387_v9 }
 0x2b7   : > { %v2447_v6 = vsel %vm661_vm7, %v2415_v7, 0.0  ;;  %v2448_v3 = vsel %vm661_vm7, %v2416_v18, 0.0  ;;  %v2450_v45 = vsel %vm661_vm7, %v2417_v58, 0.0  ;;  %v2452_v54 = vsel %vm661_vm7, %v2418_v21, 0.0 }
 0x2b8   : > { %v2449_v10 = vadd.f32 %v2448_v3, %v2447_v6  ;;  %v2454_v42 = vsel %vm661_vm7, %v2419_v60, 0.0  ;;  %v2390_v26 = vsub.f32 %v4709_v47, %v4952_v20  ;;  %v2422_v12 = vmul.f32 %v2388_v46, %v2388_v46 }
 0x2b9   : > { %v2456_v31 = vsel %vm661_vm7, %v2420_v63, 0.0  ;;  %v2391_v25 = vsub.f32 %v4699_v38, %v4952_v20  ;;  %v2423_v8 = vmul.f32 %v2389_v39, %v2389_v39  ;;  %v2458_v2 = vsel %vm661_vm7, %v2421_v40, 0.0 }
 0x2ba   : > { %v2451_v44 = vadd.f32 %v2450_v45, %v2449_v10  ;;  %v2392_v29 = vsub.f32 %v4705_v24, %v4952_v20  ;;  %v2424_v56 = vmul.f32 %v2390_v26, %v2390_v26  ;;  %v2460_v36 = vsel %vm661_vm7, %v2422_v12, 0.0 }
 0x2bb   : > { %v2393_v47 = vsub.f32 %v4729_v50, %v4952_v20  ;;  %v2425_v27 = vmul.f32 %v2391_v25, %v2391_v25  ;;  %v2462_v41 = vsel %vm661_vm7, %v2423_v8, 0.0  ;;  %v2394_v38 = vsub.f32 %v4741_v37, %v4952_v20 }
 0x2bc   : > { %v2453_v0 = vadd.f32 %v2452_v54, %v2451_v44  ;;  %v2426_v34 = vmul.f32 %v2392_v29, %v2392_v29  ;;  %v2464_v14 = vsel %vm661_vm7, %v2424_v56, 0.0  ;;  %v2395_v24 = vsub.f32 %v4726_v48, %v4952_v20 }
 0x2bd   : > { %v2427_v28 = vmul.f32 %v2393_v47, %v2393_v47  ;;  %v2466_v7 = vsel %vm661_vm7, %v2425_v27, 0.0  ;;  %v2396_v50 = vsub.f32 %v4736_v4, %v4952_v20  ;;  %v2428_v33 = vmul.f32 %v2394_v38, %v2394_v38 }
 0x2be   : > { %v2455_v51 = vadd.f32 %v2454_v42, %v2453_v0  ;;  %v2468_v58 = vsel %vm661_vm7, %v2426_v34, 0.0  ;;  %v2429_v21 = vmul.f32 %v2395_v24, %v2395_v24  ;;  %v2431_v48 = vmul.f32 %v4961_v57, %v4961_v57 }
 0x2bf   : > { %v2470_v37 = vsel %vm661_vm7, %v2427_v28, 0.0  ;;  %v2430_v3 = vmul.f32 %v2396_v50, %v2396_v50  ;;  %v2472_v10 = vsel %vm661_vm7, %v2428_v33, 0.0  ;;  %v2432_v4 = vmul.f32 %v4965_v22, %v4965_v22 }
 0x2c0   : > { %v2457_v19 = vadd.f32 %v2456_v31, %v2455_v51  ;;  %v2474_v60 = vsel %vm661_vm7, %v2429_v21, 0.0  ;;  %v2433_v46 = vmul.f32 %v4969_v53, %v4969_v53  ;;  %v2478_v63 = vsel %vm661_vm7, %v2431_v48, 0.0 }
 0x2c1   : > { %v2476_v20 = vsel %vm661_vm7, %v2430_v3, 0.0  ;;  %v2434_v0 = vmul.f32 %v4973_v15, %v4973_v15  ;;  %v2480_v57 = vsel %vm661_vm7, %v2432_v4, 0.0  ;;  %v2435_v40 = vmul.f32 %v4977_v61, %v4977_v61 }
 0x2c2   : > { %v2459_v43 = vadd.f32 %v2458_v2, %v2457_v19  ;;  %v2482_v22 = vsel %vm661_vm7, %v2433_v46, 0.0  ;;  %v2436_v51 = vmul.f32 %v4981_v13, %v4981_v13  ;;  %v2437_v12 = vmul.f32 %v4985_v59, %v4985_v59 }
 0x2c3   : > { %v2484_v53 = vsel %vm661_vm7, %v2434_v0, 0.0  ;;  %v2486_v15 = vsel %vm661_vm7, %v2435_v40, 0.0  ;;  %v2438_v19 = vmul.f32 %v4989_v16, %v4989_v16  ;;  %v2439_v8 = vmul.f32 %v4993_v5, %v4993_v5 }
 0x2c4   : > { %v2461_v49 = vadd.f32 %v2460_v36, %v2459_v43  ;;  %v2488_v61 = vsel %vm661_vm7, %v2436_v51, 0.0  ;;  %v2490_v13 = vsel %vm661_vm7, %v2437_v12, 0.0  ;;  %v2440_v43 = vmul.f32 %v4997_v23, %v4997_v23 }
 0x2c5   : > { %v2492_v59 = vsel %vm661_vm7, %v2438_v19, 0.0  ;;  %v2441_v56 = vmul.f32 %v5001_v1, %v5001_v1  ;;  %v2494_v16 = vsel %vm661_vm7, %v2439_v8, 0.0  ;;  %v2443_v27 = vmul.f32 %v5009_v52, %v5009_v52 }
 0x2c6   : > { %v2463_v30 = vadd.f32 %v2462_v41, %v2461_v49  ;;  %v2442_v49 = vmul.f32 %v5005_v62, %v5005_v62  ;;  %v2496_v5 = vsel %vm661_vm7, %v2440_v43, 0.0  ;;  %v2445_v62 = vmul.f32 %v5017_v55, %v5017_v55 }
 0x2c7   : > { %v2498_v23 = vsel %vm661_vm7, %v2441_v56, 0.0  ;;  %v2502_v34 = vsel %vm661_vm7, %v2443_v27, 0.0  ;;  %v2446_v52 = vmul.f32 %v5021_v35, %v5021_v35 }
 0x2c8   : > { %v2465_v17 = vadd.f32 %v2464_v14, %v2463_v30  ;;  %v2444_v30 = vmul.f32 %v5013_v32, %v5013_v32  ;;  %v2500_v1 = vsel %vm661_vm7, %v2442_v49, 0.0  ;;  %v2506_v32 = vsel %vm661_vm7, %v2445_v62, 0.0 }
 0x2ca   : > { %v2467_v18 = vadd.f32 %v2466_v7, %v2465_v17  ;;  %v2504_v17 = vsel %vm661_vm7, %v2444_v30, 0.0  ;;  %v2508_v7 = vsel %vm661_vm7, %v2446_v52, 0.0 }
 0x2cc   : > { %v2469_v11 = vadd.f32 %v2468_v58, %v2467_v18 }
 0x2ce   : > { %v2471_v6 = vadd.f32 %v2470_v37, %v2469_v11 }
 0x2d0   : > { %v2473_v9 = vadd.f32 %v2472_v10, %v2471_v6 }
 0x2d2   : > { %v2475_v45 = vadd.f32 %v2474_v60, %v2473_v9 }
 0x2d4   : > { %v2477_v44 = vadd.f32 %v2476_v20, %v2475_v45 }
 0x2d6   : > { %v2479_v54 = vadd.f32 %v2478_v63, %v2477_v44 }
 0x2d8   : > { %v2481_v39 = vadd.f32 %v2480_v57, %v2479_v54 }
 0x2da   : > { %v2483_v42 = vadd.f32 %v2482_v22, %v2481_v39 }
 0x2dc   : > { %v2485_v26 = vadd.f32 %v2484_v53, %v2483_v42 }
 0x2de   : > { %v2487_v31 = vadd.f32 %v2486_v15, %v2485_v26 }
 0x2e0   : > { %v2489_v25 = vadd.f32 %v2488_v61, %v2487_v31 }
 0x2e2   : > { %v2491_v2 = vadd.f32 %v2490_v13, %v2489_v25 }
 0x2e4   : > { %v2493_v29 = vadd.f32 %v2492_v59, %v2491_v2 }
 0x2e6   : > { %v2495_v36 = vadd.f32 %v2494_v16, %v2493_v29 }
 0x2e8   : > { %v2497_v47 = vadd.f32 %v2496_v5, %v2495_v36 }
 0x2ea   : > { %v2499_v41 = vadd.f32 %v2498_v23, %v2497_v47 }
 0x2ec   : > { %v2501_v38 = vadd.f32 %v2500_v1, %v2499_v41 }
 0x2ee   : > { %v2503_v14 = vadd.f32 %v2502_v34, %v2501_v38 }
 0x2f0   : > { %v2505_v24 = vadd.f32 %v2504_v17, %v2503_v14 }
 0x2f2   : > { %v2507_v28 = vadd.f32 %v2506_v32, %v2505_v24 }
 0x2f4   : > { %v2509_v18 = vadd.f32 %v2508_v7, %v2507_v28 }
 0x2f6   : > { %v2510_v50 = vrot.slane %v2509_v18, 4 }
 0x2f8   : > { %v2511_v55 = vadd.f32 %v2510_v50, %v2509_v18 }
 0x2fa   : > { %v2512_v33 = vrot.slane %v2511_v55, 2 }
 0x2fc   : > { %v2513_v58 = vadd.f32 %v2512_v33, %v2511_v55 }
 0x2fe   : > { %v2514_v11 = vrot.slane %v2513_v58, 1 }
 0x300   : > { %v2515_v35 = vadd.f32 %v2514_v11, %v2513_v58 }
 0x302   : > { %2516 = vst.msk [vmem:[%s4954_s5 + $0x1] sm:$0x1] %vm2413_vm5, %v2515_v35 }
 0x303   : > { %3339 = shalt.err (!%p3336_p0)
}
 0x304   : > { %s3340_s24 = scalar_lea.hbm %s5124_s25, 32  ;;  %s3344_s14 = scalar_lea.hbm %s5174_s4, 64 }
 0x305   : > { %p3341_p4 = scmp.ne.s32.totalorder %s5124_s25, %s3340_s24  ;;  %p3345_p3 = scmp.lt.u32.totalorder %s5124_s25, %s5174_s4 }
 0x306   : > { %p3346_p7 = scmp.lt.u32.totalorder %s3344_s14, %s3340_s24  ;;  %p3348_p1 = scmp.lt.u32.totalorder %s3340_s24, %s5124_s25 }
 0x307   : > { %p3342_p11 = pnand %p3341_p4, %p3539_p12 }
 0x308   : > { %p3347_p9 = por %p3346_p7, %p3345_p3 }
 0x309   : > { %p3343_p13 = pneg %p3342_p11 }
 0x30a   : > { %p3349_p5 = por %p3348_p1, %p3347_p9 }
 0x30c   : > { %p3350_p2 = pnand %p3349_p5, %p3343_p13 }
 0x30e   : > { %3353 = shalt.err (!%p3350_p2)
}
 0x30f   : > { %3105 = dma.vmem_to_hbm [thread:$0]  (%p3539_p12), %s5126_s10, 32, %s5124_s25, %s2523_s29  }
 0x310 PF: > { %s2564_s13 = sand.u32 1, %s3392_s15   ;;  %p5264_p6 = scmp.ne.s32.totalorder %s5208_s22, 0 }
 0x311   : > { %p5265_p8 = scmp.ge.s32.totalorder %s3404_s18, 2  ;;  %s2565_s8 = scalar_lea.sflag [#allocation5], %s2564_s13 }
 0x313   : > { %p3120_p10 = pnand %p5265_p8, %p5264_p6 }
 0x315   : > { %3383 = dma.done.wait (!%p3120_p10), %s2565_s8, 2048  }
 0x316   : > { %3385 = vsyncadd (!%p3120_p10), %s2565_s8, 4294965248  ;;  %s2574_s28 = scalar_lea.sflag [#allocation11], %s2564_s13 }
 0x317   : > { %3387 = dma.done.wait (!%p3120_p10), %s2574_s28, 32  }
 0x318   : > { %3389 = vsyncadd (!%p3120_p10), %s2574_s28, 4294967264  ;;  %s5266_s30 = sld [smem:[#allocation17_spill]]  ;;  %p24_p12 = scmp.ge.s32.totalorder %s3501_s27, 4  }
 0x319   : > { %s5267_s15 = smov %s3396_s16  ;;  %s5268_s16 = smov %s3400_s17 }
 0x31a   : > { %s5270_s18 = smov %s3501_s27  ;;  %26 = sbr.rel (!%p24_p12) target bundleno = 12 (0xc), region = 116 }
 0x31e   : > { %s5269_s17 = smov %s5266_s30 }
 0x321   :  { %2579 = vsyncpa [#allocation4], 1 }
 0x322   :  { %2581 = vsyncpa [#allocation4 + $0x1], 1 }
 0x323   :  { %2582 = vsyncpa [#allocation7], 1 }
 0x324   :  { %2584 = vsyncpa [#allocation7 + $0x1], 1 }
 0x325   :  { %2585 = vsyncpa [#allocation5], 1 }
 0x326   :  { %2587 = vsyncpa [#allocation5 + $0x1], 1 }
 0x327   :  { %2588 = vsyncpa [#allocation11], 1 }
 0x328   :  { %2590 = vsyncpa [#allocation11 + $0x1], 1 }

</bundles_post_ra>
